<compile_context>
chip_gen: v6e
topology: v6e:2x2x1
jax: 0.10.0
libtpu: 0.0.40
codegen_flags: <defaults>
</compile_context>

<pallas_src>
import functools
import math

import jax
import jax.numpy as jnp
from jax.experimental import pallas as pl
from jax.experimental.pallas import tpu as pltpu

_BF16 = jnp.bfloat16


# ----------------------------- in-kernel helpers -----------------------------

def _layer_norm(x, g, b, eps=1e-5):
    mu = jnp.mean(x, axis=-1, keepdims=True)
    var = jnp.mean((x - mu) ** 2, axis=-1, keepdims=True)
    return (x - mu) * jax.lax.rsqrt(var + eps) * g + b


def _attention(q, k, v, heads, mask_add):
    """Scaled-dot-product attention over already-projected q/k/v.

    q: (Lq, D) f32, k/v: (Lk, D) f32, mask_add: additive (Lq, Lk) mask or None.
    Heads are static lane slices of width dh; score/AV matmuls are inherently
    per-head (K = dh) — the big projections are fused outside this helper.
    Returns (Lq, D) f32.
    """
    _, D = q.shape
    dh = D // heads
    scale = 1.0 / math.sqrt(dh)
    outs = []
    for h in range(heads):                                     # static unroll
        sl = slice(h * dh, (h + 1) * dh)
        s = jax.lax.dot_general(
            q[:, sl].astype(_BF16), k[:, sl].astype(_BF16),
            (((1,), (1,)), ((), ())),
            preferred_element_type=jnp.float32) * scale        # (Lq, Lk)
        if mask_add is not None:
            s = s + mask_add
        s = s - jnp.max(s, axis=-1, keepdims=True)
        p = jnp.exp(s)
        p = p * pl.reciprocal(jnp.sum(p, axis=-1, keepdims=True), approx=False)
        outs.append(jnp.dot(p.astype(_BF16), v[:, sl].astype(_BF16),
                            preferred_element_type=jnp.float32))   # (Lq, dh)
    return jnp.concatenate(outs, axis=-1)                      # (Lq, D)


def _self_attn(xn, wqkv, bqkv, wo, bo, heads, mask_add):
    """Fused-QKV self-attention.  wqkv: (D, 3D) bf16, wo: (D, D) bf16."""
    D = xn.shape[-1]
    qkv = jnp.dot(xn.astype(_BF16), wqkv,
                  preferred_element_type=jnp.float32) + bqkv       # (L, 3D)
    q, k, v = qkv[:, :D], qkv[:, D:2 * D], qkv[:, 2 * D:]
    a = _attention(q, k, v, heads, mask_add)
    return jnp.dot(a.astype(_BF16), wo, preferred_element_type=jnp.float32) + bo


def _cross_attn(xn, zn, wq, bq, wkv, bkv, wo, bo, heads):
    """Cross-attention: Q from xn, fused K/V from zn."""
    D = xn.shape[-1]
    q = jnp.dot(xn.astype(_BF16), wq, preferred_element_type=jnp.float32) + bq
    kv = jnp.dot(zn.astype(_BF16), wkv, preferred_element_type=jnp.float32) + bkv
    k, v = kv[:, :D], kv[:, D:]
    a = _attention(q, k, v, heads, None)
    return jnp.dot(a.astype(_BF16), wo, preferred_element_type=jnp.float32) + bo


def _ffn(xn, w1, b1, w2, b2):
    h = jnp.dot(xn.astype(_BF16), w1, preferred_element_type=jnp.float32) + b1
    h = jax.nn.gelu(h, approximate=True)
    return jnp.dot(h.astype(_BF16), w2, preferred_element_type=jnp.float32) + b2


# ----------------------------- Pallas kernels -----------------------------

def encoder_kernel(x_ref,
                   ln1_g, ln1_b, wqkv, bqkv, wo, bo,
                   ln2_g, ln2_b, w1, b1, w2, b2,
                   o_ref, *, heads):
    """grid=(B, depth): o_ref block is resident across the depth axis and
    carries the residual stream; weights are the depth-indexed layer slice."""
    d = pl.program_id(1)

    @pl.when(d == 0)
    def _():
        o_ref[...] = x_ref[...]

    x = o_ref[...]                                             # (L, D) f32
    xn = _layer_norm(x, ln1_g[...], ln1_b[...])
    x = x + _self_attn(xn, wqkv[...], bqkv[...], wo[...], bo[...], heads, None)
    xn = _layer_norm(x, ln2_g[...], ln2_b[...])
    x = x + _ffn(xn, w1[...], b1[...], w2[...], b2[...])
    o_ref[...] = x


def decoder_kernel(x_ref, z_ref, mask_ref,
                   sa_g, sa_b, swqkv, sbqkv, swo, sbo,
                   cx_g, cx_b, cz_g, cz_b,
                   cwq, cbq, cwkv, cbkv, cwo, cbo,
                   ff_g, ff_b, w1, b1, w2, b2,
                   hg, hb, fw, fb,
                   o_ref, res_ref, *, heads):
    """grid=(B, depth): residual lives in VMEM scratch across the depth axis;
    the final LayerNorm + vocab projection is fused into the last step."""
    d = pl.program_id(1)

    @pl.when(d == 0)
    def _():
        res_ref[...] = x_ref[...]

    x = res_ref[...]                                           # (L, D) f32
    # causal self-attention
    xn = _layer_norm(x, sa_g[...], sa_b[...])
    x = x + _self_attn(xn, swqkv[...], sbqkv[...], swo[...], sbo[...], heads,
                       mask_ref[...])
    # cross-attention on the (per-layer normed) encoder memory
    xn = _layer_norm(x, cx_g[...], cx_b[...])
    zn = _layer_norm(z_ref[...], cz_g[...], cz_b[...])
    x = x + _cross_attn(xn, zn, cwq[...], cbq[...], cwkv[...], cbkv[...],
                        cwo[...], cbo[...], heads)
    # feed-forward
    xn = _layer_norm(x, ff_g[...], ff_b[...])
    x = x + _ffn(xn, w1[...], b1[...], w2[...], b2[...])
    res_ref[...] = x

    # fused head: final LayerNorm + vocab projection (lane-dense V)
    @pl.when(d == pl.num_programs(1) - 1)
    def _():
        xn_f = _layer_norm(x, hg[...], hb[...])
        o_ref[...] = (jnp.dot(xn_f.astype(_BF16), fw[...],
                              preferred_element_type=jnp.float32) + fb[...])


# ----------------------------- pallas_call wrappers -----------------------------

_COMPILER_PARAMS = pltpu.CompilerParams(
    dimension_semantics=("parallel", "arbitrary"),   # batch || , depth sequential
    vmem_limit_bytes=64 * 1024 * 1024,               # safe on v5e/v6e/v7x
)

ENC_KEYS = ["ln1_g", "ln1_b", "wqkv", "bqkv", "wo", "bo",
            "ln2_g", "ln2_b", "w1", "b1", "w2", "b2"]

DEC_KEYS = ["sa_g", "sa_b", "swqkv", "sbqkv", "swo", "sbo",
            "cx_g", "cx_b", "cz_g", "cz_b",
            "cwq", "cbq", "cwkv", "cbkv", "cwo", "cbo",
            "ff_g", "ff_b", "w1", "b1", "w2", "b2"]

HEAD_KEYS = ["hg", "hb", "fw", "fb"]


def _batch_spec(shape):
    """(B, L, D) activation: per-batch block, resident across the depth axis."""
    return pl.BlockSpec((pl.Squeezed(),) + tuple(shape[1:]),
                        lambda b, d: (b, 0, 0))


def _layer_spec(shape):
    """(depth, ...) stacked per-layer weights: depth-indexed block."""
    nd = len(shape) - 1
    return pl.BlockSpec((pl.Squeezed(),) + tuple(shape[1:]),
                        lambda b, d, _nd=nd: (d,) + (0,) * _nd)


def _const_spec(shape):
    """Layer/batch-invariant constant block (full array)."""
    nd = len(shape)
    return pl.BlockSpec(tuple(shape), lambda b, d, _nd=nd: (0,) * _nd)


def run_encoder(x, kp, heads):
    B, L, D = x.shape
    depth = kp["wqkv"].shape[0]
    arrays = [kp[k] for k in ENC_KEYS]
    return pl.pallas_call(
        functools.partial(encoder_kernel, heads=heads),
        out_shape=jax.ShapeDtypeStruct((B, L, D), jnp.float32),
        grid=(B, depth),
        in_specs=[_batch_spec(x.shape)] + [_layer_spec(a.shape) for a in arrays],
        out_specs=_batch_spec((B, L, D)),
        compiler_params=_COMPILER_PARAMS,
    )(x, *arrays)


def run_decoder(x, z, mask_add, kp, head_kp, heads):
    B, L, D = x.shape
    depth = kp["swqkv"].shape[0]
    V = head_kp["fw"].shape[1]
    arrays = [kp[k] for k in DEC_KEYS]
    head_arrays = [head_kp[k] for k in HEAD_KEYS]
    in_specs = ([_batch_spec(x.shape), _batch_spec(z.shape),
                 _const_spec(mask_add.shape)]
                + [_layer_spec(a.shape) for a in arrays]
                + [_const_spec(a.shape) for a in head_arrays])
    return pl.pallas_call(
        functools.partial(decoder_kernel, heads=heads),
        out_shape=jax.ShapeDtypeStruct((B, L, V), jnp.float32),
        grid=(B, depth),
        in_specs=in_specs,
        out_specs=_batch_spec((B, L, V)),
        scratch_shapes=[pltpu.VMEM((L, D), jnp.float32)],   # resident residual
        compiler_params=_COMPILER_PARAMS,
    )(x, z, mask_add, *arrays, *head_arrays)


# ----------------------------- parameter plumbing -----------------------------

def _init_linear(key, din, dout, std=0.02):
    kw, kb = jax.random.split(key)
    w = (std * jax.random.normal(kw, (din, dout))).astype(jnp.float32)
    b = (std * jax.random.normal(kb, (dout,))).astype(jnp.float32)
    return w, b


def init_attn_params(key, d_q, d_kv, d_model):
    kq, kk, kv, ko = jax.random.split(key, 4)
    wq, bq = _init_linear(kq, d_q, d_model)
    wk, bk = _init_linear(kk, d_kv, d_model)
    wv, bv = _init_linear(kv, d_kv, d_model)
    wo, bo = _init_linear(ko, d_model, d_model)
    return dict(wq=wq, bq=bq, wk=wk, bk=bk, wv=wv, bv=bv, wo=wo, bo=bo)


def init_encoder_block(key, D, Dff):
    k_attn, k1, k2 = jax.random.split(key, 3)
    w1, b1 = _init_linear(k1, D, Dff)
    w2, b2 = _init_linear(k2, Dff, D)
    ones, zeros = jnp.ones((D,), jnp.float32), jnp.zeros((D,), jnp.float32)
    return dict(ln1_g=ones, ln1_b=zeros, attn=init_attn_params(k_attn, D, D, D),
                ln2_g=ones, ln2_b=zeros, w1=w1, b1=b1, w2=w2, b2=b2)


def init_decoder_block(key, D, Dc, Dff):
    k_sa, k_ca, k1, k2 = jax.random.split(key, 4)
    w1, b1 = _init_linear(k1, D, Dff)
    w2, b2 = _init_linear(k2, Dff, D)
    ones, zeros = jnp.ones((D,), jnp.float32), jnp.zeros((D,), jnp.float32)
    return dict(sa_g=ones, sa_b=zeros, self_attn=init_attn_params(k_sa, D, D, D),
                cx_g=ones, cx_b=zeros,
                cz_g=jnp.ones((Dc,), jnp.float32), cz_b=jnp.zeros((Dc,), jnp.float32),
                cross_attn=init_attn_params(k_ca, D, Dc, D),
                ff_g=ones, ff_b=zeros, w1=w1, b1=b1, w2=w2, b2=b2)


def _stack(layers):
    return {k: jnp.stack([l[k] for l in layers], axis=0) for k in layers[0]}


def enc_params_to_kernel(params_list):
    """Per-layer dicts -> fused-QKV bf16 weights stacked on a leading layer axis."""
    def one(p):
        a = p["attn"]
        return dict(
            ln1_g=p["ln1_g"][None], ln1_b=p["ln1_b"][None],
            wqkv=jnp.concatenate([a["wq"], a["wk"], a["wv"]], 1).astype(_BF16),
            bqkv=jnp.concatenate([a["bq"], a["bk"], a["bv"]], 0)[None],
            wo=a["wo"].astype(_BF16), bo=a["bo"][None],
            ln2_g=p["ln2_g"][None], ln2_b=p["ln2_b"][None],
            w1=p["w1"].astype(_BF16), b1=p["b1"][None],
            w2=p["w2"].astype(_BF16), b2=p["b2"][None])
    return _stack([one(p) for p in params_list])


def dec_params_to_kernel(params_list):
    def one(p):
        sa, ca = p["self_attn"], p["cross_attn"]
        return dict(
            sa_g=p["sa_g"][None], sa_b=p["sa_b"][None],
            swqkv=jnp.concatenate([sa["wq"], sa["wk"], sa["wv"]], 1).astype(_BF16),
            sbqkv=jnp.concatenate([sa["bq"], sa["bk"], sa["bv"]], 0)[None],
            swo=sa["wo"].astype(_BF16), sbo=sa["bo"][None],
            cx_g=p["cx_g"][None], cx_b=p["cx_b"][None],
            cz_g=p["cz_g"][None], cz_b=p["cz_b"][None],
            cwq=ca["wq"].astype(_BF16), cbq=ca["bq"][None],
            cwkv=jnp.concatenate([ca["wk"], ca["wv"]], 1).astype(_BF16),
            cbkv=jnp.concatenate([ca["bk"], ca["bv"]], 0)[None],
            cwo=ca["wo"].astype(_BF16), cbo=ca["bo"][None],
            ff_g=p["ff_g"][None], ff_b=p["ff_b"][None],
            w1=p["w1"].astype(_BF16), b1=p["b1"][None],
            w2=p["w2"].astype(_BF16), b2=p["b2"][None])
    return _stack([one(p) for p in params_list])


# ----------------------------- glue + pure-JAX reference -----------------------------

def sinusoidal_pe(L, D):
    pos = jnp.arange(L, dtype=jnp.float32)[:, None]
    i = jnp.arange(D // 2, dtype=jnp.float32)[None, :]
    freq = jnp.exp(-math.log(10000.0) * (2.0 * i / D))
    ang = pos * freq
    pe = jnp.zeros((L, D), jnp.float32)
    pe = pe.at[:, 0::2].set(jnp.sin(ang))
    pe = pe.at[:, 1::2].set(jnp.cos(ang))
    return pe


def ref_layer_norm(x, g, b, eps=1e-5):
    mu = x.mean(-1, keepdims=True)
    var = ((x - mu) ** 2).mean(-1, keepdims=True)
    return (x - mu) / jnp.sqrt(var + eps) * g + b


def ref_mha(xq, xkv, p, H, mask=None):
    B, Lq, _ = xq.shape
    Lk = xkv.shape[1]
    D = p["wo"].shape[0]
    dh = D // H
    q = xq @ p["wq"] + p["bq"]
    k = xkv @ p["wk"] + p["bk"]
    v = xkv @ p["wv"] + p["bv"]
    qh = q.reshape(B, Lq, H, dh).transpose(0, 2, 1, 3)
    kh = k.reshape(B, Lk, H, dh).transpose(0, 2, 1, 3)
    vh = v.reshape(B, Lk, H, dh).transpose(0, 2, 1, 3)
    s = jnp.einsum("bhqd,bhkd->bhqk", qh, kh) / math.sqrt(dh)
    if mask is not None:
        s = jnp.where(mask[None, None].astype(bool), s, -1e30)
    a = jax.nn.softmax(s, axis=-1)
    o = jnp.einsum("bhqk,bhkd->bhqd", a, vh).transpose(0, 2, 1, 3).reshape(B, Lq, D)
    return o @ p["wo"] + p["bo"]


def ref_ffn(x, w1, b1, w2, b2):
    return jax.nn.gelu(x @ w1 + b1, approximate=True) @ w2 + b2


def ref_encoder_block(x, p, H):
    xn = ref_layer_norm(x, p["ln1_g"], p["ln1_b"])
    x = x + ref_mha(xn, xn, p["attn"], H)
    xn = ref_layer_norm(x, p["ln2_g"], p["ln2_b"])
    return x + ref_ffn(xn, p["w1"], p["b1"], p["w2"], p["b2"])


def ref_decoder_block(x, z, p, H, mask):
    xn = ref_layer_norm(x, p["sa_g"], p["sa_b"])
    x = x + ref_mha(xn, xn, p["self_attn"], H, mask=mask)
    xn = ref_layer_norm(x, p["cx_g"], p["cx_b"])
    zn = ref_layer_norm(z, p["cz_g"], p["cz_b"])
    x = x + ref_mha(xn, zn, p["cross_attn"], H)
    xn = ref_layer_norm(x, p["ff_g"], p["ff_b"])
    return x + ref_ffn(xn, p["w1"], p["b1"], p["w2"], p["b2"])


# ----------------------------- driver -----------------------------

if __name__ == "__main__":
    B, L_DEC, L_ENC = 2, 8, 8
    D, HEADS, DFF = 64, 4, 256
    DEPTH_ENC, DEPTH_DEC, VOCAB = 2, 2, 128   # small vocab, lane-dense head out

    key = jax.random.PRNGKey(0)
    k_xt, k_zt, k_embe, k_embd, k_head, k_blocks = jax.random.split(key, 6)
    k_enc = jax.random.split(jax.random.fold_in(k_blocks, 0), DEPTH_ENC)
    k_dec = jax.random.split(jax.random.fold_in(k_blocks, 1), DEPTH_DEC)

    x_tkns = jax.random.randint(k_xt, (B, L_DEC), 0, VOCAB)
    z_tkns = jax.random.randint(k_zt, (B, L_ENC), 0, VOCAB)
    enc_embed = (0.02 * jax.random.normal(k_embe, (VOCAB, D))).astype(jnp.float32)
    dec_embed = (0.02 * jax.random.normal(k_embd, (VOCAB, D))).astype(jnp.float32)

    enc_params = [init_encoder_block(k, D, DFF) for k in k_enc]
    dec_params = [init_decoder_block(k, D, D, DFF) for k in k_dec]
    fc_w, fc_b = _init_linear(k_head, D, VOCAB)
    head_g = jnp.ones((D,), jnp.float32)
    head_b = jnp.zeros((D,), jnp.float32)

    enc_kp = enc_params_to_kernel(enc_params)
    dec_kp = dec_params_to_kernel(dec_params)
    head_kp = dict(hg=head_g[None], hb=head_b[None],
                   fw=fc_w.astype(_BF16), fb=fc_b[None])

    pe_enc = sinusoidal_pe(L_ENC, D)
    pe_dec = sinusoidal_pe(L_DEC, D)
    causal = jnp.tril(jnp.ones((L_DEC, L_DEC), jnp.float32))
    mask_add = jnp.where(causal > 0, 0.0, -1e30).astype(jnp.float32)

    # ---------- Pallas hot path ----------
    # TODO(synk): token-embedding gather + PE table stay in plain JAX (data-
    # dependent gather has no clean BlockSpec equivalent at this scale).
    @jax.jit
    def forward(x_tkns, z_tkns):
        z = run_encoder(enc_embed[z_tkns] + pe_enc[None], enc_kp, HEADS)
        x = dec_embed[x_tkns] + pe_dec[None]
        return run_decoder(x, z, mask_add, dec_kp, head_kp, HEADS)

    logits = jax.block_until_ready(forward(x_tkns, z_tkns))

    # ---------- pure-JAX reference ----------
    z_ref = enc_embed[z_tkns] + pe_enc[None]
    for p in enc_params:
        z_ref = ref_encoder_block(z_ref, p, HEADS)
    x_ref = dec_embed[x_tkns] + pe_dec[None]
    for p in dec_params:
        x_ref = ref_decoder_block(x_ref, z_ref, p, HEADS, causal)
    logits_ref = ref_layer_norm(x_ref, head_g, head_b) @ fc_w + fc_b

    assert logits.shape == (B, L_DEC, VOCAB)
    max_err = float(jnp.max(jnp.abs(logits - logits_ref)))
    assert jnp.allclose(logits, logits_ref, atol=2e-2, rtol=2e-2), max_err
    print("KERNEL_OK")
</pallas_src>

<mosaic_0001>
module attributes {stable_mosaic.version = 11 : i64} {
  func.func @encoder_kernel(%arg0: i32, %arg1: i32, %arg2: memref<1x8x64xf32, #tpu.memory_space<vmem>>, %arg3: memref<1x1x64xf32, #tpu.memory_space<vmem>>, %arg4: memref<1x1x64xf32, #tpu.memory_space<vmem>>, %arg5: memref<1x64x192xbf16, #tpu.memory_space<vmem>>, %arg6: memref<1x1x192xf32, #tpu.memory_space<vmem>>, %arg7: memref<1x64x64xbf16, #tpu.memory_space<vmem>>, %arg8: memref<1x1x64xf32, #tpu.memory_space<vmem>>, %arg9: memref<1x1x64xf32, #tpu.memory_space<vmem>>, %arg10: memref<1x1x64xf32, #tpu.memory_space<vmem>>, %arg11: memref<1x64x256xbf16, #tpu.memory_space<vmem>>, %arg12: memref<1x1x256xf32, #tpu.memory_space<vmem>>, %arg13: memref<1x256x64xbf16, #tpu.memory_space<vmem>>, %arg14: memref<1x1x64xf32, #tpu.memory_space<vmem>>, %arg15: memref<1x8x64xf32, #tpu.memory_space<vmem>>) attributes {dimension_semantics = [#tpu.dimension_semantics<parallel>, #tpu.dimension_semantics<arbitrary>], iteration_bounds = array<i64: 2, 2>, scalar_prefetch = 0 : i64, scratch_operands = 0 : i64, tpu.core_type = #tpu.core_type<tc>, window_params = [{transform_indices = @transform_0, window_bounds = array<i64: 1, 8, 64>}, {transform_indices = @transform_1, window_bounds = array<i64: 1, 1, 64>}, {transform_indices = @transform_2, window_bounds = array<i64: 1, 1, 64>}, {transform_indices = @transform_3, window_bounds = array<i64: 1, 64, 192>}, {transform_indices = @transform_4, window_bounds = array<i64: 1, 1, 192>}, {transform_indices = @transform_5, window_bounds = array<i64: 1, 64, 64>}, {transform_indices = @transform_6, window_bounds = array<i64: 1, 1, 64>}, {transform_indices = @transform_7, window_bounds = array<i64: 1, 1, 64>}, {transform_indices = @transform_8, window_bounds = array<i64: 1, 1, 64>}, {transform_indices = @transform_9, window_bounds = array<i64: 1, 64, 256>}, {transform_indices = @transform_10, window_bounds = array<i64: 1, 1, 256>}, {transform_indices = @transform_11, window_bounds = array<i64: 1, 256, 64>}, {transform_indices = @transform_12, window_bounds = array<i64: 1, 1, 64>}, {transform_indices = @transform_13, window_bounds = array<i64: 1, 8, 64>}]} {
    %c0_i32 = arith.constant 0 : i32
    %0 = arith.cmpi eq, %arg1, %c0_i32 : i32
    %1 = arith.extui %0 : i1 to i32
    %c0_i32_0 = arith.constant 0 : i32
    %2 = arith.cmpi ne, %1, %c0_i32_0 : i32
    scf.if %2 {
      %c0_79 = arith.constant 0 : index
      %c0_80 = arith.constant 0 : index
      %c0_81 = arith.constant 0 : index
      %195 = vector.load %arg2[%c0_79, %c0_80, %c0_81] : memref<1x8x64xf32, #tpu.memory_space<vmem>>, vector<1x8x64xf32>
      %196 = vector.shape_cast %195 : vector<1x8x64xf32> to vector<8x64xf32>
      %c0_82 = arith.constant 0 : index
      %c0_83 = arith.constant 0 : index
      %c0_84 = arith.constant 0 : index
      %197 = vector.load %arg15[%c0_82, %c0_83, %c0_84] : memref<1x8x64xf32, #tpu.memory_space<vmem>>, vector<1x8x64xf32>
      %198 = vector.shape_cast %197 : vector<1x8x64xf32> to vector<8x64xf32>
      %199 = vector.shape_cast %196 : vector<8x64xf32> to vector<1x8x64xf32>
      tpu.vector_store %arg15[%c0_82, %c0_83, %c0_84], %199 {strides = array<i32>} : memref<1x8x64xf32, #tpu.memory_space<vmem>>, vector<1x8x64xf32>,
    } else {
    }
    %c0 = arith.constant 0 : index
    %c0_1 = arith.constant 0 : index
    %c0_2 = arith.constant 0 : index
    %3 = vector.load %arg15[%c0, %c0_1, %c0_2] : memref<1x8x64xf32, #tpu.memory_space<vmem>>, vector<1x8x64xf32>
    %4 = vector.shape_cast %3 : vector<1x8x64xf32> to vector<8x64xf32>
    %c0_3 = arith.constant 0 : index
    %c0_4 = arith.constant 0 : index
    %c0_5 = arith.constant 0 : index
    %5 = vector.load %arg3[%c0_3, %c0_4, %c0_5] : memref<1x1x64xf32, #tpu.memory_space<vmem>>, vector<1x1x64xf32>
    %6 = vector.shape_cast %5 : vector<1x1x64xf32> to vector<1x64xf32>
    %c0_6 = arith.constant 0 : index
    %c0_7 = arith.constant 0 : index
    %c0_8 = arith.constant 0 : index
    %7 = vector.load %arg4[%c0_6, %c0_7, %c0_8] : memref<1x1x64xf32, #tpu.memory_space<vmem>>, vector<1x1x64xf32>
    %8 = vector.shape_cast %7 : vector<1x1x64xf32> to vector<1x64xf32>
    %cst = arith.constant dense<0.000000e+00> : vector<8xf32>
    %9 = vector.multi_reduction <add>, %4, %cst [1] : vector<8x64xf32> to vector<8xf32>
    %10 = vector.shape_cast %9 : vector<8xf32> to vector<8x1xf32>
    %cst_9 = arith.constant 6.400000e+01 : f32
    %11 = vector.broadcast %cst_9 : f32 to vector<8x1xf32>
    %12 = arith.divf %10, %11 : vector<8x1xf32>
    %13 = vector.broadcast %12 : vector<8x1xf32> to vector<8x64xf32>
    %14 = arith.subf %4, %13 : vector<8x64xf32>
    %15 = arith.mulf %14, %14 : vector<8x64xf32>
    %cst_10 = arith.constant dense<0.000000e+00> : vector<8xf32>
    %16 = vector.multi_reduction <add>, %15, %cst_10 [1] : vector<8x64xf32> to vector<8xf32>
    %17 = vector.shape_cast %16 : vector<8xf32> to vector<8x1xf32>
    %cst_11 = arith.constant 6.400000e+01 : f32
    %18 = vector.broadcast %cst_11 : f32 to vector<8x1xf32>
    %19 = arith.divf %17, %18 : vector<8x1xf32>
    %20 = vector.broadcast %12 : vector<8x1xf32> to vector<8x64xf32>
    %21 = arith.subf %4, %20 : vector<8x64xf32>
    %cst_12 = arith.constant 9.99999974E-6 : f32
    %22 = vector.broadcast %cst_12 : f32 to vector<8x1xf32>
    %23 = arith.addf %19, %22 : vector<8x1xf32>
    %24 = math.rsqrt %23 : vector<8x1xf32>
    %25 = vector.broadcast %24 : vector<8x1xf32> to vector<8x64xf32>
    %26 = arith.mulf %21, %25 : vector<8x64xf32>
    %27 = vector.broadcast %6 : vector<1x64xf32> to vector<8x64xf32>
    %28 = arith.mulf %26, %27 : vector<8x64xf32>
    %29 = vector.broadcast %8 : vector<1x64xf32> to vector<8x64xf32>
    %30 = arith.addf %28, %29 : vector<8x64xf32>
    %c0_13 = arith.constant 0 : index
    %c0_14 = arith.constant 0 : index
    %c0_15 = arith.constant 0 : index
    %31 = vector.load %arg5[%c0_13, %c0_14, %c0_15] : memref<1x64x192xbf16, #tpu.memory_space<vmem>>, vector<1x64x192xbf16>
    %32 = vector.shape_cast %31 : vector<1x64x192xbf16> to vector<64x192xbf16>
    %c0_16 = arith.constant 0 : index
    %c0_17 = arith.constant 0 : index
    %c0_18 = arith.constant 0 : index
    %33 = vector.load %arg6[%c0_16, %c0_17, %c0_18] : memref<1x1x192xf32, #tpu.memory_space<vmem>>, vector<1x1x192xf32>
    %34 = vector.shape_cast %33 : vector<1x1x192xf32> to vector<1x192xf32>
    %c0_19 = arith.constant 0 : index
    %c0_20 = arith.constant 0 : index
    %c0_21 = arith.constant 0 : index
    %35 = vector.load %arg7[%c0_19, %c0_20, %c0_21] : memref<1x64x64xbf16, #tpu.memory_space<vmem>>, vector<1x64x64xbf16>
    %36 = vector.shape_cast %35 : vector<1x64x64xbf16> to vector<64x64xbf16>
    %c0_22 = arith.constant 0 : index
    %c0_23 = arith.constant 0 : index
    %c0_24 = arith.constant 0 : index
    %37 = vector.load %arg8[%c0_22, %c0_23, %c0_24] : memref<1x1x64xf32, #tpu.memory_space<vmem>>, vector<1x1x64xf32>
    %38 = vector.shape_cast %37 : vector<1x1x64xf32> to vector<1x64xf32>
    %39 = arith.truncf %30 : vector<8x64xf32> to vector<8x64xbf16>
    %cst_25 = arith.constant dense<0.000000e+00> : vector<8x192xf32>
    %40 = tpu.matmul %39, %32, %cst_25 {dimension_numbers = #tpu.dot_dimension_numbers<[1], [0], [0], [1], [0, 0, 1, 1], [], []>} : vector<8x64xbf16>, vector<64x192xbf16>, vector<8x192xf32> -> vector<8x192xf32>
    %41 = vector.broadcast %34 : vector<1x192xf32> to vector<8x192xf32>
    %42 = arith.addf %40, %41 : vector<8x192xf32>
    %43 = vector.extract_strided_slice %42 {offsets = [0, 0], sizes = [8, 64], strides = [1, 1]} : vector<8x192xf32> to vector<8x64xf32>
    %44 = vector.extract_strided_slice %42 {offsets = [0, 64], sizes = [8, 64], strides = [1, 1]} : vector<8x192xf32> to vector<8x64xf32>
    %45 = vector.extract_strided_slice %42 {offsets = [0, 128], sizes = [8, 64], strides = [1, 1]} : vector<8x192xf32> to vector<8x64xf32>
    %46 = vector.extract_strided_slice %43 {offsets = [0, 0], sizes = [8, 16], strides = [1, 1]} : vector<8x64xf32> to vector<8x16xf32>
    %47 = arith.truncf %46 : vector<8x16xf32> to vector<8x16xbf16>
    %48 = vector.extract_strided_slice %44 {offsets = [0, 0], sizes = [8, 16], strides = [1, 1]} : vector<8x64xf32> to vector<8x16xf32>
    %49 = arith.truncf %48 : vector<8x16xf32> to vector<8x16xbf16>
    %cst_26 = arith.constant dense<0.000000e+00> : vector<8x8xf32>
    %50 = tpu.matmul %47, %49, %cst_26 {dimension_numbers = #tpu.dot_dimension_numbers<[1], [1], [0], [0], [0, 0, 1, 0], [], []>} : vector<8x16xbf16>, vector<8x16xbf16>, vector<8x8xf32> -> vector<8x8xf32>
    %cst_27 = arith.constant 2.500000e-01 : f32
    %51 = vector.broadcast %cst_27 : f32 to vector<8x8xf32>
    %52 = arith.mulf %50, %51 : vector<8x8xf32>
    %cst_28 = arith.constant dense<0xFF800000> : vector<8xf32>
    %53 = vector.multi_reduction <maximumf>, %52, %cst_28 [1] : vector<8x8xf32> to vector<8xf32>
    %54 = vector.shape_cast %53 : vector<8xf32> to vector<8x1xf32>
    %55 = vector.broadcast %54 : vector<8x1xf32> to vector<8x8xf32>
    %56 = arith.subf %52, %55 : vector<8x8xf32>
    %57 = math.exp %56 : vector<8x8xf32>
    %cst_29 = arith.constant dense<0.000000e+00> : vector<8xf32>
    %58 = vector.multi_reduction <add>, %57, %cst_29 [1] : vector<8x8xf32> to vector<8xf32>
    %59 = vector.shape_cast %58 : vector<8xf32> to vector<8x1xf32>
    %60 = tpu.reciprocal %59 : vector<8x1xf32> -> vector<8x1xf32>
    %61 = vector.broadcast %60 : vector<8x1xf32> to vector<8x8xf32>
    %62 = arith.mulf %57, %61 : vector<8x8xf32>
    %63 = arith.truncf %62 : vector<8x8xf32> to vector<8x8xbf16>
    %64 = vector.extract_strided_slice %45 {offsets = [0, 0], sizes = [8, 16], strides = [1, 1]} : vector<8x64xf32> to vector<8x16xf32>
    %65 = arith.truncf %64 : vector<8x16xf32> to vector<8x16xbf16>
    %cst_30 = arith.constant dense<0.000000e+00> : vector<8x16xf32>
    %66 = tpu.matmul %63, %65, %cst_30 {dimension_numbers = #tpu.dot_dimension_numbers<[1], [0], [0], [1], [0, 0, 1, 1], [], []>} : vector<8x8xbf16>, vector<8x16xbf16>, vector<8x16xf32> -> vector<8x16xf32>
    %67 = vector.extract_strided_slice %43 {offsets = [0, 16], sizes = [8, 16], strides = [1, 1]} : vector<8x64xf32> to vector<8x16xf32>
    %68 = arith.truncf %67 : vector<8x16xf32> to vector<8x16xbf16>
    %69 = vector.extract_strided_slice %44 {offsets = [0, 16], sizes = [8, 16], strides = [1, 1]} : vector<8x64xf32> to vector<8x16xf32>
    %70 = arith.truncf %69 : vector<8x16xf32> to vector<8x16xbf16>
    %cst_31 = arith.constant dense<0.000000e+00> : vector<8x8xf32>
    %71 = tpu.matmul %68, %70, %cst_31 {dimension_numbers = #tpu.dot_dimension_numbers<[1], [1], [0], [0], [0, 0, 1, 0], [], []>} : vector<8x16xbf16>, vector<8x16xbf16>, vector<8x8xf32> -> vector<8x8xf32>
    %cst_32 = arith.constant 2.500000e-01 : f32
    %72 = vector.broadcast %cst_32 : f32 to vector<8x8xf32>
    %73 = arith.mulf %71, %72 : vector<8x8xf32>
    %cst_33 = arith.constant dense<0xFF800000> : vector<8xf32>
    %74 = vector.multi_reduction <maximumf>, %73, %cst_33 [1] : vector<8x8xf32> to vector<8xf32>
    %75 = vector.shape_cast %74 : vector<8xf32> to vector<8x1xf32>
    %76 = vector.broadcast %75 : vector<8x1xf32> to vector<8x8xf32>
    %77 = arith.subf %73, %76 : vector<8x8xf32>
    %78 = math.exp %77 : vector<8x8xf32>
    %cst_34 = arith.constant dense<0.000000e+00> : vector<8xf32>
    %79 = vector.multi_reduction <add>, %78, %cst_34 [1] : vector<8x8xf32> to vector<8xf32>
    %80 = vector.shape_cast %79 : vector<8xf32> to vector<8x1xf32>
    %81 = tpu.reciprocal %80 : vector<8x1xf32> -> vector<8x1xf32>
    %82 = vector.broadcast %81 : vector<8x1xf32> to vector<8x8xf32>
    %83 = arith.mulf %78, %82 : vector<8x8xf32>
    %84 = arith.truncf %83 : vector<8x8xf32> to vector<8x8xbf16>
    %85 = vector.extract_strided_slice %45 {offsets = [0, 16], sizes = [8, 16], strides = [1, 1]} : vector<8x64xf32> to vector<8x16xf32>
    %86 = arith.truncf %85 : vector<8x16xf32> to vector<8x16xbf16>
    %cst_35 = arith.constant dense<0.000000e+00> : vector<8x16xf32>
    %87 = tpu.matmul %84, %86, %cst_35 {dimension_numbers = #tpu.dot_dimension_numbers<[1], [0], [0], [1], [0, 0, 1, 1], [], []>} : vector<8x8xbf16>, vector<8x16xbf16>, vector<8x16xf32> -> vector<8x16xf32>
    %88 = vector.extract_strided_slice %43 {offsets = [0, 32], sizes = [8, 16], strides = [1, 1]} : vector<8x64xf32> to vector<8x16xf32>
    %89 = arith.truncf %88 : vector<8x16xf32> to vector<8x16xbf16>
    %90 = vector.extract_strided_slice %44 {offsets = [0, 32], sizes = [8, 16], strides = [1, 1]} : vector<8x64xf32> to vector<8x16xf32>
    %91 = arith.truncf %90 : vector<8x16xf32> to vector<8x16xbf16>
    %cst_36 = arith.constant dense<0.000000e+00> : vector<8x8xf32>
    %92 = tpu.matmul %89, %91, %cst_36 {dimension_numbers = #tpu.dot_dimension_numbers<[1], [1], [0], [0], [0, 0, 1, 0], [], []>} : vector<8x16xbf16>, vector<8x16xbf16>, vector<8x8xf32> -> vector<8x8xf32>
    %cst_37 = arith.constant 2.500000e-01 : f32
    %93 = vector.broadcast %cst_37 : f32 to vector<8x8xf32>
    %94 = arith.mulf %92, %93 : vector<8x8xf32>
    %cst_38 = arith.constant dense<0xFF800000> : vector<8xf32>
    %95 = vector.multi_reduction <maximumf>, %94, %cst_38 [1] : vector<8x8xf32> to vector<8xf32>
    %96 = vector.shape_cast %95 : vector<8xf32> to vector<8x1xf32>
    %97 = vector.broadcast %96 : vector<8x1xf32> to vector<8x8xf32>
    %98 = arith.subf %94, %97 : vector<8x8xf32>
    %99 = math.exp %98 : vector<8x8xf32>
    %cst_39 = arith.constant dense<0.000000e+00> : vector<8xf32>
    %100 = vector.multi_reduction <add>, %99, %cst_39 [1] : vector<8x8xf32> to vector<8xf32>
    %101 = vector.shape_cast %100 : vector<8xf32> to vector<8x1xf32>
    %102 = tpu.reciprocal %101 : vector<8x1xf32> -> vector<8x1xf32>
    %103 = vector.broadcast %102 : vector<8x1xf32> to vector<8x8xf32>
    %104 = arith.mulf %99, %103 : vector<8x8xf32>
    %105 = arith.truncf %104 : vector<8x8xf32> to vector<8x8xbf16>
    %106 = vector.extract_strided_slice %45 {offsets = [0, 32], sizes = [8, 16], strides = [1, 1]} : vector<8x64xf32> to vector<8x16xf32>
    %107 = arith.truncf %106 : vector<8x16xf32> to vector<8x16xbf16>
    %cst_40 = arith.constant dense<0.000000e+00> : vector<8x16xf32>
    %108 = tpu.matmul %105, %107, %cst_40 {dimension_numbers = #tpu.dot_dimension_numbers<[1], [0], [0], [1], [0, 0, 1, 1], [], []>} : vector<8x8xbf16>, vector<8x16xbf16>, vector<8x16xf32> -> vector<8x16xf32>
    %109 = vector.extract_strided_slice %43 {offsets = [0, 48], sizes = [8, 16], strides = [1, 1]} : vector<8x64xf32> to vector<8x16xf32>
    %110 = arith.truncf %109 : vector<8x16xf32> to vector<8x16xbf16>
    %111 = vector.extract_strided_slice %44 {offsets = [0, 48], sizes = [8, 16], strides = [1, 1]} : vector<8x64xf32> to vector<8x16xf32>
    %112 = arith.truncf %111 : vector<8x16xf32> to vector<8x16xbf16>
    %cst_41 = arith.constant dense<0.000000e+00> : vector<8x8xf32>
    %113 = tpu.matmul %110, %112, %cst_41 {dimension_numbers = #tpu.dot_dimension_numbers<[1], [1], [0], [0], [0, 0, 1, 0], [], []>} : vector<8x16xbf16>, vector<8x16xbf16>, vector<8x8xf32> -> vector<8x8xf32>
    %cst_42 = arith.constant 2.500000e-01 : f32
    %114 = vector.broadcast %cst_42 : f32 to vector<8x8xf32>
    %115 = arith.mulf %113, %114 : vector<8x8xf32>
    %cst_43 = arith.constant dense<0xFF800000> : vector<8xf32>
    %116 = vector.multi_reduction <maximumf>, %115, %cst_43 [1] : vector<8x8xf32> to vector<8xf32>
    %117 = vector.shape_cast %116 : vector<8xf32> to vector<8x1xf32>
    %118 = vector.broadcast %117 : vector<8x1xf32> to vector<8x8xf32>
    %119 = arith.subf %115, %118 : vector<8x8xf32>
    %120 = math.exp %119 : vector<8x8xf32>
    %cst_44 = arith.constant dense<0.000000e+00> : vector<8xf32>
    %121 = vector.multi_reduction <add>, %120, %cst_44 [1] : vector<8x8xf32> to vector<8xf32>
    %122 = vector.shape_cast %121 : vector<8xf32> to vector<8x1xf32>
    %123 = tpu.reciprocal %122 : vector<8x1xf32> -> vector<8x1xf32>
    %124 = vector.broadcast %123 : vector<8x1xf32> to vector<8x8xf32>
    %125 = arith.mulf %120, %124 : vector<8x8xf32>
    %126 = arith.truncf %125 : vector<8x8xf32> to vector<8x8xbf16>
    %127 = vector.extract_strided_slice %45 {offsets = [0, 48], sizes = [8, 16], strides = [1, 1]} : vector<8x64xf32> to vector<8x16xf32>
    %128 = arith.truncf %127 : vector<8x16xf32> to vector<8x16xbf16>
    %cst_45 = arith.constant dense<0.000000e+00> : vector<8x16xf32>
    %129 = tpu.matmul %126, %128, %cst_45 {dimension_numbers = #tpu.dot_dimension_numbers<[1], [0], [0], [1], [0, 0, 1, 1], [], []>} : vector<8x8xbf16>, vector<8x16xbf16>, vector<8x16xf32> -> vector<8x16xf32>
    %130 = tpu.concatenate %66, %87, %108, %129 in 1 : vector<8x16xf32>, vector<8x16xf32>, vector<8x16xf32>, vector<8x16xf32> -> vector<8x64xf32>
    %131 = arith.truncf %130 : vector<8x64xf32> to vector<8x64xbf16>
    %cst_46 = arith.constant dense<0.000000e+00> : vector<8x64xf32>
    %132 = tpu.matmul %131, %36, %cst_46 {dimension_numbers = #tpu.dot_dimension_numbers<[1], [0], [0], [1], [0, 0, 1, 1], [], []>} : vector<8x64xbf16>, vector<64x64xbf16>, vector<8x64xf32> -> vector<8x64xf32>
    %133 = vector.broadcast %38 : vector<1x64xf32> to vector<8x64xf32>
    %134 = arith.addf %132, %133 : vector<8x64xf32>
    %135 = arith.addf %4, %134 : vector<8x64xf32>
    %c0_47 = arith.constant 0 : index
    %c0_48 = arith.constant 0 : index
    %c0_49 = arith.constant 0 : index
    %136 = vector.load %arg9[%c0_47, %c0_48, %c0_49] : memref<1x1x64xf32, #tpu.memory_space<vmem>>, vector<1x1x64xf32>
    %137 = vector.shape_cast %136 : vector<1x1x64xf32> to vector<1x64xf32>
    %c0_50 = arith.constant 0 : index
    %c0_51 = arith.constant 0 : index
    %c0_52 = arith.constant 0 : index
    %138 = vector.load %arg10[%c0_50, %c0_51, %c0_52] : memref<1x1x64xf32, #tpu.memory_space<vmem>>, vector<1x1x64xf32>
    %139 = vector.shape_cast %138 : vector<1x1x64xf32> to vector<1x64xf32>
    %cst_53 = arith.constant dense<0.000000e+00> : vector<8xf32>
    %140 = vector.multi_reduction <add>, %135, %cst_53 [1] : vector<8x64xf32> to vector<8xf32>
    %141 = vector.shape_cast %140 : vector<8xf32> to vector<8x1xf32>
    %cst_54 = arith.constant 6.400000e+01 : f32
    %142 = vector.broadcast %cst_54 : f32 to vector<8x1xf32>
    %143 = arith.divf %141, %142 : vector<8x1xf32>
    %144 = vector.broadcast %143 : vector<8x1xf32> to vector<8x64xf32>
    %145 = arith.subf %135, %144 : vector<8x64xf32>
    %146 = arith.mulf %145, %145 : vector<8x64xf32>
    %cst_55 = arith.constant dense<0.000000e+00> : vector<8xf32>
    %147 = vector.multi_reduction <add>, %146, %cst_55 [1] : vector<8x64xf32> to vector<8xf32>
    %148 = vector.shape_cast %147 : vector<8xf32> to vector<8x1xf32>
    %cst_56 = arith.constant 6.400000e+01 : f32
    %149 = vector.broadcast %cst_56 : f32 to vector<8x1xf32>
    %150 = arith.divf %148, %149 : vector<8x1xf32>
    %151 = vector.broadcast %143 : vector<8x1xf32> to vector<8x64xf32>
    %152 = arith.subf %135, %151 : vector<8x64xf32>
    %cst_57 = arith.constant 9.99999974E-6 : f32
    %153 = vector.broadcast %cst_57 : f32 to vector<8x1xf32>
    %154 = arith.addf %150, %153 : vector<8x1xf32>
    %155 = math.rsqrt %154 : vector<8x1xf32>
    %156 = vector.broadcast %155 : vector<8x1xf32> to vector<8x64xf32>
    %157 = arith.mulf %152, %156 : vector<8x64xf32>
    %158 = vector.broadcast %137 : vector<1x64xf32> to vector<8x64xf32>
    %159 = arith.mulf %157, %158 : vector<8x64xf32>
    %160 = vector.broadcast %139 : vector<1x64xf32> to vector<8x64xf32>
    %161 = arith.addf %159, %160 : vector<8x64xf32>
    %c0_58 = arith.constant 0 : index
    %c0_59 = arith.constant 0 : index
    %c0_60 = arith.constant 0 : index
    %162 = vector.load %arg11[%c0_58, %c0_59, %c0_60] : memref<1x64x256xbf16, #tpu.memory_space<vmem>>, vector<1x64x256xbf16>
    %163 = vector.shape_cast %162 : vector<1x64x256xbf16> to vector<64x256xbf16>
    %c0_61 = arith.constant 0 : index
    %c0_62 = arith.constant 0 : index
    %c0_63 = arith.constant 0 : index
    %164 = vector.load %arg12[%c0_61, %c0_62, %c0_63] : memref<1x1x256xf32, #tpu.memory_space<vmem>>, vector<1x1x256xf32>
    %165 = vector.shape_cast %164 : vector<1x1x256xf32> to vector<1x256xf32>
    %c0_64 = arith.constant 0 : index
    %c0_65 = arith.constant 0 : index
    %c0_66 = arith.constant 0 : index
    %166 = vector.load %arg13[%c0_64, %c0_65, %c0_66] : memref<1x256x64xbf16, #tpu.memory_space<vmem>>, vector<1x256x64xbf16>
    %167 = vector.shape_cast %166 : vector<1x256x64xbf16> to vector<256x64xbf16>
    %c0_67 = arith.constant 0 : index
    %c0_68 = arith.constant 0 : index
    %c0_69 = arith.constant 0 : index
    %168 = vector.load %arg14[%c0_67, %c0_68, %c0_69] : memref<1x1x64xf32, #tpu.memory_space<vmem>>, vector<1x1x64xf32>
    %169 = vector.shape_cast %168 : vector<1x1x64xf32> to vector<1x64xf32>
    %170 = arith.truncf %161 : vector<8x64xf32> to vector<8x64xbf16>
    %cst_70 = arith.constant dense<0.000000e+00> : vector<8x256xf32>
    %171 = tpu.matmul %170, %163, %cst_70 {dimension_numbers = #tpu.dot_dimension_numbers<[1], [0], [0], [1], [0, 0, 1, 1], [], []>} : vector<8x64xbf16>, vector<64x256xbf16>, vector<8x256xf32> -> vector<8x256xf32>
    %172 = vector.broadcast %165 : vector<1x256xf32> to vector<8x256xf32>
    %173 = arith.addf %171, %172 : vector<8x256xf32>
    %174 = arith.mulf %173, %173 : vector<8x256xf32>
    %175 = arith.mulf %173, %174 : vector<8x256xf32>
    %cst_71 = arith.constant 4.471500e-02 : f32
    %176 = vector.broadcast %cst_71 : f32 to vector<8x256xf32>
    %177 = arith.mulf %176, %175 : vector<8x256xf32>
    %178 = arith.addf %173, %177 : vector<8x256xf32>
    %cst_72 = arith.constant 0.797884583 : f32
    %179 = vector.broadcast %cst_72 : f32 to vector<8x256xf32>
    %180 = arith.mulf %179, %178 : vector<8x256xf32>
    %181 = math.tanh %180 : vector<8x256xf32>
    %cst_73 = arith.constant 1.000000e+00 : f32
    %182 = vector.broadcast %cst_73 : f32 to vector<8x256xf32>
    %183 = arith.addf %182, %181 : vector<8x256xf32>
    %cst_74 = arith.constant 5.000000e-01 : f32
    %184 = vector.broadcast %cst_74 : f32 to vector<8x256xf32>
    %185 = arith.mulf %184, %183 : vector<8x256xf32>
    %186 = arith.mulf %173, %185 : vector<8x256xf32>
    %187 = arith.truncf %186 : vector<8x256xf32> to vector<8x256xbf16>
    %cst_75 = arith.constant dense<0.000000e+00> : vector<8x64xf32>
    %188 = tpu.matmul %187, %167, %cst_75 {dimension_numbers = #tpu.dot_dimension_numbers<[1], [0], [0], [1], [0, 0, 1, 1], [], []>} : vector<8x256xbf16>, vector<256x64xbf16>, vector<8x64xf32> -> vector<8x64xf32>
    %189 = vector.broadcast %169 : vector<1x64xf32> to vector<8x64xf32>
    %190 = arith.addf %188, %189 : vector<8x64xf32>
    %191 = arith.addf %135, %190 : vector<8x64xf32>
    %c0_76 = arith.constant 0 : index
    %c0_77 = arith.constant 0 : index
    %c0_78 = arith.constant 0 : index
    %192 = vector.load %arg15[%c0_76, %c0_77, %c0_78] : memref<1x8x64xf32, #tpu.memory_space<vmem>>, vector<1x8x64xf32>
    %193 = vector.shape_cast %192 : vector<1x8x64xf32> to vector<8x64xf32>
    %194 = vector.shape_cast %191 : vector<8x64xf32> to vector<1x8x64xf32>
    tpu.vector_store %arg15[%c0_76, %c0_77, %c0_78], %194 {strides = array<i32>} : memref<1x8x64xf32, #tpu.memory_space<vmem>>, vector<1x8x64xf32>,
    return
  }
  func.func @transform_0(%arg0: i32, %arg1: i32) -> (i32, i32, i32) {
    %c0_i32 = arith.constant 0 : i32
    %c0_i32_0 = arith.constant 0 : i32
    %c0_i32_1 = arith.constant 0 : i32
    return %arg0, %c0_i32, %c0_i32_0 : i32, i32, i32
  }
  func.func @transform_1(%arg0: i32, %arg1: i32) -> (i32, i32, i32) {
    %c0_i32 = arith.constant 0 : i32
    %c0_i32_0 = arith.constant 0 : i32
    %c0_i32_1 = arith.constant 0 : i32
    return %arg1, %c0_i32, %c0_i32_0 : i32, i32, i32
  }
  func.func @transform_2(%arg0: i32, %arg1: i32) -> (i32, i32, i32) {
    %c0_i32 = arith.constant 0 : i32
    %c0_i32_0 = arith.constant 0 : i32
    %c0_i32_1 = arith.constant 0 : i32
    return %arg1, %c0_i32, %c0_i32_0 : i32, i32, i32
  }
  func.func @transform_3(%arg0: i32, %arg1: i32) -> (i32, i32, i32) {
    %c0_i32 = arith.constant 0 : i32
    %c0_i32_0 = arith.constant 0 : i32
    %c0_i32_1 = arith.constant 0 : i32
    return %arg1, %c0_i32, %c0_i32_0 : i32, i32, i32
  }
  func.func @transform_4(%arg0: i32, %arg1: i32) -> (i32, i32, i32) {
    %c0_i32 = arith.constant 0 : i32
    %c0_i32_0 = arith.constant 0 : i32
    %c0_i32_1 = arith.constant 0 : i32
    return %arg1, %c0_i32, %c0_i32_0 : i32, i32, i32
  }
  func.func @transform_5(%arg0: i32, %arg1: i32) -> (i32, i32, i32) {
    %c0_i32 = arith.constant 0 : i32
    %c0_i32_0 = arith.constant 0 : i32
    %c0_i32_1 = arith.constant 0 : i32
    return %arg1, %c0_i32, %c0_i32_0 : i32, i32, i32
  }
  func.func @transform_6(%arg0: i32, %arg1: i32) -> (i32, i32, i32) {
    %c0_i32 = arith.constant 0 : i32
    %c0_i32_0 = arith.constant 0 : i32
    %c0_i32_1 = arith.constant 0 : i32
    return %arg1, %c0_i32, %c0_i32_0 : i32, i32, i32
  }
  func.func @transform_7(%arg0: i32, %arg1: i32) -> (i32, i32, i32) {
    %c0_i32 = arith.constant 0 : i32
    %c0_i32_0 = arith.constant 0 : i32
    %c0_i32_1 = arith.constant 0 : i32
    return %arg1, %c0_i32, %c0_i32_0 : i32, i32, i32
  }
  func.func @transform_8(%arg0: i32, %arg1: i32) -> (i32, i32, i32) {
    %c0_i32 = arith.constant 0 : i32
    %c0_i32_0 = arith.constant 0 : i32
    %c0_i32_1 = arith.constant 0 : i32
    return %arg1, %c0_i32, %c0_i32_0 : i32, i32, i32
  }
  func.func @transform_9(%arg0: i32, %arg1: i32) -> (i32, i32, i32) {
    %c0_i32 = arith.constant 0 : i32
    %c0_i32_0 = arith.constant 0 : i32
    %c0_i32_1 = arith.constant 0 : i32
    return %arg1, %c0_i32, %c0_i32_0 : i32, i32, i32
  }
  func.func @transform_10(%arg0: i32, %arg1: i32) -> (i32, i32, i32) {
    %c0_i32 = arith.constant 0 : i32
    %c0_i32_0 = arith.constant 0 : i32
    %c0_i32_1 = arith.constant 0 : i32
    return %arg1, %c0_i32, %c0_i32_0 : i32, i32, i32
  }
  func.func @transform_11(%arg0: i32, %arg1: i32) -> (i32, i32, i32) {
    %c0_i32 = arith.constant 0 : i32
    %c0_i32_0 = arith.constant 0 : i32
    %c0_i32_1 = arith.constant 0 : i32
    return %arg1, %c0_i32, %c0_i32_0 : i32, i32, i32
  }
  func.func @transform_12(%arg0: i32, %arg1: i32) -> (i32, i32, i32) {
    %c0_i32 = arith.constant 0 : i32
    %c0_i32_0 = arith.constant 0 : i32
    %c0_i32_1 = arith.constant 0 : i32
    return %arg1, %c0_i32, %c0_i32_0 : i32, i32, i32
  }
  func.func @transform_13(%arg0: i32, %arg1: i32) -> (i32, i32, i32) {
    %c0_i32 = arith.constant 0 : i32
    %c0_i32_0 = arith.constant 0 : i32
    %c0_i32_1 = arith.constant 0 : i32
    return %arg0, %c0_i32, %c0_i32_0 : i32, i32, i32
  }
}

module attributes {stable_mosaic.version = 11 : i64} {
  func.func @decoder_kernel(%arg0: i32, %arg1: i32, %arg2: memref<1x8x64xf32, #tpu.memory_space<vmem>>, %arg3: memref<1x8x64xf32, #tpu.memory_space<vmem>>, %arg4: memref<8x8xf32, #tpu.memory_space<vmem>>, %arg5: memref<1x1x64xf32, #tpu.memory_space<vmem>>, %arg6: memref<1x1x64xf32, #tpu.memory_space<vmem>>, %arg7: memref<1x64x192xbf16, #tpu.memory_space<vmem>>, %arg8: memref<1x1x192xf32, #tpu.memory_space<vmem>>, %arg9: memref<1x64x64xbf16, #tpu.memory_space<vmem>>, %arg10: memref<1x1x64xf32, #tpu.memory_space<vmem>>, %arg11: memref<1x1x64xf32, #tpu.memory_space<vmem>>, %arg12: memref<1x1x64xf32, #tpu.memory_space<vmem>>, %arg13: memref<1x1x64xf32, #tpu.memory_space<vmem>>, %arg14: memref<1x1x64xf32, #tpu.memory_space<vmem>>, %arg15: memref<1x64x64xbf16, #tpu.memory_space<vmem>>, %arg16: memref<1x1x64xf32, #tpu.memory_space<vmem>>, %arg17: memref<1x64x128xbf16, #tpu.memory_space<vmem>>, %arg18: memref<1x1x128xf32, #tpu.memory_space<vmem>>, %arg19: memref<1x64x64xbf16, #tpu.memory_space<vmem>>, %arg20: memref<1x1x64xf32, #tpu.memory_space<vmem>>, %arg21: memref<1x1x64xf32, #tpu.memory_space<vmem>>, %arg22: memref<1x1x64xf32, #tpu.memory_space<vmem>>, %arg23: memref<1x64x256xbf16, #tpu.memory_space<vmem>>, %arg24: memref<1x1x256xf32, #tpu.memory_space<vmem>>, %arg25: memref<1x256x64xbf16, #tpu.memory_space<vmem>>, %arg26: memref<1x1x64xf32, #tpu.memory_space<vmem>>, %arg27: memref<1x64xf32, #tpu.memory_space<vmem>>, %arg28: memref<1x64xf32, #tpu.memory_space<vmem>>, %arg29: memref<64x128xbf16, #tpu.memory_space<vmem>>, %arg30: memref<1x128xf32, #tpu.memory_space<vmem>>, %arg31: memref<1x8x128xf32, #tpu.memory_space<vmem>>, %arg32: memref<8x64xf32, #tpu.memory_space<vmem>>) attributes {dimension_semantics = [#tpu.dimension_semantics<parallel>, #tpu.dimension_semantics<arbitrary>], iteration_bounds = array<i64: 2, 2>, scalar_prefetch = 0 : i64, scratch_operands = 1 : i64, tpu.core_type = #tpu.core_type<tc>, window_params = [{transform_indices = @transform_0, window_bounds = array<i64: 1, 8, 64>}, {transform_indices = @transform_1, window_bounds = array<i64: 1, 8, 64>}, {pipeline_mode = #tpu.pipeline_mode<synchronous>, transform_indices = @transform_2, window_bounds = array<i64: 8, 8>}, {transform_indices = @transform_3, window_bounds = array<i64: 1, 1, 64>}, {transform_indices = @transform_4, window_bounds = array<i64: 1, 1, 64>}, {transform_indices = @transform_5, window_bounds = array<i64: 1, 64, 192>}, {transform_indices = @transform_6, window_bounds = array<i64: 1, 1, 192>}, {transform_indices = @transform_7, window_bounds = array<i64: 1, 64, 64>}, {transform_indices = @transform_8, window_bounds = array<i64: 1, 1, 64>}, {transform_indices = @transform_9, window_bounds = array<i64: 1, 1, 64>}, {transform_indices = @transform_10, window_bounds = array<i64: 1, 1, 64>}, {transform_indices = @transform_11, window_bounds = array<i64: 1, 1, 64>}, {transform_indices = @transform_12, window_bounds = array<i64: 1, 1, 64>}, {transform_indices = @transform_13, window_bounds = array<i64: 1, 64, 64>}, {transform_indices = @transform_14, window_bounds = array<i64: 1, 1, 64>}, {transform_indices = @transform_15, window_bounds = array<i64: 1, 64, 128>}, {transform_indices = @transform_16, window_bounds = array<i64: 1, 1, 128>}, {transform_indices = @transform_17, window_bounds = array<i64: 1, 64, 64>}, {transform_indices = @transform_18, window_bounds = array<i64: 1, 1, 64>}, {transform_indices = @transform_19, window_bounds = array<i64: 1, 1, 64>}, {transform_indices = @transform_20, window_bounds = array<i64: 1, 1, 64>}, {transform_indices = @transform_21, window_bounds = array<i64: 1, 64, 256>}, {transform_indices = @transform_22, window_bounds = array<i64: 1, 1, 256>}, {transform_indices = @transform_23, window_bounds = array<i64: 1, 256, 64>}, {transform_indices = @transform_24, window_bounds = array<i64: 1, 1, 64>}, {pipeline_mode = #tpu.pipeline_mode<synchronous>, transform_indices = @transform_25, window_bounds = array<i64: 1, 64>}, {pipeline_mode = #tpu.pipeline_mode<synchronous>, transform_indices = @transform_26, window_bounds = array<i64: 1, 64>}, {pipeline_mode = #tpu.pipeline_mode<synchronous>, transform_indices = @transform_27, window_bounds = array<i64: 64, 128>}, {pipeline_mode = #tpu.pipeline_mode<synchronous>, transform_indices = @transform_28, window_bounds = array<i64: 1, 128>}, {transform_indices = @transform_29, window_bounds = array<i64: 1, 8, 128>}]} {
    %c0_i32 = arith.constant 0 : i32
    %0 = arith.cmpi eq, %arg1, %c0_i32 : i32
    %1 = arith.extui %0 : i1 to i32
    %c0_i32_0 = arith.constant 0 : i32
    %2 = arith.cmpi ne, %1, %c0_i32_0 : i32
    scf.if %2 {
      %c0_146 = arith.constant 0 : index
      %c0_147 = arith.constant 0 : index
      %c0_148 = arith.constant 0 : index
      %366 = vector.load %arg2[%c0_146, %c0_147, %c0_148] : memref<1x8x64xf32, #tpu.memory_space<vmem>>, vector<1x8x64xf32>
      %367 = vector.shape_cast %366 : vector<1x8x64xf32> to vector<8x64xf32>
      %c0_149 = arith.constant 0 : index
      %c0_150 = arith.constant 0 : index
      %368 = vector.load %arg32[%c0_149, %c0_150] : memref<8x64xf32, #tpu.memory_space<vmem>>, vector<8x64xf32>
      tpu.vector_store %arg32[%c0_149, %c0_150], %367 {strides = array<i32>} : memref<8x64xf32, #tpu.memory_space<vmem>>, vector<8x64xf32>,
    } else {
    }
    %c0 = arith.constant 0 : index
    %c0_1 = arith.constant 0 : index
    %3 = vector.load %arg32[%c0, %c0_1] : memref<8x64xf32, #tpu.memory_space<vmem>>, vector<8x64xf32>
    %c0_2 = arith.constant 0 : index
    %c0_3 = arith.constant 0 : index
    %c0_4 = arith.constant 0 : index
    %4 = vector.load %arg5[%c0_2, %c0_3, %c0_4] : memref<1x1x64xf32, #tpu.memory_space<vmem>>, vector<1x1x64xf32>
    %5 = vector.shape_cast %4 : vector<1x1x64xf32> to vector<1x64xf32>
    %c0_5 = arith.constant 0 : index
    %c0_6 = arith.constant 0 : index
    %c0_7 = arith.constant 0 : index
    %6 = vector.load %arg6[%c0_5, %c0_6, %c0_7] : memref<1x1x64xf32, #tpu.memory_space<vmem>>, vector<1x1x64xf32>
    %7 = vector.shape_cast %6 : vector<1x1x64xf32> to vector<1x64xf32>
    %cst = arith.constant dense<0.000000e+00> : vector<8xf32>
    %8 = vector.multi_reduction <add>, %3, %cst [1] : vector<8x64xf32> to vector<8xf32>
    %9 = vector.shape_cast %8 : vector<8xf32> to vector<8x1xf32>
    %cst_8 = arith.constant 6.400000e+01 : f32
    %10 = vector.broadcast %cst_8 : f32 to vector<8x1xf32>
    %11 = arith.divf %9, %10 : vector<8x1xf32>
    %12 = vector.broadcast %11 : vector<8x1xf32> to vector<8x64xf32>
    %13 = arith.subf %3, %12 : vector<8x64xf32>
    %14 = arith.mulf %13, %13 : vector<8x64xf32>
    %cst_9 = arith.constant dense<0.000000e+00> : vector<8xf32>
    %15 = vector.multi_reduction <add>, %14, %cst_9 [1] : vector<8x64xf32> to vector<8xf32>
    %16 = vector.shape_cast %15 : vector<8xf32> to vector<8x1xf32>
    %cst_10 = arith.constant 6.400000e+01 : f32
    %17 = vector.broadcast %cst_10 : f32 to vector<8x1xf32>
    %18 = arith.divf %16, %17 : vector<8x1xf32>
    %19 = vector.broadcast %11 : vector<8x1xf32> to vector<8x64xf32>
    %20 = arith.subf %3, %19 : vector<8x64xf32>
    %cst_11 = arith.constant 9.99999974E-6 : f32
    %21 = vector.broadcast %cst_11 : f32 to vector<8x1xf32>
    %22 = arith.addf %18, %21 : vector<8x1xf32>
    %23 = math.rsqrt %22 : vector<8x1xf32>
    %24 = vector.broadcast %23 : vector<8x1xf32> to vector<8x64xf32>
    %25 = arith.mulf %20, %24 : vector<8x64xf32>
    %26 = vector.broadcast %5 : vector<1x64xf32> to vector<8x64xf32>
    %27 = arith.mulf %25, %26 : vector<8x64xf32>
    %28 = vector.broadcast %7 : vector<1x64xf32> to vector<8x64xf32>
    %29 = arith.addf %27, %28 : vector<8x64xf32>
    %c0_12 = arith.constant 0 : index
    %c0_13 = arith.constant 0 : index
    %c0_14 = arith.constant 0 : index
    %30 = vector.load %arg7[%c0_12, %c0_13, %c0_14] : memref<1x64x192xbf16, #tpu.memory_space<vmem>>, vector<1x64x192xbf16>
    %31 = vector.shape_cast %30 : vector<1x64x192xbf16> to vector<64x192xbf16>
    %c0_15 = arith.constant 0 : index
    %c0_16 = arith.constant 0 : index
    %c0_17 = arith.constant 0 : index
    %32 = vector.load %arg8[%c0_15, %c0_16, %c0_17] : memref<1x1x192xf32, #tpu.memory_space<vmem>>, vector<1x1x192xf32>
    %33 = vector.shape_cast %32 : vector<1x1x192xf32> to vector<1x192xf32>
    %c0_18 = arith.constant 0 : index
    %c0_19 = arith.constant 0 : index
    %c0_20 = arith.constant 0 : index
    %34 = vector.load %arg9[%c0_18, %c0_19, %c0_20] : memref<1x64x64xbf16, #tpu.memory_space<vmem>>, vector<1x64x64xbf16>
    %35 = vector.shape_cast %34 : vector<1x64x64xbf16> to vector<64x64xbf16>
    %c0_21 = arith.constant 0 : index
    %c0_22 = arith.constant 0 : index
    %c0_23 = arith.constant 0 : index
    %36 = vector.load %arg10[%c0_21, %c0_22, %c0_23] : memref<1x1x64xf32, #tpu.memory_space<vmem>>, vector<1x1x64xf32>
    %37 = vector.shape_cast %36 : vector<1x1x64xf32> to vector<1x64xf32>
    %c0_24 = arith.constant 0 : index
    %c0_25 = arith.constant 0 : index
    %38 = vector.load %arg4[%c0_24, %c0_25] : memref<8x8xf32, #tpu.memory_space<vmem>>, vector<8x8xf32>
    %39 = arith.truncf %29 : vector<8x64xf32> to vector<8x64xbf16>
    %cst_26 = arith.constant dense<0.000000e+00> : vector<8x192xf32>
    %40 = tpu.matmul %39, %31, %cst_26 {dimension_numbers = #tpu.dot_dimension_numbers<[1], [0], [0], [1], [0, 0, 1, 1], [], []>} : vector<8x64xbf16>, vector<64x192xbf16>, vector<8x192xf32> -> vector<8x192xf32>
    %41 = vector.broadcast %33 : vector<1x192xf32> to vector<8x192xf32>
    %42 = arith.addf %40, %41 : vector<8x192xf32>
    %43 = vector.extract_strided_slice %42 {offsets = [0, 0], sizes = [8, 64], strides = [1, 1]} : vector<8x192xf32> to vector<8x64xf32>
    %44 = vector.extract_strided_slice %42 {offsets = [0, 64], sizes = [8, 64], strides = [1, 1]} : vector<8x192xf32> to vector<8x64xf32>
    %45 = vector.extract_strided_slice %42 {offsets = [0, 128], sizes = [8, 64], strides = [1, 1]} : vector<8x192xf32> to vector<8x64xf32>
    %46 = vector.extract_strided_slice %43 {offsets = [0, 0], sizes = [8, 16], strides = [1, 1]} : vector<8x64xf32> to vector<8x16xf32>
    %47 = arith.truncf %46 : vector<8x16xf32> to vector<8x16xbf16>
    %48 = vector.extract_strided_slice %44 {offsets = [0, 0], sizes = [8, 16], strides = [1, 1]} : vector<8x64xf32> to vector<8x16xf32>
    %49 = arith.truncf %48 : vector<8x16xf32> to vector<8x16xbf16>
    %cst_27 = arith.constant dense<0.000000e+00> : vector<8x8xf32>
    %50 = tpu.matmul %47, %49, %cst_27 {dimension_numbers = #tpu.dot_dimension_numbers<[1], [1], [0], [0], [0, 0, 1, 0], [], []>} : vector<8x16xbf16>, vector<8x16xbf16>, vector<8x8xf32> -> vector<8x8xf32>
    %cst_28 = arith.constant 2.500000e-01 : f32
    %51 = vector.broadcast %cst_28 : f32 to vector<8x8xf32>
    %52 = arith.mulf %50, %51 : vector<8x8xf32>
    %53 = arith.addf %52, %38 : vector<8x8xf32>
    %cst_29 = arith.constant dense<0xFF800000> : vector<8xf32>
    %54 = vector.multi_reduction <maximumf>, %53, %cst_29 [1] : vector<8x8xf32> to vector<8xf32>
    %55 = vector.shape_cast %54 : vector<8xf32> to vector<8x1xf32>
    %56 = vector.broadcast %55 : vector<8x1xf32> to vector<8x8xf32>
    %57 = arith.subf %53, %56 : vector<8x8xf32>
    %58 = math.exp %57 : vector<8x8xf32>
    %cst_30 = arith.constant dense<0.000000e+00> : vector<8xf32>
    %59 = vector.multi_reduction <add>, %58, %cst_30 [1] : vector<8x8xf32> to vector<8xf32>
    %60 = vector.shape_cast %59 : vector<8xf32> to vector<8x1xf32>
    %61 = tpu.reciprocal %60 : vector<8x1xf32> -> vector<8x1xf32>
    %62 = vector.broadcast %61 : vector<8x1xf32> to vector<8x8xf32>
    %63 = arith.mulf %58, %62 : vector<8x8xf32>
    %64 = arith.truncf %63 : vector<8x8xf32> to vector<8x8xbf16>
    %65 = vector.extract_strided_slice %45 {offsets = [0, 0], sizes = [8, 16], strides = [1, 1]} : vector<8x64xf32> to vector<8x16xf32>
    %66 = arith.truncf %65 : vector<8x16xf32> to vector<8x16xbf16>
    %cst_31 = arith.constant dense<0.000000e+00> : vector<8x16xf32>
    %67 = tpu.matmul %64, %66, %cst_31 {dimension_numbers = #tpu.dot_dimension_numbers<[1], [0], [0], [1], [0, 0, 1, 1], [], []>} : vector<8x8xbf16>, vector<8x16xbf16>, vector<8x16xf32> -> vector<8x16xf32>
    %68 = vector.extract_strided_slice %43 {offsets = [0, 16], sizes = [8, 16], strides = [1, 1]} : vector<8x64xf32> to vector<8x16xf32>
    %69 = arith.truncf %68 : vector<8x16xf32> to vector<8x16xbf16>
    %70 = vector.extract_strided_slice %44 {offsets = [0, 16], sizes = [8, 16], strides = [1, 1]} : vector<8x64xf32> to vector<8x16xf32>
    %71 = arith.truncf %70 : vector<8x16xf32> to vector<8x16xbf16>
    %cst_32 = arith.constant dense<0.000000e+00> : vector<8x8xf32>
    %72 = tpu.matmul %69, %71, %cst_32 {dimension_numbers = #tpu.dot_dimension_numbers<[1], [1], [0], [0], [0, 0, 1, 0], [], []>} : vector<8x16xbf16>, vector<8x16xbf16>, vector<8x8xf32> -> vector<8x8xf32>
    %cst_33 = arith.constant 2.500000e-01 : f32
    %73 = vector.broadcast %cst_33 : f32 to vector<8x8xf32>
    %74 = arith.mulf %72, %73 : vector<8x8xf32>
    %75 = arith.addf %74, %38 : vector<8x8xf32>
    %cst_34 = arith.constant dense<0xFF800000> : vector<8xf32>
    %76 = vector.multi_reduction <maximumf>, %75, %cst_34 [1] : vector<8x8xf32> to vector<8xf32>
    %77 = vector.shape_cast %76 : vector<8xf32> to vector<8x1xf32>
    %78 = vector.broadcast %77 : vector<8x1xf32> to vector<8x8xf32>
    %79 = arith.subf %75, %78 : vector<8x8xf32>
    %80 = math.exp %79 : vector<8x8xf32>
    %cst_35 = arith.constant dense<0.000000e+00> : vector<8xf32>
    %81 = vector.multi_reduction <add>, %80, %cst_35 [1] : vector<8x8xf32> to vector<8xf32>
    %82 = vector.shape_cast %81 : vector<8xf32> to vector<8x1xf32>
    %83 = tpu.reciprocal %82 : vector<8x1xf32> -> vector<8x1xf32>
    %84 = vector.broadcast %83 : vector<8x1xf32> to vector<8x8xf32>
    %85 = arith.mulf %80, %84 : vector<8x8xf32>
    %86 = arith.truncf %85 : vector<8x8xf32> to vector<8x8xbf16>
    %87 = vector.extract_strided_slice %45 {offsets = [0, 16], sizes = [8, 16], strides = [1, 1]} : vector<8x64xf32> to vector<8x16xf32>
    %88 = arith.truncf %87 : vector<8x16xf32> to vector<8x16xbf16>
    %cst_36 = arith.constant dense<0.000000e+00> : vector<8x16xf32>
    %89 = tpu.matmul %86, %88, %cst_36 {dimension_numbers = #tpu.dot_dimension_numbers<[1], [0], [0], [1], [0, 0, 1, 1], [], []>} : vector<8x8xbf16>, vector<8x16xbf16>, vector<8x16xf32> -> vector<8x16xf32>
    %90 = vector.extract_strided_slice %43 {offsets = [0, 32], sizes = [8, 16], strides = [1, 1]} : vector<8x64xf32> to vector<8x16xf32>
    %91 = arith.truncf %90 : vector<8x16xf32> to vector<8x16xbf16>
    %92 = vector.extract_strided_slice %44 {offsets = [0, 32], sizes = [8, 16], strides = [1, 1]} : vector<8x64xf32> to vector<8x16xf32>
    %93 = arith.truncf %92 : vector<8x16xf32> to vector<8x16xbf16>
    %cst_37 = arith.constant dense<0.000000e+00> : vector<8x8xf32>
    %94 = tpu.matmul %91, %93, %cst_37 {dimension_numbers = #tpu.dot_dimension_numbers<[1], [1], [0], [0], [0, 0, 1, 0], [], []>} : vector<8x16xbf16>, vector<8x16xbf16>, vector<8x8xf32> -> vector<8x8xf32>
    %cst_38 = arith.constant 2.500000e-01 : f32
    %95 = vector.broadcast %cst_38 : f32 to vector<8x8xf32>
    %96 = arith.mulf %94, %95 : vector<8x8xf32>
    %97 = arith.addf %96, %38 : vector<8x8xf32>
    %cst_39 = arith.constant dense<0xFF800000> : vector<8xf32>
    %98 = vector.multi_reduction <maximumf>, %97, %cst_39 [1] : vector<8x8xf32> to vector<8xf32>
    %99 = vector.shape_cast %98 : vector<8xf32> to vector<8x1xf32>
    %100 = vector.broadcast %99 : vector<8x1xf32> to vector<8x8xf32>
    %101 = arith.subf %97, %100 : vector<8x8xf32>
    %102 = math.exp %101 : vector<8x8xf32>
    %cst_40 = arith.constant dense<0.000000e+00> : vector<8xf32>
    %103 = vector.multi_reduction <add>, %102, %cst_40 [1] : vector<8x8xf32> to vector<8xf32>
    %104 = vector.shape_cast %103 : vector<8xf32> to vector<8x1xf32>
    %105 = tpu.reciprocal %104 : vector<8x1xf32> -> vector<8x1xf32>
    %106 = vector.broadcast %105 : vector<8x1xf32> to vector<8x8xf32>
    %107 = arith.mulf %102, %106 : vector<8x8xf32>
    %108 = arith.truncf %107 : vector<8x8xf32> to vector<8x8xbf16>
    %109 = vector.extract_strided_slice %45 {offsets = [0, 32], sizes = [8, 16], strides = [1, 1]} : vector<8x64xf32> to vector<8x16xf32>
    %110 = arith.truncf %109 : vector<8x16xf32> to vector<8x16xbf16>
    %cst_41 = arith.constant dense<0.000000e+00> : vector<8x16xf32>
    %111 = tpu.matmul %108, %110, %cst_41 {dimension_numbers = #tpu.dot_dimension_numbers<[1], [0], [0], [1], [0, 0, 1, 1], [], []>} : vector<8x8xbf16>, vector<8x16xbf16>, vector<8x16xf32> -> vector<8x16xf32>
    %112 = vector.extract_strided_slice %43 {offsets = [0, 48], sizes = [8, 16], strides = [1, 1]} : vector<8x64xf32> to vector<8x16xf32>
    %113 = arith.truncf %112 : vector<8x16xf32> to vector<8x16xbf16>
    %114 = vector.extract_strided_slice %44 {offsets = [0, 48], sizes = [8, 16], strides = [1, 1]} : vector<8x64xf32> to vector<8x16xf32>
    %115 = arith.truncf %114 : vector<8x16xf32> to vector<8x16xbf16>
    %cst_42 = arith.constant dense<0.000000e+00> : vector<8x8xf32>
    %116 = tpu.matmul %113, %115, %cst_42 {dimension_numbers = #tpu.dot_dimension_numbers<[1], [1], [0], [0], [0, 0, 1, 0], [], []>} : vector<8x16xbf16>, vector<8x16xbf16>, vector<8x8xf32> -> vector<8x8xf32>
    %cst_43 = arith.constant 2.500000e-01 : f32
    %117 = vector.broadcast %cst_43 : f32 to vector<8x8xf32>
    %118 = arith.mulf %116, %117 : vector<8x8xf32>
    %119 = arith.addf %118, %38 : vector<8x8xf32>
    %cst_44 = arith.constant dense<0xFF800000> : vector<8xf32>
    %120 = vector.multi_reduction <maximumf>, %119, %cst_44 [1] : vector<8x8xf32> to vector<8xf32>
    %121 = vector.shape_cast %120 : vector<8xf32> to vector<8x1xf32>
    %122 = vector.broadcast %121 : vector<8x1xf32> to vector<8x8xf32>
    %123 = arith.subf %119, %122 : vector<8x8xf32>
    %124 = math.exp %123 : vector<8x8xf32>
    %cst_45 = arith.constant dense<0.000000e+00> : vector<8xf32>
    %125 = vector.multi_reduction <add>, %124, %cst_45 [1] : vector<8x8xf32> to vector<8xf32>
    %126 = vector.shape_cast %125 : vector<8xf32> to vector<8x1xf32>
    %127 = tpu.reciprocal %126 : vector<8x1xf32> -> vector<8x1xf32>
    %128 = vector.broadcast %127 : vector<8x1xf32> to vector<8x8xf32>
    %129 = arith.mulf %124, %128 : vector<8x8xf32>
    %130 = arith.truncf %129 : vector<8x8xf32> to vector<8x8xbf16>
    %131 = vector.extract_strided_slice %45 {offsets = [0, 48], sizes = [8, 16], strides = [1, 1]} : vector<8x64xf32> to vector<8x16xf32>
    %132 = arith.truncf %131 : vector<8x16xf32> to vector<8x16xbf16>
    %cst_46 = arith.constant dense<0.000000e+00> : vector<8x16xf32>
    %133 = tpu.matmul %130, %132, %cst_46 {dimension_numbers = #tpu.dot_dimension_numbers<[1], [0], [0], [1], [0, 0, 1, 1], [], []>} : vector<8x8xbf16>, vector<8x16xbf16>, vector<8x16xf32> -> vector<8x16xf32>
    %134 = tpu.concatenate %67, %89, %111, %133 in 1 : vector<8x16xf32>, vector<8x16xf32>, vector<8x16xf32>, vector<8x16xf32> -> vector<8x64xf32>
    %135 = arith.truncf %134 : vector<8x64xf32> to vector<8x64xbf16>
    %cst_47 = arith.constant dense<0.000000e+00> : vector<8x64xf32>
    %136 = tpu.matmul %135, %35, %cst_47 {dimension_numbers = #tpu.dot_dimension_numbers<[1], [0], [0], [1], [0, 0, 1, 1], [], []>} : vector<8x64xbf16>, vector<64x64xbf16>, vector<8x64xf32> -> vector<8x64xf32>
    %137 = vector.broadcast %37 : vector<1x64xf32> to vector<8x64xf32>
    %138 = arith.addf %136, %137 : vector<8x64xf32>
    %139 = arith.addf %3, %138 : vector<8x64xf32>
    %c0_48 = arith.constant 0 : index
    %c0_49 = arith.constant 0 : index
    %c0_50 = arith.constant 0 : index
    %140 = vector.load %arg11[%c0_48, %c0_49, %c0_50] : memref<1x1x64xf32, #tpu.memory_space<vmem>>, vector<1x1x64xf32>
    %141 = vector.shape_cast %140 : vector<1x1x64xf32> to vector<1x64xf32>
    %c0_51 = arith.constant 0 : index
    %c0_52 = arith.constant 0 : index
    %c0_53 = arith.constant 0 : index
    %142 = vector.load %arg12[%c0_51, %c0_52, %c0_53] : memref<1x1x64xf32, #tpu.memory_space<vmem>>, vector<1x1x64xf32>
    %143 = vector.shape_cast %142 : vector<1x1x64xf32> to vector<1x64xf32>
    %cst_54 = arith.constant dense<0.000000e+00> : vector<8xf32>
    %144 = vector.multi_reduction <add>, %139, %cst_54 [1] : vector<8x64xf32> to vector<8xf32>
    %145 = vector.shape_cast %144 : vector<8xf32> to vector<8x1xf32>
    %cst_55 = arith.constant 6.400000e+01 : f32
    %146 = vector.broadcast %cst_55 : f32 to vector<8x1xf32>
    %147 = arith.divf %145, %146 : vector<8x1xf32>
    %148 = vector.broadcast %147 : vector<8x1xf32> to vector<8x64xf32>
    %149 = arith.subf %139, %148 : vector<8x64xf32>
    %150 = arith.mulf %149, %149 : vector<8x64xf32>
    %cst_56 = arith.constant dense<0.000000e+00> : vector<8xf32>
    %151 = vector.multi_reduction <add>, %150, %cst_56 [1] : vector<8x64xf32> to vector<8xf32>
    %152 = vector.shape_cast %151 : vector<8xf32> to vector<8x1xf32>
    %cst_57 = arith.constant 6.400000e+01 : f32
    %153 = vector.broadcast %cst_57 : f32 to vector<8x1xf32>
    %154 = arith.divf %152, %153 : vector<8x1xf32>
    %155 = vector.broadcast %147 : vector<8x1xf32> to vector<8x64xf32>
    %156 = arith.subf %139, %155 : vector<8x64xf32>
    %cst_58 = arith.constant 9.99999974E-6 : f32
    %157 = vector.broadcast %cst_58 : f32 to vector<8x1xf32>
    %158 = arith.addf %154, %157 : vector<8x1xf32>
    %159 = math.rsqrt %158 : vector<8x1xf32>
    %160 = vector.broadcast %159 : vector<8x1xf32> to vector<8x64xf32>
    %161 = arith.mulf %156, %160 : vector<8x64xf32>
    %162 = vector.broadcast %141 : vector<1x64xf32> to vector<8x64xf32>
    %163 = arith.mulf %161, %162 : vector<8x64xf32>
    %164 = vector.broadcast %143 : vector<1x64xf32> to vector<8x64xf32>
    %165 = arith.addf %163, %164 : vector<8x64xf32>
    %c0_59 = arith.constant 0 : index
    %c0_60 = arith.constant 0 : index
    %c0_61 = arith.constant 0 : index
    %166 = vector.load %arg3[%c0_59, %c0_60, %c0_61] : memref<1x8x64xf32, #tpu.memory_space<vmem>>, vector<1x8x64xf32>
    %167 = vector.shape_cast %166 : vector<1x8x64xf32> to vector<8x64xf32>
    %c0_62 = arith.constant 0 : index
    %c0_63 = arith.constant 0 : index
    %c0_64 = arith.constant 0 : index
    %168 = vector.load %arg13[%c0_62, %c0_63, %c0_64] : memref<1x1x64xf32, #tpu.memory_space<vmem>>, vector<1x1x64xf32>
    %169 = vector.shape_cast %168 : vector<1x1x64xf32> to vector<1x64xf32>
    %c0_65 = arith.constant 0 : index
    %c0_66 = arith.constant 0 : index
    %c0_67 = arith.constant 0 : index
    %170 = vector.load %arg14[%c0_65, %c0_66, %c0_67] : memref<1x1x64xf32, #tpu.memory_space<vmem>>, vector<1x1x64xf32>
    %171 = vector.shape_cast %170 : vector<1x1x64xf32> to vector<1x64xf32>
    %cst_68 = arith.constant dense<0.000000e+00> : vector<8xf32>
    %172 = vector.multi_reduction <add>, %167, %cst_68 [1] : vector<8x64xf32> to vector<8xf32>
    %173 = vector.shape_cast %172 : vector<8xf32> to vector<8x1xf32>
    %cst_69 = arith.constant 6.400000e+01 : f32
    %174 = vector.broadcast %cst_69 : f32 to vector<8x1xf32>
    %175 = arith.divf %173, %174 : vector<8x1xf32>
    %176 = vector.broadcast %175 : vector<8x1xf32> to vector<8x64xf32>
    %177 = arith.subf %167, %176 : vector<8x64xf32>
    %178 = arith.mulf %177, %177 : vector<8x64xf32>
    %cst_70 = arith.constant dense<0.000000e+00> : vector<8xf32>
    %179 = vector.multi_reduction <add>, %178, %cst_70 [1] : vector<8x64xf32> to vector<8xf32>
    %180 = vector.shape_cast %179 : vector<8xf32> to vector<8x1xf32>
    %cst_71 = arith.constant 6.400000e+01 : f32
    %181 = vector.broadcast %cst_71 : f32 to vector<8x1xf32>
    %182 = arith.divf %180, %181 : vector<8x1xf32>
    %183 = vector.broadcast %175 : vector<8x1xf32> to vector<8x64xf32>
    %184 = arith.subf %167, %183 : vector<8x64xf32>
    %cst_72 = arith.constant 9.99999974E-6 : f32
    %185 = vector.broadcast %cst_72 : f32 to vector<8x1xf32>
    %186 = arith.addf %182, %185 : vector<8x1xf32>
    %187 = math.rsqrt %186 : vector<8x1xf32>
    %188 = vector.broadcast %187 : vector<8x1xf32> to vector<8x64xf32>
    %189 = arith.mulf %184, %188 : vector<8x64xf32>
    %190 = vector.broadcast %169 : vector<1x64xf32> to vector<8x64xf32>
    %191 = arith.mulf %189, %190 : vector<8x64xf32>
    %192 = vector.broadcast %171 : vector<1x64xf32> to vector<8x64xf32>
    %193 = arith.addf %191, %192 : vector<8x64xf32>
    %c0_73 = arith.constant 0 : index
    %c0_74 = arith.constant 0 : index
    %c0_75 = arith.constant 0 : index
    %194 = vector.load %arg15[%c0_73, %c0_74, %c0_75] : memref<1x64x64xbf16, #tpu.memory_space<vmem>>, vector<1x64x64xbf16>
    %195 = vector.shape_cast %194 : vector<1x64x64xbf16> to vector<64x64xbf16>
    %c0_76 = arith.constant 0 : index
    %c0_77 = arith.constant 0 : index
    %c0_78 = arith.constant 0 : index
    %196 = vector.load %arg16[%c0_76, %c0_77, %c0_78] : memref<1x1x64xf32, #tpu.memory_space<vmem>>, vector<1x1x64xf32>
    %197 = vector.shape_cast %196 : vector<1x1x64xf32> to vector<1x64xf32>
    %c0_79 = arith.constant 0 : index
    %c0_80 = arith.constant 0 : index
    %c0_81 = arith.constant 0 : index
    %198 = vector.load %arg17[%c0_79, %c0_80, %c0_81] : memref<1x64x128xbf16, #tpu.memory_space<vmem>>, vector<1x64x128xbf16>
    %199 = vector.shape_cast %198 : vector<1x64x128xbf16> to vector<64x128xbf16>
    %c0_82 = arith.constant 0 : index
    %c0_83 = arith.constant 0 : index
    %c0_84 = arith.constant 0 : index
    %200 = vector.load %arg18[%c0_82, %c0_83, %c0_84] : memref<1x1x128xf32, #tpu.memory_space<vmem>>, vector<1x1x128xf32>
    %201 = vector.shape_cast %200 : vector<1x1x128xf32> to vector<1x128xf32>
    %c0_85 = arith.constant 0 : index
    %c0_86 = arith.constant 0 : index
    %c0_87 = arith.constant 0 : index
    %202 = vector.load %arg19[%c0_85, %c0_86, %c0_87] : memref<1x64x64xbf16, #tpu.memory_space<vmem>>, vector<1x64x64xbf16>
    %203 = vector.shape_cast %202 : vector<1x64x64xbf16> to vector<64x64xbf16>
    %c0_88 = arith.constant 0 : index
    %c0_89 = arith.constant 0 : index
    %c0_90 = arith.constant 0 : index
    %204 = vector.load %arg20[%c0_88, %c0_89, %c0_90] : memref<1x1x64xf32, #tpu.memory_space<vmem>>, vector<1x1x64xf32>
    %205 = vector.shape_cast %204 : vector<1x1x64xf32> to vector<1x64xf32>
    %206 = arith.truncf %165 : vector<8x64xf32> to vector<8x64xbf16>
    %cst_91 = arith.constant dense<0.000000e+00> : vector<8x64xf32>
    %207 = tpu.matmul %206, %195, %cst_91 {dimension_numbers = #tpu.dot_dimension_numbers<[1], [0], [0], [1], [0, 0, 1, 1], [], []>} : vector<8x64xbf16>, vector<64x64xbf16>, vector<8x64xf32> -> vector<8x64xf32>
    %208 = vector.broadcast %197 : vector<1x64xf32> to vector<8x64xf32>
    %209 = arith.addf %207, %208 : vector<8x64xf32>
    %210 = arith.truncf %193 : vector<8x64xf32> to vector<8x64xbf16>
    %cst_92 = arith.constant dense<0.000000e+00> : vector<8x128xf32>
    %211 = tpu.matmul %210, %199, %cst_92 {dimension_numbers = #tpu.dot_dimension_numbers<[1], [0], [0], [1], [0, 0, 1, 1], [], []>} : vector<8x64xbf16>, vector<64x128xbf16>, vector<8x128xf32> -> vector<8x128xf32>
    %212 = vector.broadcast %201 : vector<1x128xf32> to vector<8x128xf32>
    %213 = arith.addf %211, %212 : vector<8x128xf32>
    %214 = vector.extract_strided_slice %213 {offsets = [0, 0], sizes = [8, 64], strides = [1, 1]} : vector<8x128xf32> to vector<8x64xf32>
    %215 = vector.extract_strided_slice %213 {offsets = [0, 64], sizes = [8, 64], strides = [1, 1]} : vector<8x128xf32> to vector<8x64xf32>
    %216 = vector.extract_strided_slice %209 {offsets = [0, 0], sizes = [8, 16], strides = [1, 1]} : vector<8x64xf32> to vector<8x16xf32>
    %217 = arith.truncf %216 : vector<8x16xf32> to vector<8x16xbf16>
    %218 = vector.extract_strided_slice %214 {offsets = [0, 0], sizes = [8, 16], strides = [1, 1]} : vector<8x64xf32> to vector<8x16xf32>
    %219 = arith.truncf %218 : vector<8x16xf32> to vector<8x16xbf16>
    %cst_93 = arith.constant dense<0.000000e+00> : vector<8x8xf32>
    %220 = tpu.matmul %217, %219, %cst_93 {dimension_numbers = #tpu.dot_dimension_numbers<[1], [1], [0], [0], [0, 0, 1, 0], [], []>} : vector<8x16xbf16>, vector<8x16xbf16>, vector<8x8xf32> -> vector<8x8xf32>
    %cst_94 = arith.constant 2.500000e-01 : f32
    %221 = vector.broadcast %cst_94 : f32 to vector<8x8xf32>
    %222 = arith.mulf %220, %221 : vector<8x8xf32>
    %cst_95 = arith.constant dense<0xFF800000> : vector<8xf32>
    %223 = vector.multi_reduction <maximumf>, %222, %cst_95 [1] : vector<8x8xf32> to vector<8xf32>
    %224 = vector.shape_cast %223 : vector<8xf32> to vector<8x1xf32>
    %225 = vector.broadcast %224 : vector<8x1xf32> to vector<8x8xf32>
    %226 = arith.subf %222, %225 : vector<8x8xf32>
    %227 = math.exp %226 : vector<8x8xf32>
    %cst_96 = arith.constant dense<0.000000e+00> : vector<8xf32>
    %228 = vector.multi_reduction <add>, %227, %cst_96 [1] : vector<8x8xf32> to vector<8xf32>
    %229 = vector.shape_cast %228 : vector<8xf32> to vector<8x1xf32>
    %230 = tpu.reciprocal %229 : vector<8x1xf32> -> vector<8x1xf32>
    %231 = vector.broadcast %230 : vector<8x1xf32> to vector<8x8xf32>
    %232 = arith.mulf %227, %231 : vector<8x8xf32>
    %233 = arith.truncf %232 : vector<8x8xf32> to vector<8x8xbf16>
    %234 = vector.extract_strided_slice %215 {offsets = [0, 0], sizes = [8, 16], strides = [1, 1]} : vector<8x64xf32> to vector<8x16xf32>
    %235 = arith.truncf %234 : vector<8x16xf32> to vector<8x16xbf16>
    %cst_97 = arith.constant dense<0.000000e+00> : vector<8x16xf32>
    %236 = tpu.matmul %233, %235, %cst_97 {dimension_numbers = #tpu.dot_dimension_numbers<[1], [0], [0], [1], [0, 0, 1, 1], [], []>} : vector<8x8xbf16>, vector<8x16xbf16>, vector<8x16xf32> -> vector<8x16xf32>
    %237 = vector.extract_strided_slice %209 {offsets = [0, 16], sizes = [8, 16], strides = [1, 1]} : vector<8x64xf32> to vector<8x16xf32>
    %238 = arith.truncf %237 : vector<8x16xf32> to vector<8x16xbf16>
    %239 = vector.extract_strided_slice %214 {offsets = [0, 16], sizes = [8, 16], strides = [1, 1]} : vector<8x64xf32> to vector<8x16xf32>
    %240 = arith.truncf %239 : vector<8x16xf32> to vector<8x16xbf16>
    %cst_98 = arith.constant dense<0.000000e+00> : vector<8x8xf32>
    %241 = tpu.matmul %238, %240, %cst_98 {dimension_numbers = #tpu.dot_dimension_numbers<[1], [1], [0], [0], [0, 0, 1, 0], [], []>} : vector<8x16xbf16>, vector<8x16xbf16>, vector<8x8xf32> -> vector<8x8xf32>
    %cst_99 = arith.constant 2.500000e-01 : f32
    %242 = vector.broadcast %cst_99 : f32 to vector<8x8xf32>
    %243 = arith.mulf %241, %242 : vector<8x8xf32>
    %cst_100 = arith.constant dense<0xFF800000> : vector<8xf32>
    %244 = vector.multi_reduction <maximumf>, %243, %cst_100 [1] : vector<8x8xf32> to vector<8xf32>
    %245 = vector.shape_cast %244 : vector<8xf32> to vector<8x1xf32>
    %246 = vector.broadcast %245 : vector<8x1xf32> to vector<8x8xf32>
    %247 = arith.subf %243, %246 : vector<8x8xf32>
    %248 = math.exp %247 : vector<8x8xf32>
    %cst_101 = arith.constant dense<0.000000e+00> : vector<8xf32>
    %249 = vector.multi_reduction <add>, %248, %cst_101 [1] : vector<8x8xf32> to vector<8xf32>
    %250 = vector.shape_cast %249 : vector<8xf32> to vector<8x1xf32>
    %251 = tpu.reciprocal %250 : vector<8x1xf32> -> vector<8x1xf32>
    %252 = vector.broadcast %251 : vector<8x1xf32> to vector<8x8xf32>
    %253 = arith.mulf %248, %252 : vector<8x8xf32>
    %254 = arith.truncf %253 : vector<8x8xf32> to vector<8x8xbf16>
    %255 = vector.extract_strided_slice %215 {offsets = [0, 16], sizes = [8, 16], strides = [1, 1]} : vector<8x64xf32> to vector<8x16xf32>
    %256 = arith.truncf %255 : vector<8x16xf32> to vector<8x16xbf16>
    %cst_102 = arith.constant dense<0.000000e+00> : vector<8x16xf32>
    %257 = tpu.matmul %254, %256, %cst_102 {dimension_numbers = #tpu.dot_dimension_numbers<[1], [0], [0], [1], [0, 0, 1, 1], [], []>} : vector<8x8xbf16>, vector<8x16xbf16>, vector<8x16xf32> -> vector<8x16xf32>
    %258 = vector.extract_strided_slice %209 {offsets = [0, 32], sizes = [8, 16], strides = [1, 1]} : vector<8x64xf32> to vector<8x16xf32>
    %259 = arith.truncf %258 : vector<8x16xf32> to vector<8x16xbf16>
    %260 = vector.extract_strided_slice %214 {offsets = [0, 32], sizes = [8, 16], strides = [1, 1]} : vector<8x64xf32> to vector<8x16xf32>
    %261 = arith.truncf %260 : vector<8x16xf32> to vector<8x16xbf16>
    %cst_103 = arith.constant dense<0.000000e+00> : vector<8x8xf32>
    %262 = tpu.matmul %259, %261, %cst_103 {dimension_numbers = #tpu.dot_dimension_numbers<[1], [1], [0], [0], [0, 0, 1, 0], [], []>} : vector<8x16xbf16>, vector<8x16xbf16>, vector<8x8xf32> -> vector<8x8xf32>
    %cst_104 = arith.constant 2.500000e-01 : f32
    %263 = vector.broadcast %cst_104 : f32 to vector<8x8xf32>
    %264 = arith.mulf %262, %263 : vector<8x8xf32>
    %cst_105 = arith.constant dense<0xFF800000> : vector<8xf32>
    %265 = vector.multi_reduction <maximumf>, %264, %cst_105 [1] : vector<8x8xf32> to vector<8xf32>
    %266 = vector.shape_cast %265 : vector<8xf32> to vector<8x1xf32>
    %267 = vector.broadcast %266 : vector<8x1xf32> to vector<8x8xf32>
    %268 = arith.subf %264, %267 : vector<8x8xf32>
    %269 = math.exp %268 : vector<8x8xf32>
    %cst_106 = arith.constant dense<0.000000e+00> : vector<8xf32>
    %270 = vector.multi_reduction <add>, %269, %cst_106 [1] : vector<8x8xf32> to vector<8xf32>
    %271 = vector.shape_cast %270 : vector<8xf32> to vector<8x1xf32>
    %272 = tpu.reciprocal %271 : vector<8x1xf32> -> vector<8x1xf32>
    %273 = vector.broadcast %272 : vector<8x1xf32> to vector<8x8xf32>
    %274 = arith.mulf %269, %273 : vector<8x8xf32>
    %275 = arith.truncf %274 : vector<8x8xf32> to vector<8x8xbf16>
    %276 = vector.extract_strided_slice %215 {offsets = [0, 32], sizes = [8, 16], strides = [1, 1]} : vector<8x64xf32> to vector<8x16xf32>
    %277 = arith.truncf %276 : vector<8x16xf32> to vector<8x16xbf16>
    %cst_107 = arith.constant dense<0.000000e+00> : vector<8x16xf32>
    %278 = tpu.matmul %275, %277, %cst_107 {dimension_numbers = #tpu.dot_dimension_numbers<[1], [0], [0], [1], [0, 0, 1, 1], [], []>} : vector<8x8xbf16>, vector<8x16xbf16>, vector<8x16xf32> -> vector<8x16xf32>
    %279 = vector.extract_strided_slice %209 {offsets = [0, 48], sizes = [8, 16], strides = [1, 1]} : vector<8x64xf32> to vector<8x16xf32>
    %280 = arith.truncf %279 : vector<8x16xf32> to vector<8x16xbf16>
    %281 = vector.extract_strided_slice %214 {offsets = [0, 48], sizes = [8, 16], strides = [1, 1]} : vector<8x64xf32> to vector<8x16xf32>
    %282 = arith.truncf %281 : vector<8x16xf32> to vector<8x16xbf16>
    %cst_108 = arith.constant dense<0.000000e+00> : vector<8x8xf32>
    %283 = tpu.matmul %280, %282, %cst_108 {dimension_numbers = #tpu.dot_dimension_numbers<[1], [1], [0], [0], [0, 0, 1, 0], [], []>} : vector<8x16xbf16>, vector<8x16xbf16>, vector<8x8xf32> -> vector<8x8xf32>
    %cst_109 = arith.constant 2.500000e-01 : f32
    %284 = vector.broadcast %cst_109 : f32 to vector<8x8xf32>
    %285 = arith.mulf %283, %284 : vector<8x8xf32>
    %cst_110 = arith.constant dense<0xFF800000> : vector<8xf32>
    %286 = vector.multi_reduction <maximumf>, %285, %cst_110 [1] : vector<8x8xf32> to vector<8xf32>
    %287 = vector.shape_cast %286 : vector<8xf32> to vector<8x1xf32>
    %288 = vector.broadcast %287 : vector<8x1xf32> to vector<8x8xf32>
    %289 = arith.subf %285, %288 : vector<8x8xf32>
    %290 = math.exp %289 : vector<8x8xf32>
    %cst_111 = arith.constant dense<0.000000e+00> : vector<8xf32>
    %291 = vector.multi_reduction <add>, %290, %cst_111 [1] : vector<8x8xf32> to vector<8xf32>
    %292 = vector.shape_cast %291 : vector<8xf32> to vector<8x1xf32>
    %293 = tpu.reciprocal %292 : vector<8x1xf32> -> vector<8x1xf32>
    %294 = vector.broadcast %293 : vector<8x1xf32> to vector<8x8xf32>
    %295 = arith.mulf %290, %294 : vector<8x8xf32>
    %296 = arith.truncf %295 : vector<8x8xf32> to vector<8x8xbf16>
    %297 = vector.extract_strided_slice %215 {offsets = [0, 48], sizes = [8, 16], strides = [1, 1]} : vector<8x64xf32> to vector<8x16xf32>
    %298 = arith.truncf %297 : vector<8x16xf32> to vector<8x16xbf16>
    %cst_112 = arith.constant dense<0.000000e+00> : vector<8x16xf32>
    %299 = tpu.matmul %296, %298, %cst_112 {dimension_numbers = #tpu.dot_dimension_numbers<[1], [0], [0], [1], [0, 0, 1, 1], [], []>} : vector<8x8xbf16>, vector<8x16xbf16>, vector<8x16xf32> -> vector<8x16xf32>
    %300 = tpu.concatenate %236, %257, %278, %299 in 1 : vector<8x16xf32>, vector<8x16xf32>, vector<8x16xf32>, vector<8x16xf32> -> vector<8x64xf32>
    %301 = arith.truncf %300 : vector<8x64xf32> to vector<8x64xbf16>
    %cst_113 = arith.constant dense<0.000000e+00> : vector<8x64xf32>
    %302 = tpu.matmul %301, %203, %cst_113 {dimension_numbers = #tpu.dot_dimension_numbers<[1], [0], [0], [1], [0, 0, 1, 1], [], []>} : vector<8x64xbf16>, vector<64x64xbf16>, vector<8x64xf32> -> vector<8x64xf32>
    %303 = vector.broadcast %205 : vector<1x64xf32> to vector<8x64xf32>
    %304 = arith.addf %302, %303 : vector<8x64xf32>
    %305 = arith.addf %139, %304 : vector<8x64xf32>
    %c0_114 = arith.constant 0 : index
    %c0_115 = arith.constant 0 : index
    %c0_116 = arith.constant 0 : index
    %306 = vector.load %arg21[%c0_114, %c0_115, %c0_116] : memref<1x1x64xf32, #tpu.memory_space<vmem>>, vector<1x1x64xf32>
    %307 = vector.shape_cast %306 : vector<1x1x64xf32> to vector<1x64xf32>
    %c0_117 = arith.constant 0 : index
    %c0_118 = arith.constant 0 : index
    %c0_119 = arith.constant 0 : index
    %308 = vector.load %arg22[%c0_117, %c0_118, %c0_119] : memref<1x1x64xf32, #tpu.memory_space<vmem>>, vector<1x1x64xf32>
    %309 = vector.shape_cast %308 : vector<1x1x64xf32> to vector<1x64xf32>
    %cst_120 = arith.constant dense<0.000000e+00> : vector<8xf32>
    %310 = vector.multi_reduction <add>, %305, %cst_120 [1] : vector<8x64xf32> to vector<8xf32>
    %311 = vector.shape_cast %310 : vector<8xf32> to vector<8x1xf32>
    %cst_121 = arith.constant 6.400000e+01 : f32
    %312 = vector.broadcast %cst_121 : f32 to vector<8x1xf32>
    %313 = arith.divf %311, %312 : vector<8x1xf32>
    %314 = vector.broadcast %313 : vector<8x1xf32> to vector<8x64xf32>
    %315 = arith.subf %305, %314 : vector<8x64xf32>
    %316 = arith.mulf %315, %315 : vector<8x64xf32>
    %cst_122 = arith.constant dense<0.000000e+00> : vector<8xf32>
    %317 = vector.multi_reduction <add>, %316, %cst_122 [1] : vector<8x64xf32> to vector<8xf32>
    %318 = vector.shape_cast %317 : vector<8xf32> to vector<8x1xf32>
    %cst_123 = arith.constant 6.400000e+01 : f32
    %319 = vector.broadcast %cst_123 : f32 to vector<8x1xf32>
    %320 = arith.divf %318, %319 : vector<8x1xf32>
    %321 = vector.broadcast %313 : vector<8x1xf32> to vector<8x64xf32>
    %322 = arith.subf %305, %321 : vector<8x64xf32>
    %cst_124 = arith.constant 9.99999974E-6 : f32
    %323 = vector.broadcast %cst_124 : f32 to vector<8x1xf32>
    %324 = arith.addf %320, %323 : vector<8x1xf32>
    %325 = math.rsqrt %324 : vector<8x1xf32>
    %326 = vector.broadcast %325 : vector<8x1xf32> to vector<8x64xf32>
    %327 = arith.mulf %322, %326 : vector<8x64xf32>
    %328 = vector.broadcast %307 : vector<1x64xf32> to vector<8x64xf32>
    %329 = arith.mulf %327, %328 : vector<8x64xf32>
    %330 = vector.broadcast %309 : vector<1x64xf32> to vector<8x64xf32>
    %331 = arith.addf %329, %330 : vector<8x64xf32>
    %c0_125 = arith.constant 0 : index
    %c0_126 = arith.constant 0 : index
    %c0_127 = arith.constant 0 : index
    %332 = vector.load %arg23[%c0_125, %c0_126, %c0_127] : memref<1x64x256xbf16, #tpu.memory_space<vmem>>, vector<1x64x256xbf16>
    %333 = vector.shape_cast %332 : vector<1x64x256xbf16> to vector<64x256xbf16>
    %c0_128 = arith.constant 0 : index
    %c0_129 = arith.constant 0 : index
    %c0_130 = arith.constant 0 : index
    %334 = vector.load %arg24[%c0_128, %c0_129, %c0_130] : memref<1x1x256xf32, #tpu.memory_space<vmem>>, vector<1x1x256xf32>
    %335 = vector.shape_cast %334 : vector<1x1x256xf32> to vector<1x256xf32>
    %c0_131 = arith.constant 0 : index
    %c0_132 = arith.constant 0 : index
    %c0_133 = arith.constant 0 : index
    %336 = vector.load %arg25[%c0_131, %c0_132, %c0_133] : memref<1x256x64xbf16, #tpu.memory_space<vmem>>, vector<1x256x64xbf16>
    %337 = vector.shape_cast %336 : vector<1x256x64xbf16> to vector<256x64xbf16>
    %c0_134 = arith.constant 0 : index
    %c0_135 = arith.constant 0 : index
    %c0_136 = arith.constant 0 : index
    %338 = vector.load %arg26[%c0_134, %c0_135, %c0_136] : memref<1x1x64xf32, #tpu.memory_space<vmem>>, vector<1x1x64xf32>
    %339 = vector.shape_cast %338 : vector<1x1x64xf32> to vector<1x64xf32>
    %340 = arith.truncf %331 : vector<8x64xf32> to vector<8x64xbf16>
    %cst_137 = arith.constant dense<0.000000e+00> : vector<8x256xf32>
    %341 = tpu.matmul %340, %333, %cst_137 {dimension_numbers = #tpu.dot_dimension_numbers<[1], [0], [0], [1], [0, 0, 1, 1], [], []>} : vector<8x64xbf16>, vector<64x256xbf16>, vector<8x256xf32> -> vector<8x256xf32>
    %342 = vector.broadcast %335 : vector<1x256xf32> to vector<8x256xf32>
    %343 = arith.addf %341, %342 : vector<8x256xf32>
    %344 = arith.mulf %343, %343 : vector<8x256xf32>
    %345 = arith.mulf %343, %344 : vector<8x256xf32>
    %cst_138 = arith.constant 4.471500e-02 : f32
    %346 = vector.broadcast %cst_138 : f32 to vector<8x256xf32>
    %347 = arith.mulf %346, %345 : vector<8x256xf32>
    %348 = arith.addf %343, %347 : vector<8x256xf32>
    %cst_139 = arith.constant 0.797884583 : f32
    %349 = vector.broadcast %cst_139 : f32 to vector<8x256xf32>
    %350 = arith.mulf %349, %348 : vector<8x256xf32>
    %351 = math.tanh %350 : vector<8x256xf32>
    %cst_140 = arith.constant 1.000000e+00 : f32
    %352 = vector.broadcast %cst_140 : f32 to vector<8x256xf32>
    %353 = arith.addf %352, %351 : vector<8x256xf32>
    %cst_141 = arith.constant 5.000000e-01 : f32
    %354 = vector.broadcast %cst_141 : f32 to vector<8x256xf32>
    %355 = arith.mulf %354, %353 : vector<8x256xf32>
    %356 = arith.mulf %343, %355 : vector<8x256xf32>
    %357 = arith.truncf %356 : vector<8x256xf32> to vector<8x256xbf16>
    %cst_142 = arith.constant dense<0.000000e+00> : vector<8x64xf32>
    %358 = tpu.matmul %357, %337, %cst_142 {dimension_numbers = #tpu.dot_dimension_numbers<[1], [0], [0], [1], [0, 0, 1, 1], [], []>} : vector<8x256xbf16>, vector<256x64xbf16>, vector<8x64xf32> -> vector<8x64xf32>
    %359 = vector.broadcast %339 : vector<1x64xf32> to vector<8x64xf32>
    %360 = arith.addf %358, %359 : vector<8x64xf32>
    %361 = arith.addf %305, %360 : vector<8x64xf32>
    %c0_143 = arith.constant 0 : index
    %c0_144 = arith.constant 0 : index
    %362 = vector.load %arg32[%c0_143, %c0_144] : memref<8x64xf32, #tpu.memory_space<vmem>>, vector<8x64xf32>
    tpu.vector_store %arg32[%c0_143, %c0_144], %361 {strides = array<i32>} : memref<8x64xf32, #tpu.memory_space<vmem>>, vector<8x64xf32>,
    %c1_i32 = arith.constant 1 : i32
    %363 = arith.cmpi eq, %arg1, %c1_i32 : i32
    %364 = arith.extui %363 : i1 to i32
    %c0_i32_145 = arith.constant 0 : i32
    %365 = arith.cmpi ne, %364, %c0_i32_145 : i32
    scf.if %365 {
      %c0_146 = arith.constant 0 : index
      %c0_147 = arith.constant 0 : index
      %366 = vector.load %arg27[%c0_146, %c0_147] : memref<1x64xf32, #tpu.memory_space<vmem>>, vector<1x64xf32>
      %c0_148 = arith.constant 0 : index
      %c0_149 = arith.constant 0 : index
      %367 = vector.load %arg28[%c0_148, %c0_149] : memref<1x64xf32, #tpu.memory_space<vmem>>, vector<1x64xf32>
      %cst_150 = arith.constant dense<0.000000e+00> : vector<8xf32>
      %368 = vector.multi_reduction <add>, %361, %cst_150 [1] : vector<8x64xf32> to vector<8xf32>
      %369 = vector.shape_cast %368 : vector<8xf32> to vector<8x1xf32>
      %cst_151 = arith.constant 6.400000e+01 : f32
      %370 = vector.broadcast %cst_151 : f32 to vector<8x1xf32>
      %371 = arith.divf %369, %370 : vector<8x1xf32>
      %372 = vector.broadcast %371 : vector<8x1xf32> to vector<8x64xf32>
      %373 = arith.subf %361, %372 : vector<8x64xf32>
      %374 = arith.mulf %373, %373 : vector<8x64xf32>
      %cst_152 = arith.constant dense<0.000000e+00> : vector<8xf32>
      %375 = vector.multi_reduction <add>, %374, %cst_152 [1] : vector<8x64xf32> to vector<8xf32>
      %376 = vector.shape_cast %375 : vector<8xf32> to vector<8x1xf32>
      %cst_153 = arith.constant 6.400000e+01 : f32
      %377 = vector.broadcast %cst_153 : f32 to vector<8x1xf32>
      %378 = arith.divf %376, %377 : vector<8x1xf32>
      %379 = vector.broadcast %371 : vector<8x1xf32> to vector<8x64xf32>
      %380 = arith.subf %361, %379 : vector<8x64xf32>
      %cst_154 = arith.constant 9.99999974E-6 : f32
      %381 = vector.broadcast %cst_154 : f32 to vector<8x1xf32>
      %382 = arith.addf %378, %381 : vector<8x1xf32>
      %383 = math.rsqrt %382 : vector<8x1xf32>
      %384 = vector.broadcast %383 : vector<8x1xf32> to vector<8x64xf32>
      %385 = arith.mulf %380, %384 : vector<8x64xf32>
      %386 = vector.broadcast %366 : vector<1x64xf32> to vector<8x64xf32>
      %387 = arith.mulf %385, %386 : vector<8x64xf32>
      %388 = vector.broadcast %367 : vector<1x64xf32> to vector<8x64xf32>
      %389 = arith.addf %387, %388 : vector<8x64xf32>
      %390 = arith.truncf %389 : vector<8x64xf32> to vector<8x64xbf16>
      %c0_155 = arith.constant 0 : index
      %c0_156 = arith.constant 0 : index
      %391 = vector.load %arg29[%c0_155, %c0_156] : memref<64x128xbf16, #tpu.memory_space<vmem>>, vector<64x128xbf16>
      %cst_157 = arith.constant dense<0.000000e+00> : vector<8x128xf32>
      %392 = tpu.matmul %390, %391, %cst_157 {dimension_numbers = #tpu.dot_dimension_numbers<[1], [0], [0], [1], [0, 0, 1, 1], [], []>} : vector<8x64xbf16>, vector<64x128xbf16>, vector<8x128xf32> -> vector<8x128xf32>
      %c0_158 = arith.constant 0 : index
      %c0_159 = arith.constant 0 : index
      %393 = vector.load %arg30[%c0_158, %c0_159] : memref<1x128xf32, #tpu.memory_space<vmem>>, vector<1x128xf32>
      %394 = vector.broadcast %393 : vector<1x128xf32> to vector<8x128xf32>
      %395 = arith.addf %392, %394 : vector<8x128xf32>
      %c0_160 = arith.constant 0 : index
      %c0_161 = arith.constant 0 : index
      %c0_162 = arith.constant 0 : index
      %396 = vector.load %arg31[%c0_160, %c0_161, %c0_162] : memref<1x8x128xf32, #tpu.memory_space<vmem>>, vector<1x8x128xf32>
      %397 = vector.shape_cast %396 : vector<1x8x128xf32> to vector<8x128xf32>
      %398 = vector.shape_cast %395 : vector<8x128xf32> to vector<1x8x128xf32>
      tpu.vector_store %arg31[%c0_160, %c0_161, %c0_162], %398 {strides = array<i32>} : memref<1x8x128xf32, #tpu.memory_space<vmem>>, vector<1x8x128xf32>,
    } else {
    }
    return
  }
  func.func @transform_0(%arg0: i32, %arg1: i32) -> (i32, i32, i32) {
    %c0_i32 = arith.constant 0 : i32
    %c0_i32_0 = arith.constant 0 : i32
    %c0_i32_1 = arith.constant 0 : i32
    return %arg0, %c0_i32, %c0_i32_0 : i32, i32, i32
  }
  func.func @transform_1(%arg0: i32, %arg1: i32) -> (i32, i32, i32) {
    %c0_i32 = arith.constant 0 : i32
    %c0_i32_0 = arith.constant 0 : i32
    %c0_i32_1 = arith.constant 0 : i32
    return %arg0, %c0_i32, %c0_i32_0 : i32, i32, i32
  }
  func.func @transform_2(%arg0: i32, %arg1: i32) -> (i32, i32) {
    %c0_i32 = arith.constant 0 : i32
    %c0_i32_0 = arith.constant 0 : i32
    %c0_i32_1 = arith.constant 0 : i32
    return %c0_i32, %c0_i32_0 : i32, i32
  }
  func.func @transform_3(%arg0: i32, %arg1: i32) -> (i32, i32, i32) {
    %c0_i32 = arith.constant 0 : i32
    %c0_i32_0 = arith.constant 0 : i32
    %c0_i32_1 = arith.constant 0 : i32
    return %arg1, %c0_i32, %c0_i32_0 : i32, i32, i32
  }
  func.func @transform_4(%arg0: i32, %arg1: i32) -> (i32, i32, i32) {
    %c0_i32 = arith.constant 0 : i32
    %c0_i32_0 = arith.constant 0 : i32
    %c0_i32_1 = arith.constant 0 : i32
    return %arg1, %c0_i32, %c0_i32_0 : i32, i32, i32
  }
  func.func @transform_5(%arg0: i32, %arg1: i32) -> (i32, i32, i32) {
    %c0_i32 = arith.constant 0 : i32
    %c0_i32_0 = arith.constant 0 : i32
    %c0_i32_1 = arith.constant 0 : i32
    return %arg1, %c0_i32, %c0_i32_0 : i32, i32, i32
  }
  func.func @transform_6(%arg0: i32, %arg1: i32) -> (i32, i32, i32) {
    %c0_i32 = arith.constant 0 : i32
    %c0_i32_0 = arith.constant 0 : i32
    %c0_i32_1 = arith.constant 0 : i32
    return %arg1, %c0_i32, %c0_i32_0 : i32, i32, i32
  }
  func.func @transform_7(%arg0: i32, %arg1: i32) -> (i32, i32, i32) {
    %c0_i32 = arith.constant 0 : i32
    %c0_i32_0 = arith.constant 0 : i32
    %c0_i32_1 = arith.constant 0 : i32
    return %arg1, %c0_i32, %c0_i32_0 : i32, i32, i32
  }
  func.func @transform_8(%arg0: i32, %arg1: i32) -> (i32, i32, i32) {
    %c0_i32 = arith.constant 0 : i32
    %c0_i32_0 = arith.constant 0 : i32
    %c0_i32_1 = arith.constant 0 : i32
    return %arg1, %c0_i32, %c0_i32_0 : i32, i32, i32
  }
  func.func @transform_9(%arg0: i32, %arg1: i32) -> (i32, i32, i32) {
    %c0_i32 = arith.constant 0 : i32
    %c0_i32_0 = arith.constant 0 : i32
    %c0_i32_1 = arith.constant 0 : i32
    return %arg1, %c0_i32, %c0_i32_0 : i32, i32, i32
  }
  func.func @transform_10(%arg0: i32, %arg1: i32) -> (i32, i32, i32) {
    %c0_i32 = arith.constant 0 : i32
    %c0_i32_0 = arith.constant 0 : i32
    %c0_i32_1 = arith.constant 0 : i32
    return %arg1, %c0_i32, %c0_i32_0 : i32, i32, i32
  }
  func.func @transform_11(%arg0: i32, %arg1: i32) -> (i32, i32, i32) {
    %c0_i32 = arith.constant 0 : i32
    %c0_i32_0 = arith.constant 0 : i32
    %c0_i32_1 = arith.constant 0 : i32
    return %arg1, %c0_i32, %c0_i32_0 : i32, i32, i32
  }
  func.func @transform_12(%arg0: i32, %arg1: i32) -> (i32, i32, i32) {
    %c0_i32 = arith.constant 0 : i32
    %c0_i32_0 = arith.constant 0 : i32
    %c0_i32_1 = arith.constant 0 : i32
    return %arg1, %c0_i32, %c0_i32_0 : i32, i32, i32
  }
  func.func @transform_13(%arg0: i32, %arg1: i32) -> (i32, i32, i32) {
    %c0_i32 = arith.constant 0 : i32
    %c0_i32_0 = arith.constant 0 : i32
    %c0_i32_1 = arith.constant 0 : i32
    return %arg1, %c0_i32, %c0_i32_0 : i32, i32, i32
  }
  func.func @transform_14(%arg0: i32, %arg1: i32) -> (i32, i32, i32) {
    %c0_i32 = arith.constant 0 : i32
    %c0_i32_0 = arith.constant 0 : i32
    %c0_i32_1 = arith.constant 0 : i32
    return %arg1, %c0_i32, %c0_i32_0 : i32, i32, i32
  }
  func.func @transform_15(%arg0: i32, %arg1: i32) -> (i32, i32, i32) {
    %c0_i32 = arith.constant 0 : i32
    %c0_i32_0 = arith.constant 0 : i32
    %c0_i32_1 = arith.constant 0 : i32
    return %arg1, %c0_i32, %c0_i32_0 : i32, i32, i32
  }
  func.func @transform_16(%arg0: i32, %arg1: i32) -> (i32, i32, i32) {
    %c0_i32 = arith.constant 0 : i32
    %c0_i32_0 = arith.constant 0 : i32
    %c0_i32_1 = arith.constant 0 : i32
    return %arg1, %c0_i32, %c0_i32_0 : i32, i32, i32
  }
  func.func @transform_17(%arg0: i32, %arg1: i32) -> (i32, i32, i32) {
    %c0_i32 = arith.constant 0 : i32
    %c0_i32_0 = arith.constant 0 : i32
    %c0_i32_1 = arith.constant 0 : i32
    return %arg1, %c0_i32, %c0_i32_0 : i32, i32, i32
  }
  func.func @transform_18(%arg0: i32, %arg1: i32) -> (i32, i32, i32) {
    %c0_i32 = arith.constant 0 : i32
    %c0_i32_0 = arith.constant 0 : i32
    %c0_i32_1 = arith.constant 0 : i32
    return %arg1, %c0_i32, %c0_i32_0 : i32, i32, i32
  }
  func.func @transform_19(%arg0: i32, %arg1: i32) -> (i32, i32, i32) {
    %c0_i32 = arith.constant 0 : i32
    %c0_i32_0 = arith.constant 0 : i32
    %c0_i32_1 = arith.constant 0 : i32
    return %arg1, %c0_i32, %c0_i32_0 : i32, i32, i32
  }
  func.func @transform_20(%arg0: i32, %arg1: i32) -> (i32, i32, i32) {
    %c0_i32 = arith.constant 0 : i32
    %c0_i32_0 = arith.constant 0 : i32
    %c0_i32_1 = arith.constant 0 : i32
    return %arg1, %c0_i32, %c0_i32_0 : i32, i32, i32
  }
  func.func @transform_21(%arg0: i32, %arg1: i32) -> (i32, i32, i32) {
    %c0_i32 = arith.constant 0 : i32
    %c0_i32_0 = arith.constant 0 : i32
    %c0_i32_1 = arith.constant 0 : i32
    return %arg1, %c0_i32, %c0_i32_0 : i32, i32, i32
  }
  func.func @transform_22(%arg0: i32, %arg1: i32) -> (i32, i32, i32) {
    %c0_i32 = arith.constant 0 : i32
    %c0_i32_0 = arith.constant 0 : i32
    %c0_i32_1 = arith.constant 0 : i32
    return %arg1, %c0_i32, %c0_i32_0 : i32, i32, i32
  }
  func.func @transform_23(%arg0: i32, %arg1: i32) -> (i32, i32, i32) {
    %c0_i32 = arith.constant 0 : i32
    %c0_i32_0 = arith.constant 0 : i32
    %c0_i32_1 = arith.constant 0 : i32
    return %arg1, %c0_i32, %c0_i32_0 : i32, i32, i32
  }
  func.func @transform_24(%arg0: i32, %arg1: i32) -> (i32, i32, i32) {
    %c0_i32 = arith.constant 0 : i32
    %c0_i32_0 = arith.constant 0 : i32
    %c0_i32_1 = arith.constant 0 : i32
    return %arg1, %c0_i32, %c0_i32_0 : i32, i32, i32
  }
  func.func @transform_25(%arg0: i32, %arg1: i32) -> (i32, i32) {
    %c0_i32 = arith.constant 0 : i32
    %c0_i32_0 = arith.constant 0 : i32
    %c0_i32_1 = arith.constant 0 : i32
    return %c0_i32, %c0_i32_0 : i32, i32
  }
  func.func @transform_26(%arg0: i32, %arg1: i32) -> (i32, i32) {
    %c0_i32 = arith.constant 0 : i32
    %c0_i32_0 = arith.constant 0 : i32
    %c0_i32_1 = arith.constant 0 : i32
    return %c0_i32, %c0_i32_0 : i32, i32
  }
  func.func @transform_27(%arg0: i32, %arg1: i32) -> (i32, i32) {
    %c0_i32 = arith.constant 0 : i32
    %c0_i32_0 = arith.constant 0 : i32
    %c0_i32_1 = arith.constant 0 : i32
    return %c0_i32, %c0_i32_0 : i32, i32
  }
  func.func @transform_28(%arg0: i32, %arg1: i32) -> (i32, i32) {
    %c0_i32 = arith.constant 0 : i32
    %c0_i32_0 = arith.constant 0 : i32
    %c0_i32_1 = arith.constant 0 : i32
    return %c0_i32, %c0_i32_0 : i32, i32
  }
  func.func @transform_29(%arg0: i32, %arg1: i32) -> (i32, i32, i32) {
    %c0_i32 = arith.constant 0 : i32
    %c0_i32_0 = arith.constant 0 : i32
    %c0_i32_1 = arith.constant 0 : i32
    return %arg0, %c0_i32, %c0_i32_0 : i32, i32, i32
  }
}

</mosaic_0001>

<bundles_post_ra>
// kernel: forward.2
= control target key start
LH: loop header
LB: loop body
LE: loop exit
PB: predicated region body
PF: predicated region fallthrough
CT: control target
= control target key end

     0   :  { %s3093_s0 = inlined_call_operand.vmem [shape: f32[2,8,64], index: 0, kind: input, shape index: {}]   ;;  %s3094_s1 = inlined_call_operand.vmem [shape: f32[2,1,64], index: 1, kind: input, shape index: {}, may-alias: {1,7}]   ;;  %s3095_s2 = inlined_call_operand.vmem [shape: f32[2,1,64], index: 2, kind: input, shape index: {}, may-alias: {2,8}]   ;;  %s3096_s3 = inlined_call_operand.vmem [shape: bf16[2,64,192], index: 3, kind: input, shape index: {}]   ;;  %s3097_s4 = inlined_call_operand.vmem [shape: f32[2,1,192], index: 4, kind: input, shape index: {}]   ;;  %s3098_s5 = inlined_call_operand.hbm [shape: bf16[2,64,64], index: 5, kind: input, shape index: {}]   ;;  %s3099_s6 = inlined_call_operand.hbm [shape: f32[2,1,64], index: 6, kind: input, shape index: {}]   ;;  %s3100_s7 = inlined_call_operand.vmem [shape: f32[2,1,64], index: 7, kind: input, shape index: {}, may-alias: {1,7}]   ;;  %s3101_s8 = inlined_call_operand.vmem [shape: f32[2,1,64], index: 8, kind: input, shape index: {}, may-alias: {2,8}]   ;;  %s3102_s9 = inlined_call_operand.hbm [shape: bf16[2,64,256], index: 9, kind: input, shape index: {}]   ;;  %s3103_s10 = inlined_call_operand.hbm [shape: f32[2,1,256], index: 10, kind: input, shape index: {}]   ;;  %s3104_s11 = inlined_call_operand.vmem [shape: bf16[2,256,64], index: 11, kind: input, shape index: {}]   ;;  %s3105_s12 = inlined_call_operand.hbm [shape: f32[2,1,64], index: 12, kind: input, shape index: {}]   ;;  %s3106_s13 = inlined_call_operand.vmem [shape: f32[2,8,64], index: 13, kind: output, shape index: {}]  }
   0x1   :  { %3115 = sst [smem:[#allocation20_spill]] %s3093_s0 }
   0x2   :  { %3116 = sst [smem:[#allocation21_spill]] %s3094_s1 }
   0x3   :  { %3117 = sst [smem:[#allocation22_spill]] %s3095_s2 }
   0x4   :  { %3118 = sst [smem:[#allocation23_spill]] %s3096_s3 }
   0x5   :  { %3119 = sst [smem:[#allocation24_spill]] %s3097_s4 }
   0x6   :  { %3120 = sst [smem:[#allocation25_spill]] %s3098_s5 }
   0x7   :  { %3121 = sst [smem:[#allocation26_spill]] %s3099_s6 }
   0x8   :  { %3122 = sst [smem:[#allocation27_spill]] %s3100_s7 }
   0x9   :  { %3123 = sst [smem:[#allocation28_spill]] %s3101_s8 }
   0xa   :  { %3124 = sst [smem:[#allocation29_spill]] %s3102_s9 }
   0xb   :  { %3125 = sst [smem:[#allocation30_spill]] %s3103_s10 }
   0xc   :  { %3126 = sst [smem:[#allocation31_spill]] %s3104_s11 }
   0xd   :  { %3127 = sst [smem:[#allocation32_spill]] %s3105_s12 }
   0xe   :  { %3128 = sst [smem:[#allocation33_spill]] %s3106_s13 }
   0xf   :  { %18 = vsyncpa [#allocation3], 0 }
  0x10   :  { %20 = vsyncpa [#allocation3 + $0x1], 0 }
  0x11   :  { %21 = vsyncpa [#allocation5], 0 }
  0x12   :  { %23 = vsyncpa [#allocation5 + $0x1], 0 }
  0x13   :  { %24 = vsyncpa [#allocation8], 0 }
  0x14   :  { %26 = vsyncpa [#allocation8 + $0x1], 0  ;;  %s2673_s25 = smov 0   ;;  %s2675_s26 = smov 0  }
  0x15   :  { %s2677_s27 = smov 0   ;;  %s2679_s28 = smov 0  }
  0x16   :  { %s2681_s29 = smov 0   ;;  %s2683_s30 = smov 0  }
  0x17   :  { %s2685_s14 = smov 0   ;;  %s2687_s15 = smov 0  }
  0x18 LB: > { %3129 = sst [smem:[#allocation13_spill]] %s2558_s26  ;;  %s3107_s16 = sadd.s32 4294967295, %s2582_s15   ;;  %s2582_s15 = sphi %s2687_s15, %s32_s15   ;;  %s2578_s14 = sphi %s2685_s14, %s3170_s14   ;;  %s2574_s30 = sphi %s2683_s30, %s3169_s30   ;;  %s2570_s29 = sphi %s2681_s29, %s3168_s29   ;;  %s2566_s28 = sphi %s2679_s28, %s3167_s28   ;;  %s2562_s27 = sphi %s2677_s27, %s3166_s27   ;;  %s2558_s26 = sphi %s2675_s26, %s3165_s26   ;;  %s2554_s25 = sphi %s2673_s25, %s3164_s25  }
  0x19   : > { %3130 = sst [smem:[#allocation14_spill]] %s2562_s27  ;;  %s41_s17 = sadd.s32 1, %s2574_s30 }
  0x1a   : > { %3131 = sst [smem:[#allocation15_spill]] %s2574_s30  ;;  %p42_p0 = scmp.ge.s32.totalorder %s41_s17, 2 }
  0x1b   : > { %3132 = sst [smem:[#allocation16_spill]] %s2578_s14  ;;  %s44_s18 = sadd.s32 1, %s2578_s14 }
  0x1c   : > { %s181_s19 = sadd.s32 1, %s2562_s27  ;;  %p188_p1 = scmp.ne.s32.totalorder %s2562_s27, %s2558_s26 }
  0x1d   : > { %s3172_s17 = smov (%p42_p0, %s41_s17), 0  ;;  %s3174_s18 = smov (!%p42_p0, %s44_s18), %s2578_s14 }
  0x1e   : > { %3133 = sst [smem:[#allocation17_spill]] %s3172_s17  ;;  %s178_s20 = ssub.s32 %s2574_s30, %s3172_s17 }
  0x1f   : > { %p189_p2 = scmp.eq.s32.totalorder %s2582_s15, 0  ;;  %p46_p3 = scmp.ge.s32.totalorder %s3174_s18, 2 }
  0x20   : > { %p179_p4 = scmp.eq.s32.totalorder %s178_s20, 0  ;;  %p194_p6 = scmp.ne.s32.totalorder %s2558_s26, %s2554_s25 }
  0x21   : > { %p190_p5 = por %p189_p2, %p188_p1  ;;  %s3176_s18 = smov (%p46_p3, %s3174_s18), 0 }
  0x22   : > { %3134 = sst [smem:[#allocation18_spill]] %s3176_s18  ;;  %p195_p7 = scmp.eq.s32.totalorder %s3107_s16, 0 }
  0x23   : > { %s2727_s21 = scalar_select %p179_p4, %s2562_s27, %s181_s19  }
  0x24   : > { %p2221_p8 = scmp.lt.s32.totalorder %s2582_s15, 4  ;;  %s2733_s22 = sand.u32 1, %s2562_s27  }
  0x25   : > { %3135 = sst [smem:[#allocation19_spill]] %s2727_s21  ;;  %p2735_p9 = por %p195_p7, %p194_p6 }
  0x26   : > { %s3112_s24 = sand.u32 1, %s2582_s15   ;;  %p2740_p10 = pnand %p2221_p8, %p190_p5 }
  0x27   : > { %s3111_s25 = sshll.u32 %s2574_s30, 4  ;;  %s3138_s6 = sld [smem:[#allocation26_spill]] }
  0x28   : > { %s484_s17 = scalar_lea.vmem [#allocation4], %s2733_s22  ;;  %p2020_p11 = scmp.ge.s32.totalorder %s2582_s15, 1 }
  0x29   : > { %s491_s14 = sshll.u32 %s484_s17, 4  ;;  %s2754_s21 = scalar_lea.sflag [#allocation5], %s3112_s24  ;;  %s492_s14 = int_to_ptr.vmem [resolvable:$true] %s491_s14 }
  0x2a   : > { %p2758_p12 = pneg %p2740_p10  ;;  %s2381_s13 = scalar_lea.vmem %s492_s14, 16 }
  0x2b   : > { %p2382_p13 = scmp.ne.s32.totalorder %s492_s14, %s2381_s13  ;;  %s2584_s18 = smov [#allocation4]  }
  0x2c   : > { %s2386_s19 = sshll.u32 %s2584_s18, 4  ;;  %s2387_s19 = int_to_ptr.vmem [resolvable:$false] %s2386_s19 }
  0x2d   : > { %s489_s16 = scalar_lea.hbm %s3138_s6, %s3111_s25  ;;  %p2384_p0 = pnand %p2382_p13, %p2758_p12 }
  0x2e   : > { %s2388_s17 = scalar_lea.vmem %s2387_s19, 32  ;;  %p2389_p2 = scmp.lt.s32.totalorder %s492_s14, %s2387_s19 }
  0x2f   : > { %p2385_p1 = pneg %p2384_p0  ;;  %p2390_p3 = scmp.lt.s32.totalorder %s2388_s17, %s2381_s13 }
  0x31   : > { %p2391_p4 = por %p2390_p3, %p2389_p2 }
  0x33   : > { %p2392_p5 = pnand %p2391_p4, %p2385_p1 }
  0x35   : > { %2395 = shalt.err (!%p2392_p5)
}
  0x36   : > { %2211 = dma.hbm_to_vmem [thread:$0]  (!%p2740_p10), %s489_s16, 16, %s492_s14, %s2754_s21  }
  0x37   : > { %p573_p6 = scmp.lt.s32.totalorder %s2582_s15, 5  ;;  %s2016_s25 = sshll.u32 %s2733_s22, 1 }
  0x38   : > { %s2089_s18 = sshll.u32 %s2574_s30, 5  ;;  %s3141_s10 = sld [smem:[#allocation30_spill]] }
  0x39   : > { %p2772_p7 = pnand %p2020_p11, %p573_p6  ;;  %s535_s6 = scalar_lea.vmem [#allocation7], %s2016_s25 }
  0x3a   : > { %s543_s11 = sshll.u32 %s535_s6, 4  ;;  %s3142_s8 = sand.u32 1, %s2582_s15   ;;  %s544_s11 = int_to_ptr.vmem [resolvable:$true] %s543_s11 }
  0x3b   : > { %s2781_s7 = scalar_lea.sflag [#allocation8], %s3142_s8  ;;  %s2409_s4 = scalar_lea.vmem %s544_s11, 32 }
  0x3c   : > { %p2410_p8 = scmp.ne.s32.totalorder %s544_s11, %s2409_s4  ;;  %s2585_s14 = smov [#allocation7]  }
  0x3d   : > { %s2414_s16 = sshll.u32 %s2585_s14, 4  ;;  %s2415_s16 = int_to_ptr.vmem [resolvable:$false] %s2414_s16 }
  0x3e   : > { %s541_s24 = scalar_lea.hbm %s3141_s10, %s2089_s18  ;;  %p2412_p13 = pnand %p2410_p8, %p2758_p12 }
  0x3f   : > { %s2416_s3 = scalar_lea.vmem %s2415_s16, 64  ;;  %p2417_p11 = scmp.lt.s32.totalorder %s544_s11, %s2415_s16 }
  0x40   : > { %p2413_p0 = pneg %p2412_p13  ;;  %p2418_p1 = scmp.lt.s32.totalorder %s2416_s3, %s2409_s4 }
  0x42   : > { %p2419_p2 = por %p2418_p1, %p2417_p11 }
  0x44   : > { %p2420_p3 = pnand %p2419_p2, %p2413_p0 }
  0x46   : > { %2423 = shalt.err (!%p2420_p3)
}
  0x47   : > { %2217 = dma.hbm_to_vmem [thread:$0]  (!%p2740_p10), %s541_s24, 32, %s544_s11, %s2781_s7  }
  0x48   : > { %s2009_s6 = sshll.u32 %s2733_s22, 5  ;;  %s2087_s8 = sshll.u32 %s2574_s30, 9 }
  0x49   : > { %s3143_s5 = sld [smem:[#allocation25_spill]]  ;;  %s464_s17 = scalar_lea.vmem [#allocation2], %s2009_s6 }
  0x4a   : > { %s471_s14 = sshll.u32 %s464_s17, 4  ;;  %s461_s3 = scalar_lea.sflag [#allocation3], %s2733_s22  ;;  %s472_s14 = int_to_ptr.vmem [resolvable:$true] %s471_s14 }
  0x4b   : > { %s2437_s4 = scalar_lea.vmem %s472_s14, 512  ;;  %s2586_s16 = smov [#allocation2]  }
  0x4c   : > { %p2438_p4 = scmp.ne.s32.totalorder %s472_s14, %s2437_s4  ;;  %s2442_s10 = sshll.u32 %s2586_s16, 4  ;;  %s2443_s10 = int_to_ptr.vmem [resolvable:$false] %s2442_s10 }
  0x4d   : > { %s2444_s2 = scalar_lea.vmem %s2443_s10, 1024  ;;  %p2445_p8 = scmp.lt.s32.totalorder %s472_s14, %s2443_s10 }
  0x4e   : > { %p2440_p5 = pnand %p2438_p4, %p2758_p12  ;;  %p2446_p13 = scmp.lt.s32.totalorder %s2444_s2, %s2437_s4 }
  0x4f   : > { %s470_s13 = scalar_lea.hbm %s3143_s5, %s2087_s8 }
  0x50   : > { %p2441_p6 = pneg %p2440_p5  ;;  %p2447_p0 = por %p2446_p13, %p2445_p8 }
  0x52   : > { %p2448_p11 = pnand %p2447_p0, %p2441_p6 }
  0x54   : > { %2451 = shalt.err (!%p2448_p11)
}
  0x55   : > { %s2587_s11 = smov 64   ;;  %s2588_s24 = smov 4  }
  0x56   : > { %2208 = dma.hbm_to_vmem [thread:$0]  (!%p2740_p10), %s470_s13, 512, %s472_s14, %s461_s3, %s2587_s11, %s2587_s11, %s2588_s24  }
  0x57   : > { %s2013_s6 = sshll.u32 %s2733_s22, 6  ;;  %s2088_s8 = sshll.u32 %s2574_s30, 10 }
  0x58   : > { %s3144_s9 = sld [smem:[#allocation29_spill]]  ;;  %s514_s16 = scalar_lea.vmem [#allocation6], %s2013_s6 }
  0x59   : > { %s521_s10 = sshll.u32 %s514_s16, 4  ;;  %s2589_s4 = smov [#allocation6]   ;;  %s522_s10 = int_to_ptr.vmem [resolvable:$true] %s521_s10 }
  0x5a   : > { %s2465_s2 = scalar_lea.vmem %s522_s10, 1024  ;;  %s2470_s5 = sshll.u32 %s2589_s4, 4  ;;  %s2471_s5 = int_to_ptr.vmem [resolvable:$false] %s2470_s5 }
  0x5b   : > { %p2466_p1 = scmp.ne.s32.totalorder %s522_s10, %s2465_s2  ;;  %s2472_s1 = scalar_lea.vmem %s2471_s5, 2048 }
  0x5c   : > { %p2473_p4 = scmp.lt.s32.totalorder %s522_s10, %s2471_s5  ;;  %p2474_p5 = scmp.lt.s32.totalorder %s2472_s1, %s2465_s2 }
  0x5d   : > { %p2468_p2 = pnand %p2466_p1, %p2758_p12 }
  0x5e   : > { %s520_s17 = scalar_lea.hbm %s3144_s9, %s2088_s8  ;;  %p2475_p6 = por %p2474_p5, %p2473_p4 }
  0x5f   : > { %p2469_p3 = pneg %p2468_p2 }
  0x61   : > { %p2476_p8 = pnand %p2475_p6, %p2469_p3 }
  0x63   : > { %2479 = shalt.err (!%p2476_p8)
}
  0x64   : > { %s2590_s13 = smov 128   ;;  %s2591_s14 = smov 8  }
  0x65   : > { %2214 = dma.hbm_to_vmem [thread:$0]  (!%p2740_p10), %s520_s17, 1024, %s522_s10, %s2754_s21, %s2590_s13, %s2590_s13, %s2591_s14  }
  0x66   : > { %s3145_s3 = sshll.u32 %s2574_s30, 4  ;;  %s3146_s12 = sld [smem:[#allocation32_spill]] }
  0x67   : > { %s561_s8 = scalar_lea.vmem [#allocation9], %s2733_s22  ;;  %s2592_s25 = smov [#allocation9]  }
  0x68   : > { %s568_s5 = sshll.u32 %s561_s8, 4  ;;  %s2498_s18 = sshll.u32 %s2592_s25, 4  ;;  %s569_s5 = int_to_ptr.vmem [resolvable:$true] %s568_s5  ;;  %s2499_s18 = int_to_ptr.vmem [resolvable:$false] %s2498_s18 }
  0x69   : > { %s2493_s1 = scalar_lea.vmem %s569_s5, 16  ;;  %s2500_s16 = scalar_lea.vmem %s2499_s18, 32 }
  0x6a   : > { %p2494_p13 = scmp.ne.s32.totalorder %s569_s5, %s2493_s1  ;;  %p2501_p1 = scmp.lt.s32.totalorder %s569_s5, %s2499_s18 }
  0x6b   : > { %p2502_p2 = scmp.lt.s32.totalorder %s2500_s16, %s2493_s1 }
  0x6c   : > { %s566_s6 = scalar_lea.hbm %s3146_s12, %s3145_s3  ;;  %p2496_p0 = pnand %p2494_p13, %p2758_p12 }
  0x6d   : > { %p2503_p3 = por %p2502_p2, %p2501_p1 }
  0x6e   : > { %p2497_p11 = pneg %p2496_p0 }
  0x70   : > { %p2504_p4 = pnand %p2503_p3, %p2497_p11 }
  0x72   : > { %2507 = shalt.err (!%p2504_p4)
}
  0x73   : > { %2220 = dma.hbm_to_vmem [thread:$0]  (!%p2740_p10), %s566_s6, 16, %s569_s5, %s2781_s7  }
  0x74   : > { %577 = sbr.rel (%p2772_p7) target bundleno = 2605 (0xa2d), region = 72  ;;  %s2822_s27 = sand.u32 (!%p2772_p7), 1, %s2558_s26  }
  0x75   : > { %s2021_s21 = sshll.u32 (!%p2772_p7), %s2822_s27, 5  ;;  %s580_s22 = scalar_lea.sflag (!%p2772_p7), [#allocation3], %s2822_s27 }
  0x76   : > { %s2826_s17 = scalar_lea.vmem (!%p2772_p7), [#allocation2], %s2021_s21 }
  0x79   : > { %2541 = dma.done.wait (%p2735_p9), %s580_s22, 512  }
  0x7a   : > { %2543 = vsyncadd (%p2735_p9), %s580_s22, 4294966784  ;;  %s3147_s7 = sadd.s32 4294967295, %s2582_s15  }
  0x7b   : > { %s588_s20 = sand.u32 1, %s3147_s7  }
  0x7c   : > { %s589_s19 = scalar_lea.sflag [#allocation5], %s588_s20 }
  0x7d   : > { %2545 = dma.done.wait (%p2735_p9), %s589_s19, 1040  }
  0x7e   : > { %2547 = vsyncadd (%p2735_p9), %s589_s19, 4294966256  ;;  %s2022_s2 = sshll.u32 %s2822_s27, 6  ;;  %s2023_s4 = sshll.u32 %s2822_s27, 1 }
  0x7f   : > { %s2841_s13 = scalar_lea.vmem [#allocation6], %s2022_s2  ;;  %s606_s14 = scalar_lea.sflag [#allocation8], %s588_s20 }
  0x80   : > { %s2843_s3 = scalar_lea.vmem [#allocation7], %s2023_s4 }
  0x81   : > { %2549 = dma.done.wait (%p2735_p9), %s606_s14, 48  }
  0x82   : > { %2551 = vsyncadd (%p2735_p9), %s606_s14, 4294967248  ;;  %p707_p10 = scmp.lt.s32.totalorder %s2570_s29, 1  ;;  %p711_p12 = scmp.lt.s32.totalorder %s2566_s28, 1 }
  0x83   : > { %s3148_s0 = sld [smem:[#allocation20_spill]]  ;;  %p2031_p9 = scmp.ne.s32.totalorder %s2566_s28, 0 }
  0x84   : > { %s3178_s29 = smov (!%p707_p10, %s2570_s29), 1  ;;  %s3151_s4 = sld [smem:[#allocation23_spill]] }
  0x85   : > { %s2853_s11 = scalar_select %p711_p12, %s2566_s28, 1 }
  0x86   : > { %s2024_s24 = sshll.u32 %s3178_s29, 3  ;;  %s3152_s12 = sld [smem:[#allocation24_spill]] }
  0x87   : > { %s2090_s20 = sshll.u32 %s2853_s11, 6  ;;  %s2027_s10 = sshll.u32 %s2853_s11, 1 }
  0x88   : > { %s3153_s5 = sld [smem:[#allocation27_spill]]  ;;  %s2091_s22 = sshll.u32 %s2853_s11, 7 }
  0x89   : > { %s710_s8 = scalar_lea.vmem %s3148_s0, %s2024_s24  ;;  %s3154_s16 = sld [smem:[#allocation28_spill]] }
  0x8a   : > { %s2870_s14 = scalar_lea.vmem %s3151_s4, %s2090_s20  ;;  %s3155_s19 = sld [smem:[#allocation31_spill]] }
  0x8b   : > { %s3156_s26 = sld [smem:[#allocation33_spill]] }
  0x8c   : > { %s2876_s23 = scalar_lea.vmem %s3152_s12, %s2027_s10  ;;  %s617_s12 = scalar_lea.vmem [#allocation9], %s2822_s27 }
  0x8d   : > { %745 = sbr.rel (%p2031_p9) target bundleno = 148 (0x94), region = 96 }
  0x8e   : > { %s728_s1 = scalar_lea.vmem %s3153_s5, %s2853_s11 }
  0x8f   : > { %s731_s21 = scalar_lea.vmem %s3154_s16, %s2853_s11 }
  0x90   : > { %s2890_s20 = scalar_lea.vmem %s3155_s19, %s2091_s22 }
  0x91   : > { %s2895_s9 = scalar_lea.vmem %s3156_s26, %s2024_s24 }
  0x92   : > { %v746_v0 = vld [vmem:[%s710_s8] sm:$0xff]  ;;  %vm747_vm0 = vcmask 523264  }
  0x93   : > { %748 = vst.msk [vmem:[%s2895_s9] sm:$0xff] %vm747_vm0, %v746_v0 }
  0x94 PF: > { %vm752_vm1 = vcmask 523264   ;;  %v2300_v8 = vld [vmem:[%s2870_s14 + $0x34] ss:$8 sps:$4 sm:$0xff]   ;;  %v2302_v9 = vld [vmem:[%s2870_s14 + $0x30] ss:$8 sps:$4 sm:$0xff]   ;;  %v2593_v12 = vmov 0   ;;  %v801_v27 = vlaneseq }
  0x95   : > { %v2303_v10 = vld [vmem:[%s2870_s14 + $0x24] ss:$8 sps:$4 sm:$0xff]   ;;  %862 = vmatprep.subr.bf16.mxu1 %v2300_v8  ;;  %v2305_v11 = vld [vmem:[%s2870_s14 + $0x20] ss:$8 sps:$4 sm:$0xff]   ;;  %886 = vmatprep.mubr.bf16.mxu1 %v2593_v12  ;;  %v2306_v13 = vld [vmem:[%s2870_s14 + $0x14] ss:$8 sps:$4 sm:$0xff]  }
  0x96   : > { %863 = vmatpush1.bf16.msra.mxu1 %v2302_v9  ;;  %v2308_v14 = vld [vmem:[%s2870_s14 + $0x10] ss:$8 sps:$4 sm:$0xff]   ;;  %v2309_v15 = vld [vmem:[%s2870_s14 + $0x4] ss:$8 sps:$4 sm:$0xff]   ;;  %v2311_v16 = vld [vmem:[%s2870_s14] ss:$8 sps:$4 sm:$0xff]  }
  0x97   : > { %864 = vmatprep.subr.bf16.mxu1 %v2303_v10  ;;  %s3157_s28 = sld [smem:[#allocation21_spill]]  ;;  %v2927_v28 = vshrl.u32 %v801_v27, 7  ;;  %v2594_v29 = vmov 0.0   ;;  %v789_v31 = vld [vmem:[%s2876_s23] sm:$0x3]  ;;  %vm2595_vm2 = vmmov 0  }
  0x98   : > { %s3159_s8 = sld [smem:[#allocation22_spill]]  ;;  %2147 = vmatprep.subr.bf16.mxu0 %v2594_v29  ;;  %2149 = vmatprep.mubr.msk.bf16.mxu0 %vm2595_vm2, %v2594_v29  ;;  %s2596_s7 = smov 112   ;;  %vm899_vm3 = vcmask 130048   ;;  %vm964_vm4 = vcmask 1043456   ;;  %vm947_vm5 = vcmask 64512   ;;  %vm1355_vm6 = vcmask 261120  }
  0x99   : > { %v803_v30 = vsub.s32 0, %v2927_v28  ;;  %s2597_s14 = smov 64   ;;  %s2598_s29 = smov 48   ;;  %v807_v39 = vsub.s32 1, %v2927_v28  ;;  %vm1357_vm7 = vcmask 392192  }
  0x9a   : > { %v2901_v1 = vld [vmem:[%s2895_s9] sm:$0xff]  ;;  %865 = vmatpush1.bf16.msra.mxu1 %v2305_v11  ;;  %s2599_s23 = smov 32   ;;  %s2600_s6 = smov 96  }
  0x9b   : > { %v753_v2 = vsel %vm752_vm1, %v2901_v1, 0.0  ;;  %866 = vmatprep.subr.bf16.mxu1 %v2306_v13  ;;  %v804_v32 = vrot.slane %v789_v31, %v803_v30  ;;  %s2601_s5 = smov 16   ;;  %s2602_s25 = smov 80   ;;  %v808_v40 = vrot.slane %v789_v31, %v807_v39 }
  0x9c   : > { %754 = vadd.xlane.f32.xlu0 %v753_v2 }
  0x9d   : > { %s3158_s30 = scalar_lea.vmem %s3157_s28, %s2853_s11 }
  0x9e   : > { %867 = vmatpush1.bf16.msra.mxu1 %v2308_v14  ;;  %v2032_v21 = vld [vmem:[%s3158_s30] ss:$0 sm:$0xff]  ;;  %s3160_s18 = scalar_lea.vmem %s3159_s8, %s2853_s11 }
  0x9f   : > { %868 = vmatprep.subr.bf16.mxu1 %v2309_v15  ;;  %v2033_v23 = vld [vmem:[%s3160_s18] ss:$0 sm:$0xff] }
  0xa2   : > { %869 = vmatpush1.bf16.msra.mxu1 %v2311_v16 }
  0xa3   : > { %2135 = vmatprep.subr.bf16.mxu1 %v2594_v29 }
 0x125   : > { %v755_v3 = vpop.xlane.xlu0 %754 }
 0x126   : > { %v757_v4 = vmul.f32 0.015625, %v755_v3 }
 0x128   : > { %v758_v5 = vsub.f32 %v2901_v1, %v757_v4 }
 0x12a   : > { %v759_v6 = vmul.f32 %v758_v5, %v758_v5 }
 0x12c   : > { %v760_v7 = vsel %vm752_vm1, %v759_v6, 0.0 }
 0x12d   : > { %761 = vadd.xlane.f32.xlu0 %v760_v7 }
 0x1b6   : > { %v762_v17 = vpop.xlane.xlu0 %761 }
 0x1b7   : > { %v763_v18 = vmul.f32 0.015625, %v762_v17 }
 0x1b9   : > { %v764_v19 = vadd.f32 1e-05, %v763_v18 }
 0x1bb   : > { %2344 = vrsqrt.f32 %v764_v19 }
 0x1c8   : > { %v2345_v20 = vpop.eup %2344 }
 0x1c9   : > { %v766_v22 = vmul.f32 %v2345_v20, %v758_v5 }
 0x1cb   : > { %v773_v24 = vmul.f32 %v2032_v21, %v766_v22 }
 0x1cd   : > { %v780_v25 = vadd.f32 %v2033_v23, %v773_v24 }
 0x1cf   : > { %v799_v26 = vpack.c.bf16 %v780_v25, %v780_v25 }
 0x1d1   : > { %2042 = vmatmul.mubr.msk.bf16.vlgmr.msra.gmra.mxu1 %vm752_vm1, %v799_v26 }
 0x1d2   : > { %2137 = vmatprep.mubr.msk.bf16.mxu1 %vm2595_vm2, %v2594_v29 }
 0x291   : > { %v888_v33 = vpop.f32.mrf.mxu1 }
 0x292   : > { %v889_v34 = vadd.f32 %v888_v33, %v804_v32 }
 0x293   : > { %v890_v35 = vpop.f32.mrf.mxu1 }
 0x294   : > { %v895_v36 = vpack.c.bf16 %v889_v34, %v889_v34  ;;  %v891_v42 = vadd.f32 %v890_v35, %v808_v40 }
 0x295   : > { %v892_v37 = vpop.f32.mrf.mxu1 }
 0x296   : > { %1008 = vrot.lane.b32.xlu0 %v895_v36, %s2596_s7  ;;  %897 = vrot.lane.b32.xlu1 %v895_v36, %s2597_s14  ;;  %v2950_v45 = vpack.c.bf16 %v891_v42, %v891_v42 }
 0x297   : > { %v893_v38 = vpop.f32.mrf.mxu1 }
 0x298   : > { %v966_v48 = vsel %vm964_vm4, %v2950_v45, 0 }
 0x29a   : > { %1010 = vrot.lane.b32.xlu1 %v895_v36, %s2598_s29 }
 0x29e   : > { %1122 = vrot.lane.b32.xlu1 %v895_v36, %s2599_s23 }
 0x2a2   : > { %1120 = vrot.lane.b32.xlu1 %v895_v36, %s2600_s6 }
 0x2a6   : > { %1233 = vrot.lane.b32.xlu1 %v895_v36, %s2601_s5 }
 0x2aa   : > { %1231 = vrot.lane.b32.xlu1 %v895_v36, %s2602_s25 }
 0x308   : > { %v898_v41 = vpop.permute.xlu1 %897  ;;  %v1009_v49 = vpop.permute.xlu0 %1008 }
 0x309   : > { %v904_v43 = vsel %vm899_vm3, %v898_v41, 0 }
 0x30a   : > { %2136 = vmatpush3.bf16.xpose.msra.mxu1 %v904_v43 }
 0x30b   : > { %2141 = vmatprep.subr.bf16.mxu1 %v2594_v29 }
 0x30c   : > { %v1011_v44 = vpop.permute.xlu1 %1010 }
 0x30d   : > { %v1016_v46 = vsel %vm899_vm3, %v1011_v44, 0 }
 0x30e   : > { %2148 = vmatpush3.bf16.xpose.msra.mxu0 %v1016_v46 }
 0x30f   : > { %2159 = vmatprep.subr.bf16.mxu0 %v2594_v29 }
 0x310   : > { %v1123_v47 = vpop.permute.xlu1 %1122 }
 0x311   : > { %2138 = vmatmul.mubr.msk.bf16.vlgmr.msra.gmra.mxu1 %vm899_vm3, %v895_v36  ;;  %v1128_v51 = vsel %vm899_vm3, %v1123_v47, 0 }
 0x312   : > { %2142 = vmatpush3.bf16.msra.mxu1 %v966_v48  ;;  %2143 = vmatprep.mubr.msk.bf16.mxu1 %vm2595_vm2, %v2594_v29 }
 0x313   : > { %2153 = vmatprep.subr.bf16.mxu1 %v2594_v29 }
 0x314   : > { %v1121_v50 = vpop.permute.xlu1 %1120 }
 0x315   : > { %2150 = vmatmul.mubr.msk.bf16.vlgmr.msra.gmra.mxu0 %vm899_vm3, %v1009_v49 }
 0x316   : > { %2160 = vmatpush3.bf16.xpose.msra.mxu0 %v1128_v51  ;;  %2161 = vmatprep.mubr.msk.bf16.mxu0 %vm2595_vm2, %v2594_v29 }
 0x317   : > { %2171 = vmatprep.subr.bf16.mxu0 %v2594_v29 }
 0x318   : > { %v1234_v52 = vpop.permute.xlu1 %1233 }
 0x319   : > { %v1239_v53 = vsel %vm899_vm3, %v1234_v52, 0 }
 0x31c   : > { %v1232_v54 = vpop.permute.xlu1 %1231 }
 0x31d   : > { %2162 = vmatmul.mubr.msk.bf16.vlgmr.msra.gmra.mxu0 %vm899_vm3, %v1121_v50 }
 0x31e   : > { %2172 = vmatpush3.bf16.xpose.msra.mxu0 %v1239_v53  ;;  %2173 = vmatprep.mubr.msk.bf16.mxu0 %vm2595_vm2, %v2594_v29 }
 0x31f   : > { %2183 = vmatprep.subr.bf16.mxu0 %v2594_v29 }
 0x325   : > { %2174 = vmatmul.mubr.msk.bf16.vlgmr.msra.gmra.mxu0 %vm899_vm3, %v1232_v54 }
 0x326   : > { %2191 = vmatprep.mubr.msk.bf16.mxu0 %vm2595_vm2, %v2594_v29 }
 0x3d1   : > { %v940_v55 = vpop.f32.mrf.mxu1 }
 0x3d2   : > { %v946_v56 = vmul.f32 0.25, %v940_v55 }
 0x3d3   : > { %v2139_v57 = vpop.f32.mrf.mxu1 }
 0x3d4   : > { %v948_v58 = vsel %vm947_vm5, %v946_v56, -inf }
 0x3d5   : > { %949 = vmax.xlane.f32.xlu1 %v948_v58  ;;  %v943_v59 = vpop.f32.mrf.mxu1  ;;  %v1052_v60 = vpop.f32.mrf.mxu0 }
 0x3d6   : > { %v1058_v61 = vmul.f32 0.25, %v1052_v60 }
 0x3d7   : > { %v2140_v62 = vpop.f32.mrf.mxu1  ;;  %v2151_v63 = vpop.f32.mrf.mxu0 }
 0x3d8   : > { %v1059_v0 = vsel %vm947_vm5, %v1058_v61, -inf  ;;  %v2312_v63 = vld [vmem:[%s2826_s17 + $0x18] sm:$0xff]  }
 0x3d9   : > { %1060 = vmax.xlane.f32.xlu0 %v1059_v0  ;;  %v1055_v2 = vpop.f32.mrf.mxu0  ;;  %2184 = vmatpush3.bf16.msra.mxu0 %v2312_v63  ;;  %v2331_v63 = vld [vmem:[%s2890_s20 + $0x30] sm:$0xff]  }
 0x3da   : > { %2185 = vmatprep.subr.bf16.mxu0 %v2594_v29 }
 0x3db   : > { %v2152_v3 = vpop.f32.mrf.mxu0 }
 0x3dd   : > { %v1164_v4 = vpop.f32.mrf.mxu0 }
 0x3de   : > { %v1170_v5 = vmul.f32 0.25, %v1164_v4 }
 0x3df   : > { %v2163_v6 = vpop.f32.mrf.mxu0 }
 0x3e0   : > { %v1171_v7 = vsel %vm947_vm5, %v1170_v5, -inf }
 0x3e1   : > { %1172 = vmax.xlane.f32.xlu1 %v1171_v7  ;;  %v1167_v8 = vpop.f32.mrf.mxu0 }
 0x3e3   : > { %v2164_v9 = vpop.f32.mrf.mxu0 }
 0x3e4   : > { %v2313_v9 = vld [vmem:[%s2826_s17 + $0x10] sm:$0xff]  }
 0x3e5   : > { %v1275_v10 = vpop.f32.mrf.mxu0  ;;  %2186 = vmatpush3.bf16.msra.mxu0 %v2313_v9  ;;  %v2340_v9 = vld [vmem:[%s2890_s20 + $0x48] sm:$0xff]  }
 0x3e6   : > { %v1281_v11 = vmul.f32 0.25, %v1275_v10  ;;  %v2314_v10 = vld [vmem:[%s2826_s17 + $0x8] sm:$0xff]   ;;  %2187 = vmatprep.subr.bf16.mxu0 %v2594_v29 }
 0x3e7   : > { %v2175_v13 = vpop.f32.mrf.mxu0 }
 0x3e8   : > { %v1282_v14 = vsel %vm947_vm5, %v1281_v11, -inf }
 0x3e9   : > { %1283 = vmax.xlane.f32.xlu0 %v1282_v14  ;;  %v1278_v15 = vpop.f32.mrf.mxu0  ;;  %2188 = vmatpush3.bf16.msra.mxu0 %v2314_v10  ;;  %v2341_v10 = vld [vmem:[%s2890_s20 + $0x8] sm:$0xff]  }
 0x3ea   : > { %2189 = vmatprep.subr.bf16.mxu0 %v2594_v29 }
 0x3eb   : > { %v2176_v16 = vpop.f32.mrf.mxu0 }
 0x45e   : > { %v950_v17 = vpop.xlane.xlu1 %949 }
 0x45f   : > { %v951_v18 = vsub.f32 %v946_v56, %v950_v17 }
 0x461   : > { %v952_v19 = vmul.f32 1.442695, %v951_v18 }
 0x462   : > { %v1061_v20 = vpop.xlane.xlu0 %1060 }
 0x463   : > { %2346 = vpow2.f32 %v952_v19  ;;  %v1062_v21 = vsub.f32 %v1058_v61, %v1061_v20 }
 0x465   : > { %v1063_v22 = vmul.f32 1.442695, %v1062_v21 }
 0x467   : > { %2348 = vpow2.f32 %v1063_v22 }
 0x46a   : > { %v1173_v35 = vpop.xlane.xlu1 %1172 }
 0x46b   : > { %v1174_v36 = vsub.f32 %v1170_v5, %v1173_v35 }
 0x46d   : > { %v1175_v37 = vmul.f32 1.442695, %v1174_v36 }
 0x470   : > { %v2347_v23 = vpop.eup %2346 }
 0x471   : > { %v954_v24 = vsel %vm947_vm5, %v2347_v23, 0.0 }
 0x472   : > { %v1284_v25 = vpop.xlane.xlu0 %1283  ;;  %955 = vadd.xlane.f32.xlu1 %v954_v24 }
 0x473   : > { %v1285_v26 = vsub.f32 %v1281_v11, %v1284_v25 }
 0x474   : > { %v2349_v27 = vpop.eup %2348 }
 0x475   : > { %v1286_v31 = vmul.f32 1.442695, %v1285_v26  ;;  %v1065_v32 = vsel %vm947_vm5, %v2349_v27, 0.0 }
 0x476   : > { %1066 = vadd.xlane.f32.xlu0 %v1065_v32 }
 0x477   : > { %2350 = vpow2.f32 %v1286_v31 }
 0x478   : > { %2352 = vpow2.f32 %v1175_v37 }
 0x483   : > { %1072 = vrot.lane.b32.xlu1 %v2950_v45, %s2596_s7 }
 0x484   : > { %v2351_v33 = vpop.eup %2350 }
 0x485   : > { %v1288_v34 = vsel %vm947_vm5, %v2351_v33, 0.0  ;;  %v2353_v38 = vpop.eup %2352 }
 0x486   : > { %1289 = vadd.xlane.f32.xlu0 %v1288_v34  ;;  %v1177_v40 = vsel %vm947_vm5, %v2353_v38, 0.0 }
 0x49c   : > { %1183 = vrot.lane.b32.xlu0 %v2950_v45, %s2600_s6 }
 0x4a7   : > { %1178 = vadd.xlane.f32.xlu1 %v1177_v40 }
 0x4b8   : > { %1294 = vrot.lane.b32.xlu1 %v2950_v45, %s2602_s25 }
 0x4fb   : > { %v956_v41 = vpop.xlane.xlu1 %955 }
 0x4fc   : > { %2354 = vrcp.f32 %v956_v41 }
 0x4ff   : > { %v1067_v42 = vpop.xlane.xlu0 %1066  ;;  %v1073_v46 = vpop.permute.xlu1 %1072 }
 0x500   : > { %2356 = vrcp.f32 %v1067_v42  ;;  %v1078_v49 = vsel %vm964_vm4, %v1073_v46, 0  ;;  %v2319_v46 = vld [vmem:[%s2841_s13 + $0x20] ss:$8 sps:$4 sm:$0xff]  }
 0x509   : > { %v2355_v43 = vpop.eup %2354 }
 0x50a   : > { %v958_v44 = vmul.f32 %v2355_v43, %v2347_v23  ;;  %v2316_v43 = vld [vmem:[%s2841_s13 + $0x30] ss:$8 sps:$4 sm:$0xff]  }
 0x50c   : > { %v959_v47 = vpack.c.bf16 %v958_v44, %v958_v44  ;;  %v2321_v44 = vld [vmem:[%s2841_s13 + $0x24] ss:$8 sps:$4 sm:$0xff]  }
 0x50d   : > { %v2357_v48 = vpop.eup %2356 }
 0x50e   : > { %2144 = vmatmul.mubr.msk.bf16.vlgmr.msra.gmra.mxu1 %vm947_vm5, %v959_v47  ;;  %v1069_v45 = vmul.f32 %v2357_v48, %v2349_v27  ;;  %v2324_v47 = vld [vmem:[%s2841_s13 + $0x14] ss:$8 sps:$4 sm:$0xff]   ;;  %v2322_v48 = vld [vmem:[%s2841_s13 + $0x10] ss:$8 sps:$4 sm:$0xff]  }
 0x50f   : > { %2154 = vmatpush3.bf16.msra.mxu1 %v1078_v49  ;;  %v1290_v50 = vpop.xlane.xlu0 %1289  ;;  %2155 = vmatprep.mubr.msk.bf16.mxu1 %vm2595_vm2, %v2594_v29  ;;  %v2327_v49 = vld [vmem:[%s2841_s13 + $0x4] ss:$8 sps:$4 sm:$0xff]  }
 0x510   : > { %2165 = vmatprep.subr.bf16.mxu1 %v2594_v29  ;;  %v1070_v53 = vpack.c.bf16 %v1069_v45, %v1069_v45 }
 0x513   : > { %v1184_v51 = vpop.permute.xlu0 %1183 }
 0x514   : > { %v1189_v52 = vsel %vm964_vm4, %v1184_v51, 0 }
 0x516   : > { %2156 = vmatmul.mubr.msk.bf16.vlgmr.msra.gmra.mxu1 %vm947_vm5, %v1070_v53 }
 0x517   : > { %2166 = vmatpush3.bf16.msra.mxu1 %v1189_v52  ;;  %2167 = vmatprep.mubr.msk.bf16.mxu1 %vm2595_vm2, %v2594_v29 }
 0x518   : > { %2177 = vmatprep.subr.bf16.mxu1 %v2594_v29 }
 0x530   : > { %v1179_v54 = vpop.xlane.xlu1 %1178 }
 0x531   : > { %2358 = vrcp.f32 %v1179_v54  ;;  %v2057_v54 = vld [vmem:[%s728_s1] ss:$0 sm:$0xff] }
 0x532   : > { %2360 = vrcp.f32 %v1290_v50  ;;  %v2325_v50 = vld [vmem:[%s2841_s13] ss:$8 sps:$4 sm:$0xff]  }
 0x534   : > { %v1295_v57 = vpop.permute.xlu1 %1294 }
 0x535   : > { %v1300_v60 = vsel %vm964_vm4, %v1295_v57, 0 }
 0x53e   : > { %v2359_v55 = vpop.eup %2358 }
 0x53f   : > { %v1181_v56 = vmul.f32 %v2359_v55, %v2353_v38  ;;  %v2361_v59 = vpop.eup %2360 }
 0x540   : > { %v1292_v61 = vmul.f32 %v2361_v59, %v2351_v33 }
 0x541   : > { %v1182_v58 = vpack.c.bf16 %v1181_v56, %v1181_v56  ;;  %v2058_v56 = vld [vmem:[%s731_s21] ss:$0 sm:$0xff] }
 0x542   : > { %v1293_v62 = vpack.c.bf16 %v1292_v61, %v1292_v61  ;;  %v2329_v61 = vld [vmem:[%s2890_s20 + $0x38] sm:$0xff]  }
 0x543   : > { %2168 = vmatmul.mubr.msk.bf16.vlgmr.msra.gmra.mxu1 %vm947_vm5, %v1182_v58 }
 0x544   : > { %2178 = vmatpush3.bf16.msra.mxu1 %v1300_v60  ;;  %2179 = vmatprep.mubr.msk.bf16.mxu1 %vm2595_vm2, %v2594_v29  ;;  %v2328_v60 = vld [vmem:[%s2890_s20 + $0x78] sm:$0xff]  }
 0x54b   : > { %2180 = vmatmul.mubr.msk.bf16.vlgmr.msra.gmra.mxu1 %vm947_vm5, %v1293_v62  ;;  %v2330_v62 = vld [vmem:[%s2890_s20 + $0x70] sm:$0xff]  }
 0x54c   : > { %1592 = vmatprep.mubr.bf16.mxu1 %v2593_v12  ;;  %v2315_v12 = vld [vmem:[%s2826_s17] sm:$0xff]   ;;  %s3161_s17 = scalar_lea.vmem [#allocation4], %s2822_s27 }
 0x54d   : > { %2190 = vmatpush3.bf16.msra.mxu0 %v2315_v12  ;;  %v2051_v26 = vld [vmem:[%s3161_s17] ss:$0 sm:$0xff] }
 0x54e   : > { %2113 = vmatprep.subr.bf16.mxu0 %v2328_v60  ;;  %v2342_v12 = vld [vmem:[%s2890_s20 + $0x40] sm:$0xff]  }
 0x5ce   : > { %v1002_v0 = vpop.f32.mrf.mxu1 }
 0x5d0   : > { %v2145_v2 = vpop.f32.mrf.mxu1 }
 0x5d1   : > { %v2333_v2 = vld [vmem:[%s2890_s20 + $0x28] sm:$0xff]  }
 0x5d2   : > { %v1005_v3 = vpop.f32.mrf.mxu1 }
 0x5d3   : > { %v2334_v3 = vld [vmem:[%s2890_s20 + $0x60] sm:$0xff]  }
 0x5d4   : > { %v2146_v4 = vpop.f32.mrf.mxu1 }
 0x5d5   : > { %v2335_v4 = vld [vmem:[%s2890_s20 + $0x20] sm:$0xff]  }
 0x5d6   : > { %v1114_v5 = vpop.f32.mrf.mxu1 }
 0x5d7   : > { %1343 = vrot.lane.b32.xlu1 %v1114_v5, %s2601_s5  ;;  %v2336_v5 = vld [vmem:[%s2890_s20 + $0x58] sm:$0xff]  }
 0x5d8   : > { %v2157_v6 = vpop.f32.mrf.mxu1 }
 0x5d9   : > { %v2337_v6 = vld [vmem:[%s2890_s20 + $0x18] sm:$0xff]  }
 0x5da   : > { %v1117_v7 = vpop.f32.mrf.mxu1 }
 0x5db   : > { %v2338_v7 = vld [vmem:[%s2890_s20 + $0x50] sm:$0xff]  }
 0x5dc   : > { %v2158_v8 = vpop.f32.mrf.mxu1 }
 0x5dd   : > { %v2339_v8 = vld [vmem:[%s2890_s20 + $0x10] sm:$0xff]  }
 0x603   : > { %v1225_v11 = vpop.f32.mrf.mxu1 }
 0x604   : > { %1347 = vrot.lane.b32.xlu0 %v1225_v11, %s2599_s23  ;;  %v2343_v11 = vld [vmem:[%s2890_s20] sm:$0xff]  }
 0x605   : > { %v2169_v13 = vpop.f32.mrf.mxu1 }
 0x606   : > { %v1471_v13 = vld [vmem:[%s2843_s3] sm:$0x3] }
 0x607   : > { %v1228_v14 = vpop.f32.mrf.mxu1 }
 0x608   : > { %v1510_v14 = vrot.slane %v1471_v13, %v803_v30 }
 0x609   : > { %v2170_v15 = vpop.f32.mrf.mxu1 }
 0x60a   : > { %v1514_v15 = vrot.slane %v1471_v13, %v807_v39 }
 0x60b   : > { %v1336_v16 = vpop.f32.mrf.mxu1 }
 0x60c   : > { %1351 = vrot.lane.b32.xlu1 %v1336_v16, %s2598_s29 }
 0x60d   : > { %v2181_v17 = vpop.f32.mrf.mxu1 }
 0x60f   : > { %v1339_v18 = vpop.f32.mrf.mxu1 }
 0x611   : > { %v2182_v19 = vpop.f32.mrf.mxu1 }
 0x649   : > { %v1344_v20 = vpop.permute.xlu1 %1343 }
 0x64a   : > { %v1354_v29 = vsel %vm899_vm3, %v1002_v0, %v1344_v20  ;;  %v2332_v0 = vld [vmem:[%s2890_s20 + $0x68] sm:$0xff]  }
 0x676   : > { %v1348_v21 = vpop.permute.xlu0 %1347 }
 0x677   : > { %v1356_v22 = vsel %vm1355_vm6, %v1354_v29, %v1348_v21 }
 0x67e   : > { %v1352_v23 = vpop.permute.xlu1 %1351 }
 0x67f   : > { %v1358_v24 = vsel %vm1357_vm7, %v1356_v22, %v1352_v23 }
 0x680   : > { %v1359_v25 = vpack.c.bf16 %v1358_v24, %v1358_v24 }
 0x682   : > { %2192 = vmatmul.mubr.msk.bf16.vlgmr.msra.gmra.mxu0 %vm752_vm1, %v1359_v25 }
 0x683   : > { %2114 = vmatpush3.bf16.msra.mxu0 %v2329_v61 }
 0x684   : > { %2115 = vmatprep.subr.bf16.mxu0 %v2330_v62 }
 0x687   : > { %2116 = vmatpush3.bf16.msra.mxu0 %v2331_v63 }
 0x688   : > { %2117 = vmatprep.subr.bf16.mxu0 %v2332_v0 }
 0x68b   : > { %2118 = vmatpush3.bf16.msra.mxu0 %v2333_v2 }
 0x68c   : > { %2119 = vmatprep.subr.bf16.mxu0 %v2334_v3 }
 0x68f   : > { %2120 = vmatpush3.bf16.msra.mxu0 %v2335_v4 }
 0x690   : > { %2121 = vmatprep.subr.bf16.mxu0 %v2336_v5 }
 0x693   : > { %2122 = vmatpush3.bf16.msra.mxu0 %v2337_v6 }
 0x694   : > { %2123 = vmatprep.subr.bf16.mxu0 %v2338_v7 }
 0x697   : > { %2124 = vmatpush3.bf16.msra.mxu0 %v2339_v8 }
 0x698   : > { %2125 = vmatprep.subr.bf16.mxu0 %v2340_v9 }
 0x69b   : > { %2126 = vmatpush3.bf16.msra.mxu0 %v2341_v10 }
 0x69c   : > { %2127 = vmatprep.subr.bf16.mxu0 %v2342_v12 }
 0x69f   : > { %2128 = vmatpush3.bf16.msra.mxu0 %v2343_v11 }
 0x742   : > { %v1427_v27 = vpop.f32.mrf.mxu0 }
 0x743   : > { %v1428_v31 = vadd.f32 %v2051_v26, %v1427_v27 }
 0x744   : > { %v2193_v32 = vpop.f32.mrf.mxu0 }
 0x745   : > { %v3018_v33 = vadd.f32 %v1428_v31, %v2901_v1  ;;  %v2318_v1 = vld [vmem:[%s2841_s13 + $0x34] ss:$8 sps:$4 sm:$0xff]  }
 0x746   : > { %v1430_v34 = vpop.f32.mrf.mxu0  ;;  %1568 = vmatprep.subr.bf16.mxu1 %v2318_v1 }
 0x747   : > { %v1436_v35 = vsel %vm752_vm1, %v3018_v33, 0.0  ;;  %1569 = vmatpush1.bf16.msra.mxu1 %v2316_v43  ;;  %v2068_v43 = vld [vmem:[%s617_s12] ss:$0 sm:$0xff] }
 0x748   : > { %1437 = vadd.xlane.f32.xlu0 %v1436_v35  ;;  %v2194_v36 = vpop.f32.mrf.mxu0  ;;  %1570 = vmatprep.subr.bf16.mxu1 %v2321_v44 }
 0x74b   : > { %1571 = vmatpush1.bf16.msra.mxu1 %v2319_v46 }
 0x74c   : > { %1572 = vmatprep.subr.bf16.mxu1 %v2324_v47 }
 0x74f   : > { %1573 = vmatpush1.bf16.msra.mxu1 %v2322_v48 }
 0x750   : > { %1574 = vmatprep.subr.bf16.mxu1 %v2327_v49 }
 0x753   : > { %1575 = vmatpush1.bf16.msra.mxu1 %v2325_v50 }
 0x7d1   : > { %v1438_v37 = vpop.xlane.xlu0 %1437 }
 0x7d2   : > { %v1439_v38 = vmul.f32 0.015625, %v1438_v37 }
 0x7d4   : > { %v1440_v40 = vsub.f32 %v3018_v33, %v1439_v38 }
 0x7d6   : > { %v1441_v41 = vmul.f32 %v1440_v40, %v1440_v40 }
 0x7d8   : > { %v1442_v42 = vsel %vm752_vm1, %v1441_v41, 0.0 }
 0x7d9   : > { %1443 = vadd.xlane.f32.xlu1 %v1442_v42 }
 0x862   : > { %v1444_v45 = vpop.xlane.xlu1 %1443 }
 0x863   : > { %v1445_v51 = vmul.f32 0.015625, %v1444_v45 }
 0x865   : > { %v1446_v52 = vadd.f32 1e-05, %v1445_v51 }
 0x867   : > { %2362 = vrsqrt.f32 %v1446_v52 }
 0x874   : > { %v2363_v53 = vpop.eup %2362 }
 0x875   : > { %v1448_v55 = vmul.f32 %v2363_v53, %v1440_v40 }
 0x877   : > { %v1455_v57 = vmul.f32 %v2057_v54, %v1448_v55 }
 0x879   : > { %v1462_v58 = vadd.f32 %v2058_v56, %v1455_v57 }
 0x87b   : > { %v1505_v59 = vpack.c.bf16 %v1462_v58, %v1462_v58 }
 0x87d   : > { %2067 = vmatmul.mubr.msk.bf16.vlgmr.msra.gmra.mxu1 %vm752_vm1, %v1505_v59 }
 0x93d   : > { %v1594_v16 = vpop.f32.mrf.mxu1 }
 0x93e   : > { %v1595_v17 = vadd.f32 %v1594_v16, %v1510_v14 }
 0x93f   : > { %v1596_v18 = vpop.f32.mrf.mxu1 }
 0x940   : > { %v1601_v19 = vmul.f32 %v1595_v17, %v1595_v17  ;;  %v1597_v20 = vadd.f32 %v1596_v18, %v1514_v15 }
 0x941   : > { %v1598_v21 = vpop.f32.mrf.mxu1 }
 0x942   : > { %v1603_v29 = vmul.f32 %v1601_v19, %v1595_v17  ;;  %v1602_v22 = vmul.f32 %v1597_v20, %v1597_v20 }
 0x943   : > { %v1599_v23 = vpop.f32.mrf.mxu1 }
 0x944   : > { %v1605_v24 = vmul.f32 0.044715, %v1603_v29  ;;  %v1604_v25 = vmul.f32 %v1602_v22, %v1597_v20 }
 0x946   : > { %v1607_v26 = vadd.f32 %v1605_v24, %v1595_v17  ;;  %v1606_v27 = vmul.f32 0.044715, %v1604_v25 }
 0x948   : > { %v1609_v31 = vmul.f32 0.7978846, %v1607_v26  ;;  %v1608_v32 = vadd.f32 %v1606_v27, %v1597_v20 }
 0x94a   : > { %2364 = vtanh.f32 %v1609_v31  ;;  %v1610_v30 = vmul.f32 0.7978846, %v1608_v32 }
 0x94c   : > { %2366 = vtanh.f32 %v1610_v30 }
 0x957   : > { %v2365_v28 = vpop.eup %2364 }
 0x958   : > { %v1613_v39 = vadd.f32 1.0, %v2365_v28 }
 0x959   : > { %v2367_v34 = vpop.eup %2366 }
 0x95a   : > { %v1614_v35 = vadd.f32 1.0, %v2367_v34  ;;  %v1615_v36 = vmul.f32 0.5, %v1613_v39 }
 0x95c   : > { %v1616_v37 = vmul.f32 0.5, %v1614_v35  ;;  %v1617_v38 = vmul.f32 %v1615_v36, %v1595_v17 }
 0x95e   : > { %v1618_v40 = vmul.f32 %v1616_v37, %v1597_v20  ;;  %v1619_v42 = vpack.c.bf16 %v1617_v38, %v1617_v38 }
 0x960   : > { %v1620_v41 = vpack.c.bf16 %v1618_v40, %v1618_v40 }
 0x962   : > { %1755 = vmatprep.mubr.bf16.mxu0 %v1620_v41 }
 0x963   : > { %1756 = vmatmul.mubr.bf16.vlgmr.msra.gmra.mxu0 %v1619_v42 }
 0xa23   : > { %v2129_v1 = vpop.f32.mrf.mxu0 }
 0xa25   : > { %v2130_v44 = vpop.f32.mrf.mxu0 }
 0xa26   : > { %v2131_v46 = vadd.f32 %v2130_v44, %v2129_v1 }
 0xa27   : > { %v2132_v47 = vpop.f32.mrf.mxu0 }
 0xa28   : > { %v1758_v48 = vadd.f32 %v2131_v46, %v2068_v43 }
 0xa29   : > { %v2133_v49 = vpop.f32.mrf.mxu0 }
 0xa2a   : > { %v1763_v50 = vadd.f32 %v1758_v48, %v3018_v33 }
 0xa2c   : > { %1764 = vst.msk [vmem:[%s2895_s9] sm:$0xff] %vm752_vm1, %v1763_v50 }
 0xa2d PF: > { %s32_s15 = sadd.s32 1, %s2582_s15   ;;  %s3164_s25 = sld [smem:[#allocation13_spill]] }
 0xa2e   : > { %p29_p7 = scmp.ge.s32.totalorder %s32_s15, 6   ;;  %s3165_s26 = sld [smem:[#allocation14_spill]] }
 0xa2f   : > { %s3166_s27 = sld [smem:[#allocation19_spill]] }
 0xa30   : > { %s3167_s28 = sld [smem:[#allocation15_spill]]  ;;  %31 = sbr.rel (!%p29_p7) target bundleno = 24 (0x18), region = 188 }
 0xa31   : > { %s3168_s29 = sld [smem:[#allocation16_spill]] }
 0xa32   : > { %s3169_s30 = sld [smem:[#allocation17_spill]] }
 0xa33   : > { %s3170_s14 = sld [smem:[#allocation18_spill]] }
 0xa35   :  { %1784 = vsyncpa [#allocation3], 1 }
 0xa36   :  { %1786 = vsyncpa [#allocation3 + $0x1], 1 }
 0xa37   :  { %1787 = vsyncpa [#allocation5], 1 }
 0xa38   :  { %1789 = vsyncpa [#allocation5 + $0x1], 1 }
 0xa39   :  { %1790 = vsyncpa [#allocation8], 1 }
 0xa3a   :  { %1792 = vsyncpa [#allocation8 + $0x1], 1 }

// kernel: forward.3
= control target key start
LH: loop header
LB: loop body
LE: loop exit
PB: predicated region body
PF: predicated region fallthrough
CT: control target
= control target key end

     0   :  { %s4931_s6 = smov 1   ;;  %s4932_s10 = smov 2   ;;  %s5954_s0 = inlined_call_operand.smem [shape: u32[30], index: -1, kind: input, shape index: {}] }
   0x1   :  { %s4993_s5 = sld [smem:[%s5954_s0]]   ;;  %s4933_s14 = smov 3  }
   0x2   :  { %s4998_s9 = sld [smem:[%s5954_s0 + %s4931_s6]]   ;;  %s4934_s18 = smov 4  }
   0x3   :  { %s5003_s13 = sld [smem:[%s5954_s0 + %s4932_s10]]   ;;  %s4935_s22 = smov 5  }
   0x4   :  { %s5008_s17 = sld [smem:[%s5954_s0 + %s4933_s14]]   ;;  %s4936_s26 = smov 6  }
   0x5   :  { %s5013_s21 = sld [smem:[%s5954_s0 + %s4934_s18]]   ;;  %s4937_s30 = smov 7  }
   0x6   :  { %s5018_s25 = sld [smem:[%s5954_s0 + %s4935_s22]]   ;;  %s4938_s4 = smov 8  }
   0x7   :  { %6002 = sst [smem:[#allocation28_spill]] %s4993_s5  ;;  %s4939_s10 = smov 9  }
   0x8   :  { %6003 = sst [smem:[#allocation29_spill]] %s4998_s9  ;;  %s4940_s15 = smov 10  }
   0x9   :  { %6004 = sst [smem:[#allocation30_spill]] %s5003_s13  ;;  %s4941_s20 = smov 11  }
   0xa   :  { %6005 = sst [smem:[#allocation31_spill]] %s5008_s17  ;;  %s4943_s1 = smov 13  }
   0xb   :  { %6006 = sst [smem:[#allocation32_spill]] %s5013_s21  ;;  %s4944_s7 = smov 14  }
   0xc   :  { %6007 = sst [smem:[#allocation33_spill]] %s5018_s25  ;;  %s4946_s22 = smov 16  }
   0xd   :  { %s5023_s29 = sld [smem:[%s5954_s0 + %s4936_s26]]   ;;  %s4942_s26 = smov 12  }
   0xe   :  { %s5028_s3 = sld [smem:[%s5954_s0 + %s4937_s30]]   ;;  %s4947_s28 = smov 17  }
   0xf   :  { %s5033_s8 = sld [smem:[%s5954_s0 + %s4938_s4]]  }
  0x10   :  { %s5038_s14 = sld [smem:[%s5954_s0 + %s4939_s10]]  }
  0x11   :  { %s5043_s19 = sld [smem:[%s5954_s0 + %s4940_s15]]   ;;  %s4945_s15 = smov 15  }
  0x12   :  { %s5048_s24 = sld [smem:[%s5954_s0 + %s4941_s20]]  }
  0x13   :  { %6008 = sst [smem:[#allocation34_spill]] %s5023_s29 }
  0x14   :  { %6009 = sst [smem:[#allocation35_spill]] %s5028_s3 }
  0x15   :  { %6010 = sst [smem:[#allocation36_spill]] %s5033_s8 }
  0x16   :  { %6011 = sst [smem:[#allocation37_spill]] %s5038_s14 }
  0x17   :  { %6012 = sst [smem:[#allocation38_spill]] %s5043_s19 }
  0x18   :  { %6013 = sst [smem:[#allocation39_spill]] %s5048_s24 }
  0x19   :  { %s5053_s30 = sld [smem:[%s5954_s0 + %s4942_s26]]  }
  0x1a   :  { %s5058_s6 = sld [smem:[%s5954_s0 + %s4943_s1]]  }
  0x1b   :  { %s5063_s12 = sld [smem:[%s5954_s0 + %s4944_s7]]   ;;  %s4948_s7 = smov 18  }
  0x1c   :  { %s5068_s20 = sld [smem:[%s5954_s0 + %s4945_s15]]   ;;  %s4949_s15 = smov 19  }
  0x1d   :  { %s5073_s27 = sld [smem:[%s5954_s0 + %s4946_s22]]   ;;  %s4950_s22 = smov 20  }
  0x1e   :  { %s5078_s4 = sld [smem:[%s5954_s0 + %s4947_s28]]   ;;  %s4951_s28 = smov 21  }
  0x1f   :  { %6014 = sst [smem:[#allocation40_spill]] %s5053_s30 }
  0x20   :  { %6015 = sst [smem:[#allocation41_spill]] %s5058_s6 }
  0x21   :  { %6016 = sst [smem:[#allocation42_spill]] %s5063_s12 }
  0x22   :  { %6017 = sst [smem:[#allocation43_spill]] %s5068_s20 }
  0x23   :  { %6018 = sst [smem:[#allocation44_spill]] %s5073_s27 }
  0x24   :  { %6019 = sst [smem:[#allocation45_spill]] %s5078_s4 }
  0x25   :  { %s5083_s13 = sld [smem:[%s5954_s0 + %s4948_s7]]   ;;  %s4952_s7 = smov 22  }
  0x26   :  { %s5088_s6 = sld [smem:[%s5954_s0 + %s4949_s15]]   ;;  %s4953_s15 = smov 23  }
  0x27   :  { %s5093_s30 = sld [smem:[%s5954_s0 + %s4950_s22]]   ;;  %s4954_s22 = smov 24  }
  0x28   :  { %s5098_s24 = sld [smem:[%s5954_s0 + %s4951_s28]]   ;;  %s4955_s28 = smov 25  }
  0x29   :  { %s5103_s19 = sld [smem:[%s5954_s0 + %s4952_s7]]   ;;  %s4956_s7 = smov 26  }
  0x2a   :  { %s5123_s14 = sld [smem:[%s5954_s0 + %s4956_s7]]  }
  0x2b   :  { %6020 = sst [smem:[#allocation46_spill]] %s5083_s13 }
  0x2c   :  { %6021 = sst [smem:[#allocation47_spill]] %s5088_s6 }
  0x2d   :  { %6022 = sst [smem:[#allocation48_spill]] %s5093_s30 }
  0x2e   :  { %6023 = sst [smem:[#allocation49_spill]] %s5098_s24 }
  0x2f   :  { %6024 = sst [smem:[#allocation50_spill]] %s5103_s19 }
  0x30   :  { %s5108_s6 = sld [smem:[%s5954_s0 + %s4953_s15]]   ;;  %s4957_s15 = smov 27  }
  0x31   :  { %s5113_s30 = sld [smem:[%s5954_s0 + %s4954_s22]]   ;;  %s4958_s22 = smov 28  }
  0x32   :  { %s5118_s24 = sld [smem:[%s5954_s0 + %s4955_s28]]   ;;  %s4959_s28 = smov 29  }
  0x33   :  { %6028 = sst [smem:[#allocation54_spill]] %s5123_s14 }
  0x34   :  { %s5133_s3 = sld [smem:[%s5954_s0 + %s4958_s22]]  }
  0x36   :  { %6025 = sst [smem:[#allocation51_spill]] %s5108_s6 }
  0x37   :  { %6026 = sst [smem:[#allocation52_spill]] %s5113_s30 }
  0x38   :  { %6027 = sst [smem:[#allocation53_spill]] %s5118_s24 }
  0x39   :  { %s5128_s6 = sld [smem:[%s5954_s0 + %s4957_s15]]  }
  0x3a   :  { %6030 = sst [smem:[#allocation56_spill]] %s5133_s3 }
  0x3b   :  { %s5138_s24 = sld [smem:[%s5954_s0 + %s4959_s28]]  }
  0x3f   :  { %6029 = sst [smem:[#allocation55_spill]] %s5128_s6 }
  0x41   :  { %6031 = sst [smem:[#allocation57_spill]] %s5138_s24 }
  0x42   :  { %64 = vsyncpa [#allocation4], 0 }
  0x43   :  { %66 = vsyncpa [#allocation4 + $0x1], 0 }
  0x44   :  { %67 = vsyncpa [#allocation7], 0 }
  0x45   :  { %69 = vsyncpa [#allocation7 + $0x1], 0 }
  0x46   :  { %70 = vsyncpa [#allocation10], 0 }
  0x47   :  { %72 = vsyncpa [#allocation10 + $0x1], 0 }
  0x48   :  { %73 = vsyncpa [#allocation13], 0 }
  0x49   :  { %75 = vsyncpa [#allocation13 + $0x1], 0 }
  0x4a   :  { %76 = vsyncpa [#allocation16], 0 }
  0x4b   :  { %78 = vsyncpa [#allocation16 + $0x1], 0 }
  0x4c   :  { %79 = vsyncpa [#allocation19], 0 }
  0x4d   :  { %80 = vsyncpa [#allocation5], 0 }
  0x4e   :  { %82 = vsyncpa [#allocation5 + $0x1], 0  ;;  %s5140_s7 = smov 0   ;;  %s5142_s10 = smov 0  }
  0x4f   :  { %s5144_s11 = smov 0   ;;  %s5146_s0 = smov 0  }
  0x50   :  { %s5148_s15 = smov 0   ;;  %s5150_s16 = smov 0  }
  0x51   :  { %s5152_s18 = smov 0   ;;  %s5154_s22 = smov 0  }
  0x52   :  { %s5156_s23 = smov 0   ;;  %s5158_s26 = smov 0  }
  0x53   :  { %s5160_s28 = smov 0  }
  0x54 LB: > { %s6032_s29 = sld [smem:[#allocation34_spill]]  ;;  %s97_s1 = sadd.s32 1, %s4921_s23  ;;  %s4905_s15 = sphi %s5148_s15, %s6143_s15   ;;  %s4901_s0 = sphi %s5146_s0, %s6142_s0   ;;  %s4897_s11 = sphi %s5144_s11, %s6141_s11   ;;  %s4893_s10 = sphi %s5142_s10, %s6140_s10   ;;  %s4889_s7 = sphi %s5140_s7, %s6139_s7   ;;  %s4929_s28 = sphi %s5160_s28, %s88_s28   ;;  %s4925_s26 = sphi %s5158_s26, %s6148_s26   ;;  %s4921_s23 = sphi %s5156_s23, %s6147_s23   ;;  %s4917_s22 = sphi %s5154_s22, %s6146_s22   ;;  %s4913_s18 = sphi %s5152_s18, %s6145_s18   ;;  %s4909_s16 = sphi %s5150_s16, %s6144_s16  }
  0x55   : > { %s6033_s19 = sld [smem:[#allocation50_spill]]  ;;  %s258_s2 = sadd.s32 1, %s4909_s16 }
  0x56   : > { %s6034_s4 = sld [smem:[#allocation45_spill]]  ;;  %p5197_p0 = scmp.ge.s32.totalorder %s97_s1, 2 }
  0x57   : > { %s6035_s20 = sld [smem:[#allocation43_spill]]  ;;  %p265_p1 = scmp.ne.s32.totalorder %s4909_s16, %s4905_s15 }
  0x58   : > { %s6036_s8 = sld [smem:[#allocation36_spill]]  ;;  %p266_p2 = scmp.eq.s32.totalorder %s4929_s28, 0 }
  0x59   : > { %6037 = sst [smem:[#allocation58_spill]] %s4889_s7  ;;  %s6150_s1 = smov (%p5197_p0, %s97_s1), 0 }
  0x5a   : > { %6038 = sst [smem:[#allocation59_spill]] %s4893_s10  ;;  %p267_p3 = por %p266_p2, %p265_p1 }
  0x5b   : > { %6039 = sst [smem:[#allocation60_spill]] %s4897_s11  ;;  %p4270_p4 = scmp.lt.s32.totalorder %s4929_s28, 4 }
  0x5c   : > { %6040 = sst [smem:[#allocation61_spill]] %s4905_s15  ;;  %s255_s14 = ssub.s32 %s4921_s23, %s6150_s1 }
  0x5d   : > { %6041 = sst [smem:[#allocation62_spill]] %s4909_s16  ;;  %s5212_s6 = sand.u32 1, %s4909_s16  }
  0x5e   : > { %6042 = sst [smem:[#allocation63_spill]] %s4913_s18  ;;  %p256_p5 = scmp.eq.s32.totalorder %s255_s14, 0 }
  0x5f   : > { %6043 = sst [smem:[#allocation64_spill]] %s4917_s22  ;;  %p5214_p6 = pnand %p4270_p4, %p267_p3 }
  0x60   : > { %6044 = sst [smem:[#allocation65_spill]] %s4921_s23  ;;  %s5219_s21 = sand.u32 1, %s4929_s28  }
  0x61   : > { %6045 = sst [smem:[#allocation66_spill]] %s4925_s26  ;;  %s5225_s9 = sshll.u32 %s4921_s23, 4 }
  0x62   : > { %6046 = sst [smem:[#allocation67_spill]] %s4929_s28  ;;  %s965_s18 = scalar_lea.hbm %s6036_s8, %s5225_s9 }
  0x63   : > { %s6047_s24 = scalar_select %p5197_p0, 1, 0 }
  0x64   : > { %6048 = sst [smem:[#allocation68_spill]] %s6150_s1  ;;  %s960_s1 = scalar_lea.vmem [#allocation6], %s5212_s6 }
  0x65   : > { %s5222_s17 = scalar_select %p256_p5, %s4909_s16, %s258_s2  }
  0x66   : > { %s967_s5 = sshll.u32 %s960_s1, 4  ;;  %s4511_s14 = scalar_lea.hbm %s965_s18, 16  ;;  %s968_s5 = int_to_ptr.vmem [resolvable:$true] %s967_s5 }
  0x67   : > { %6050 = sst [smem:[#allocation69_spill]] %s5222_s17  ;;  %p4512_p7 = scmp.ne.s32.totalorder %s965_s18, %s4511_s14 }
  0x68   : > { %p5233_p8 = pneg %p5214_p6  ;;  %s4516_s2 = scalar_lea.hbm %s6036_s8, 32 }
  0x69   : > { %p4517_p11 = scmp.lt.s32.totalorder %s965_s18, %s6036_s8  ;;  %p4518_p12 = scmp.lt.s32.totalorder %s4516_s2, %s4511_s14 }
  0x6a   : > { %p4514_p9 = pnand %p5233_p8, %p4512_p7 }
  0x6b   : > { %p4519_p13 = por %p4518_p12, %p4517_p11 }
  0x6c   : > { %p4515_p10 = pneg %p4514_p9 }
  0x6e   : > { %p4520_p1 = pnand %p4519_p13, %p4515_p10 }
  0x70   : > { %4523 = shalt.err (!%p4520_p1)
}
  0x71   : > { %s4524_s1 = scalar_lea.vmem %s968_s5, 16  ;;  %s4960_s22 = smov [#allocation6]  }
  0x72   : > { %p4525_p2 = scmp.ne.s32.totalorder %s968_s5, %s4524_s1  ;;  %s4529_s17 = sshll.u32 %s4960_s22, 4  ;;  %s4530_s17 = int_to_ptr.vmem [resolvable:$false] %s4529_s17 }
  0x73   : > { %s4531_s16 = scalar_lea.vmem %s4530_s17, 32  ;;  %p4532_p5 = scmp.lt.s32.totalorder %s968_s5, %s4530_s17 }
  0x74   : > { %p4527_p3 = pnand %p4525_p2, %p5233_p8  ;;  %p4533_p0 = scmp.lt.s32.totalorder %s4531_s16, %s4524_s1 }
  0x76   : > { %p4528_p4 = pneg %p4527_p3  ;;  %p4534_p7 = por %p4533_p0, %p4532_p5 }
  0x78   : > { %p4535_p9 = pnand %p4534_p7, %p4528_p4 }
  0x7a   : > { %4538 = shalt.err (!%p4535_p9)
}
  0x7b   : > { %s6052_s14 = scalar_lea.sflag [#allocation7], %s5219_s21  ;;  %s5965_s22 = sshll.u32 %s5212_s6, 5 }
  0x7c   : > { %4243 = dma.hbm_to_vmem [thread:$0]  (!%p5214_p6), %s965_s18, 16, %s968_s5, %s6052_s14  }
  0x7d   : > { %s3966_s17 = sshll.u32 %s4921_s23, 9  ;;  %s1027_s2 = scalar_lea.vmem [#allocation9], %s5965_s22 }
  0x7e   : > { %s5252_s16 = scalar_lea.hbm %s6035_s20, %s3966_s17  ;;  %s1034_s1 = sshll.u32 %s1027_s2, 4  ;;  %s5256_s1 = int_to_ptr.vmem [resolvable:$true] %s1034_s1 }
  0x7f   : > { %s5971_s8 = scalar_lea.sflag [#allocation10], %s5219_s21  ;;  %s4539_s13 = scalar_lea.hbm %s5252_s16, 512 }
  0x80   : > { %p4540_p0 = scmp.ne.s32.totalorder %s5252_s16, %s4539_s13  ;;  %s4544_s5 = scalar_lea.hbm %s6035_s20, 1024 }
  0x81   : > { %p4545_p12 = scmp.lt.s32.totalorder %s5252_s16, %s6035_s20  ;;  %p4546_p13 = scmp.lt.s32.totalorder %s4544_s5, %s4539_s13 }
  0x82   : > { %p4542_p10 = pnand %p4540_p0, %p5233_p8 }
  0x83   : > { %p4547_p1 = por %p4546_p13, %p4545_p12 }
  0x84   : > { %p4543_p11 = pneg %p4542_p10 }
  0x86   : > { %p4548_p2 = pnand %p4547_p1, %p4543_p11 }
  0x88   : > { %4551 = shalt.err (!%p4548_p2)
}
  0x89   : > { %s4552_s18 = scalar_lea.vmem %s5256_s1, 512  ;;  %s4961_s14 = smov [#allocation9]  }
  0x8a   : > { %p4553_p3 = scmp.ne.s32.totalorder %s5256_s1, %s4552_s18  ;;  %s4557_s2 = sshll.u32 %s4961_s14, 4  ;;  %s4558_s2 = int_to_ptr.vmem [resolvable:$false] %s4557_s2 }
  0x8b   : > { %s4559_s22 = scalar_lea.vmem %s4558_s2, 1024  ;;  %p4560_p7 = scmp.lt.s32.totalorder %s5256_s1, %s4558_s2 }
  0x8c   : > { %p4555_p4 = pnand %p4553_p3, %p5233_p8  ;;  %p4561_p9 = scmp.lt.s32.totalorder %s4559_s22, %s4552_s18 }
  0x8e   : > { %p4556_p5 = pneg %p4555_p4  ;;  %p4562_p0 = por %p4561_p9, %p4560_p7 }
  0x90   : > { %p4563_p10 = pnand %p4562_p0, %p4556_p5 }
  0x92   : > { %4566 = shalt.err (!%p4563_p10)
}
  0x93   : > { %s4962_s13 = smov 64   ;;  %s4963_s5 = smov 4  }
  0x94   : > { %4249 = dma.hbm_to_vmem [thread:$0]  (!%p5214_p6), %s5252_s16, 512, %s5256_s1, %s5971_s8, %s4962_s13, %s4962_s13, %s4963_s5  }
  0x95   : > { %s5283_s22 = scalar_lea.hbm %s6034_s4, %s3966_s17  ;;  %s6053_s18 = sshll.u32 %s5212_s6, 5 }
  0x96   : > { %s1065_s14 = scalar_lea.vmem [#allocation12], %s6053_s18  ;;  %s3832_s20 = sshll.u32 %s5212_s6, 1 }
  0x97   : > { %s1072_s2 = sshll.u32 %s1065_s14, 4  ;;  %s3965_s27 = sshll.u32 %s4921_s23, 5  ;;  %s5288_s2 = int_to_ptr.vmem [resolvable:$true] %s1072_s2 }
  0x98   : > { %s5970_s3 = scalar_lea.sflag [#allocation13], %s5219_s21  ;;  %s4567_s12 = scalar_lea.hbm %s5283_s22, 512 }
  0x99   : > { %p4568_p11 = scmp.ne.s32.totalorder %s5283_s22, %s4567_s12  ;;  %s4572_s16 = scalar_lea.hbm %s6034_s4, 1024 }
  0x9a   : > { %p4573_p1 = scmp.lt.s32.totalorder %s5283_s22, %s6034_s4  ;;  %p4574_p2 = scmp.lt.s32.totalorder %s4572_s16, %s4567_s12 }
  0x9b   : > { %p4570_p12 = pnand %p4568_p11, %p5233_p8 }
  0x9c   : > { %p4575_p3 = por %p4574_p2, %p4573_p1 }
  0x9d   : > { %p4571_p13 = pneg %p4570_p12 }
  0x9f   : > { %p4576_p4 = pnand %p4575_p3, %p4571_p13 }
  0xa1   : > { %4579 = shalt.err (!%p4576_p4)
}
  0xa2   : > { %s4580_s17 = scalar_lea.vmem %s5288_s2, 512  ;;  %s4964_s1 = smov [#allocation12]  }
  0xa3   : > { %p4581_p5 = scmp.ne.s32.totalorder %s5288_s2, %s4580_s17  ;;  %s4585_s18 = sshll.u32 %s4964_s1, 4  ;;  %s4586_s18 = int_to_ptr.vmem [resolvable:$false] %s4585_s18 }
  0xa4   : > { %s4587_s14 = scalar_lea.vmem %s4586_s18, 1024  ;;  %p4588_p0 = scmp.lt.s32.totalorder %s5288_s2, %s4586_s18 }
  0xa5   : > { %p4583_p7 = pnand %p4581_p5, %p5233_p8  ;;  %p4589_p10 = scmp.lt.s32.totalorder %s4587_s14, %s4580_s17 }
  0xa7   : > { %p4584_p9 = pneg %p4583_p7  ;;  %p4590_p11 = por %p4589_p10, %p4588_p0 }
  0xa9   : > { %p4591_p12 = pnand %p4590_p11, %p4584_p9 }
  0xab   : > { %4594 = shalt.err (!%p4591_p12)
}
  0xac   : > { %4255 = dma.hbm_to_vmem [thread:$0]  (!%p5214_p6), %s5283_s22, 512, %s5288_s2, %s5970_s3, %s4962_s13, %s4962_s13, %s4963_s5  }
  0xad   : > { %s5316_s12 = scalar_lea.hbm %s6033_s19, %s3965_s27  ;;  %s1123_s16 = scalar_lea.vmem [#allocation15], %s3832_s20 }
  0xae   : > { %s1131_s17 = sshll.u32 %s1123_s16, 4  ;;  %s5969_s1 = scalar_lea.sflag [#allocation16], %s5219_s21  ;;  %s1132_s17 = int_to_ptr.vmem [resolvable:$true] %s1131_s17 }
  0xaf   : > { %s4595_s18 = scalar_lea.hbm %s5316_s12, 32  ;;  %s4600_s14 = scalar_lea.hbm %s6033_s19, 64 }
  0xb0   : > { %p4596_p13 = scmp.ne.s32.totalorder %s5316_s12, %s4595_s18  ;;  %p4601_p3 = scmp.lt.s32.totalorder %s5316_s12, %s6033_s19 }
  0xb1   : > { %p4602_p4 = scmp.lt.s32.totalorder %s4600_s14, %s4595_s18 }
  0xb2   : > { %p4598_p1 = pnand %p4596_p13, %p5233_p8 }
  0xb3   : > { %p4603_p5 = por %p4602_p4, %p4601_p3 }
  0xb4   : > { %p4599_p2 = pneg %p4598_p1 }
  0xb6   : > { %p4604_p7 = pnand %p4603_p5, %p4599_p2 }
  0xb8   : > { %4607 = shalt.err (!%p4604_p7)
}
  0xb9   : > { %s4608_s13 = scalar_lea.vmem %s1132_s17, 32  ;;  %s4965_s5 = smov [#allocation15]  }
  0xba   : > { %p4609_p9 = scmp.ne.s32.totalorder %s1132_s17, %s4608_s13  ;;  %s4613_s22 = sshll.u32 %s4965_s5, 4  ;;  %s4614_s22 = int_to_ptr.vmem [resolvable:$false] %s4613_s22 }
  0xbb   : > { %s4615_s2 = scalar_lea.vmem %s4614_s22, 64  ;;  %p4616_p11 = scmp.lt.s32.totalorder %s1132_s17, %s4614_s22 }
  0xbc   : > { %p4611_p0 = pnand %p4609_p9, %p5233_p8  ;;  %p4617_p12 = scmp.lt.s32.totalorder %s4615_s2, %s4608_s13 }
  0xbe   : > { %p4612_p10 = pneg %p4611_p0  ;;  %p4618_p13 = por %p4617_p12, %p4616_p11 }
  0xc0   : > { %p4619_p1 = pnand %p4618_p13, %p4612_p10 }
  0xc2   : > { %4622 = shalt.err (!%p4619_p1)
}
  0xc3   : > { %4261 = dma.hbm_to_vmem [thread:$0]  (!%p5214_p6), %s5316_s12, 32, %s1132_s17, %s5969_s1  }
  0xc4   : > { %s5336_s16 = sadd.s32 4294967295, %s4929_s28   ;;  %s3828_s18 = sadd.s32 4294967294, %s4929_s28  }
  0xc5   : > { %s100_s14 = sadd.s32 1, %s4925_s26  ;;  %p6054_p2 = scmp.ne.s32.totalorder %s6047_s24, 0 }
  0xc6   : > { %p271_p3 = scmp.ne.s32.totalorder %s4905_s15, %s4901_s0  ;;  %p5974_p4 = scmp.eq.s32.totalorder %s5336_s16, 0 }
  0xc7   : > { %s6152_s14 = smov (!%p6054_p2, %s100_s14), %s4925_s26  ;;  %s836_s13 = sadd.s32 1, %s4897_s11 }
  0xc8   : > { %p102_p5 = scmp.ge.s32.totalorder %s6152_s14, 2  ;;  %p5349_p7 = por %p5974_p4, %p271_p3 }
  0xc9   : > { %p846_p9 = scmp.ne.s32.totalorder %s4897_s11, %s4893_s10  ;;  %p847_p0 = scmp.eq.s32.totalorder %s5336_s16, 3 }
  0xca   : > { %s6055_s5 = scalar_select %p5349_p7, 1, 0 }
  0xcb   : > { %s6154_s14 = smov (%p102_p5, %s6152_s14), 0  ;;  %p852_p10 = scmp.ne.s32.totalorder %s4893_s10, %s4889_s7 }
  0xcc   : > { %6056 = sst [smem:[#allocation70_spill]] %s6154_s14  ;;  %s833_s24 = ssub.s32 %s4925_s26, %s6154_s14 }
  0xcd   : > { %p853_p11 = scmp.eq.s32.totalorder %s3828_s18, 3  ;;  %p834_p12 = scmp.eq.s32.totalorder %s833_s24, 0 }
  0xce   : > { %p5362_p13 = por %p847_p0, %p846_p9  ;;  %p3829_p2 = scmp.ge.s32.totalorder %s4929_s28, 1 }
  0xcf   : > { %p5366_p1 = por %p853_p11, %p852_p10  ;;  %p860_p3 = scmp.lt.s32.totalorder %s4929_s28, 5 }
  0xd0   : > { %s6057_s0 = scalar_select %p5362_p13, 1, 0 }
  0xd1   : > { %s6059_s12 = scalar_select %p5366_p1, 1, 0 }
  0xd2   : > { %6058 = sst [smem:[#allocation71_spill]] %s6057_s0  ;;  %p5375_p5 = pnand %p3829_p2, %p860_p3 }
  0xd3   : > { %6060 = sst [smem:[#allocation72_spill]] %s6059_s12  ;;  %s4966_s2 = smov [#allocation18]  }
  0xd4   : > { %s5372_s17 = scalar_select %p834_p12, %s4897_s11, %s836_s13  }
  0xd5   : > { %s6062_s22 = scalar_select %p5375_p5, 1, 0 }
  0xd6   : > { %6061 = sst [smem:[#allocation73_spill]] %s5372_s17  ;;  %s885_s18 = sshll.u32 %s4966_s2, 4  ;;  %s5379_s18 = int_to_ptr.vmem [resolvable:$true] %s885_s18 }
  0xd7   : > { %p4233_p9 = pneg %p5375_p5  ;;  %s5386_s24 = scalar_lea.hbm %s6032_s29, %s3965_s27 }
  0xd8   : > { %s934_s13 = scalar_lea.vmem [#allocation3], %s3832_s20  ;;  %s931_s2 = scalar_lea.sflag [#allocation4], %s5212_s6 }
  0xd9   : > { %s942_s1 = sshll.u32 %s934_s13, 4  ;;  %p5392_p0 = pnand %p4233_p9, %p5974_p4  ;;  %s943_s1 = int_to_ptr.vmem [resolvable:$true] %s942_s1 }
  0xda   : > { %s4623_s8 = scalar_lea.hbm %s5386_s24, 32  ;;  %s4628_s27 = scalar_lea.hbm %s6032_s29, 64 }
  0xdb   : > { %s6063_s3 = scalar_select %p5392_p0, 1, 0 }
  0xdc   : > { %p4624_p10 = scmp.ne.s32.totalorder %s5386_s24, %s4623_s8  ;;  %p4629_p2 = scmp.lt.s32.totalorder %s5386_s24, %s6032_s29 }
  0xdd   : > { %p4630_p3 = scmp.lt.s32.totalorder %s4628_s27, %s4623_s8 }
  0xde   : > { %p4626_p11 = pnand %p4624_p10, %p5233_p8 }
  0xdf   : > { %p4631_p1 = por %p4630_p3, %p4629_p2 }
  0xe0   : > { %p4627_p12 = pneg %p4626_p11 }
  0xe2   : > { %p4632_p13 = pnand %p4631_p1, %p4627_p12 }
  0xe4   : > { %4635 = shalt.err (!%p4632_p13)
}
  0xe5   : > { %s4636_s20 = scalar_lea.vmem %s943_s1, 32  ;;  %s4967_s13 = smov [#allocation3]  }
  0xe6   : > { %p4637_p7 = scmp.ne.s32.totalorder %s943_s1, %s4636_s20  ;;  %s4641_s4 = sshll.u32 %s4967_s13, 4  ;;  %s4642_s4 = int_to_ptr.vmem [resolvable:$false] %s4641_s4 }
  0xe7   : > { %s4643_s19 = scalar_lea.vmem %s4642_s4, 64  ;;  %p4644_p5 = scmp.lt.s32.totalorder %s943_s1, %s4642_s4 }
  0xe8   : > { %p4639_p9 = pnand %p4637_p7, %p5233_p8  ;;  %p4645_p0 = scmp.lt.s32.totalorder %s4643_s19, %s4636_s20 }
  0xea   : > { %p4640_p4 = pneg %p4639_p9  ;;  %p4646_p10 = por %p4645_p0, %p4644_p5 }
  0xec   : > { %p4647_p11 = pnand %p4646_p10, %p4640_p4 }
  0xee   : > { %4650 = shalt.err (!%p4647_p11)
}
  0xef   : > { %s6064_s8 = sld [smem:[#allocation42_spill]]  ;;  %p6065_p7 = scmp.ne.s32.totalorder %s6063_s3, 0 }
  0xf0   : > { %4240 = dma.hbm_to_vmem [thread:$0]  (!%p5214_p6), %s5386_s24, 32, %s943_s1, %s931_s2  }
  0xf1   : > { %p4653_p13 = pneg %p6065_p7  ;;  %s4662_s4 = scalar_lea.vmem %s5379_s18, 16 }
  0xf2   : > { %p4663_p1 = scmp.ne.s32.totalorder %s5379_s18, %s4662_s4  ;;  %s4669_s19 = scalar_lea.vmem %s5379_s18, 32 }
  0xf3   : > { %p4670_p0 = scmp.lt.s32.totalorder %s5379_s18, %s5379_s18  ;;  %p4671_p12 = scmp.lt.s32.totalorder %s4669_s19, %s4662_s4 }
  0xf4   : > { %p4665_p5 = pnand %p4663_p1, %p4653_p13 }
  0xf5   : > { %s5411_s27 = scalar_lea.hbm %s6064_s8, %s5225_s9  ;;  %p4672_p2 = por %p4671_p12, %p4670_p0 }
  0xf6   : > { %p4666_p4 = pneg %p4665_p5 }
  0xf8   : > { %p4673_p3 = pnand %p4672_p2, %p4666_p4 }
  0xfa   : > { %4676 = shalt.err (!%p4673_p3)
}
  0xfb   : > { %s6066_s20 = sld [smem:[#allocation56_spill]]  ;;  %s1009_s24 = scalar_lea.vmem [#allocation8], %s5212_s6 }
  0xfc   : > { %s6067_s1 = sld [smem:[#allocation44_spill]]  ;;  %s1016_s2 = sshll.u32 %s1009_s24, 4  ;;  %s1017_s2 = int_to_ptr.vmem [resolvable:$true] %s1016_s2 }
  0xfd   : > { %s4677_s4 = scalar_lea.hbm %s5411_s27, 16  ;;  %s4682_s3 = scalar_lea.hbm %s6064_s8, 32 }
  0xfe   : > { %p4678_p9 = scmp.ne.s32.totalorder %s5411_s27, %s4677_s4  ;;  %p4683_p13 = scmp.lt.s32.totalorder %s5411_s27, %s6064_s8 }
  0xff   : > { %p4684_p1 = scmp.lt.s32.totalorder %s4682_s3, %s4677_s4 }
 0x100   : > { %p4680_p10 = pnand %p4678_p9, %p5233_p8 }
 0x101   : > { %4236 = dma.hbm_to_vmem [thread:$0]  (!%p6065_p7), %s6066_s20, 16, %s5379_s18, [#allocation19]  }
 0x102   : > { %s5427_s13 = scalar_lea.hbm %s6067_s1, %s5225_s9  ;;  %p4681_p11 = pneg %p4680_p10 }
 0x103   : > { %p4685_p5 = por %p4684_p1, %p4683_p13 }
 0x105   : > { %p4686_p4 = pnand %p4685_p5, %p4681_p11 }
 0x107   : > { %4689 = shalt.err (!%p4686_p4)
}
 0x108   : > { %s4690_s19 = scalar_lea.vmem %s1017_s2, 16  ;;  %s4968_s18 = smov [#allocation8]  }
 0x109   : > { %p4691_p0 = scmp.ne.s32.totalorder %s1017_s2, %s4690_s19  ;;  %s4695_s20 = sshll.u32 %s4968_s18, 4  ;;  %s4696_s20 = int_to_ptr.vmem [resolvable:$false] %s4695_s20 }
 0x10a   : > { %s4697_s24 = scalar_lea.vmem %s4696_s20, 32  ;;  %p4698_p2 = scmp.lt.s32.totalorder %s1017_s2, %s4696_s20 }
 0x10b   : > { %p4693_p7 = pnand %p4691_p0, %p5233_p8  ;;  %p4699_p3 = scmp.lt.s32.totalorder %s4697_s24, %s4690_s19 }
 0x10d   : > { %p4694_p12 = pneg %p4693_p7  ;;  %p4700_p9 = por %p4699_p3, %p4698_p2 }
 0x10f   : > { %p4701_p10 = pnand %p4700_p9, %p4694_p12 }
 0x111   : > { %4704 = shalt.err (!%p4701_p10)
}
 0x112   : > { %s6068_s4 = scalar_lea.sflag [#allocation7], %s5219_s21  ;;  %s6069_s3 = sld [smem:[#allocation46_spill]] }
 0x113   : > { %4246 = dma.hbm_to_vmem [thread:$0]  (!%p5214_p6), %s5411_s27, 16, %s1017_s2, %s6068_s4  }
 0x114   : > { %s1047_s18 = scalar_lea.vmem [#allocation11], %s5212_s6  ;;  %s4705_s24 = scalar_lea.hbm %s5427_s13, 16 }
 0x115   : > { %s1054_s19 = sshll.u32 %s1047_s18, 4  ;;  %p4706_p11 = scmp.ne.s32.totalorder %s5427_s13, %s4705_s24  ;;  %s1055_s19 = int_to_ptr.vmem [resolvable:$true] %s1054_s19 }
 0x116   : > { %s4710_s8 = scalar_lea.hbm %s6067_s1, 32  ;;  %p4711_p5 = scmp.lt.s32.totalorder %s5427_s13, %s6067_s1 }
 0x117   : > { %p4708_p13 = pnand %p4706_p11, %p5233_p8  ;;  %p4712_p4 = scmp.lt.s32.totalorder %s4710_s8, %s4705_s24 }
 0x118   : > { %s5446_s20 = scalar_lea.hbm %s6069_s3, %s5225_s9 }
 0x119   : > { %p4709_p1 = pneg %p4708_p13  ;;  %p4713_p0 = por %p4712_p4, %p4711_p5 }
 0x11b   : > { %p4714_p7 = pnand %p4713_p0, %p4709_p1 }
 0x11d   : > { %4717 = shalt.err (!%p4714_p7)
}
 0x11e   : > { %s4718_s29 = scalar_lea.vmem %s1055_s19, 16  ;;  %s4969_s27 = smov [#allocation11]  }
 0x11f   : > { %p4719_p12 = scmp.ne.s32.totalorder %s1055_s19, %s4718_s29  ;;  %s4723_s2 = sshll.u32 %s4969_s27, 4  ;;  %s4724_s2 = int_to_ptr.vmem [resolvable:$false] %s4723_s2 }
 0x120   : > { %s4725_s4 = scalar_lea.vmem %s4724_s2, 32  ;;  %p4726_p9 = scmp.lt.s32.totalorder %s1055_s19, %s4724_s2 }
 0x121   : > { %p4721_p2 = pnand %p4719_p12, %p5233_p8  ;;  %p4727_p10 = scmp.lt.s32.totalorder %s4725_s4, %s4718_s29 }
 0x123   : > { %p4722_p3 = pneg %p4721_p2  ;;  %p4728_p11 = por %p4727_p10, %p4726_p9 }
 0x125   : > { %p4729_p13 = pnand %p4728_p11, %p4722_p3 }
 0x127   : > { %4732 = shalt.err (!%p4729_p13)
}
 0x128   : > { %s6070_s8 = scalar_lea.sflag [#allocation10], %s5219_s21  ;;  %s6071_s18 = sld [smem:[#allocation52_spill]] }
 0x129   : > { %4252 = dma.hbm_to_vmem [thread:$0]  (!%p5214_p6), %s5427_s13, 16, %s1055_s19, %s6070_s8  }
 0x12a   : > { %s1085_s27 = scalar_lea.vmem [#allocation14], %s5212_s6  ;;  %s4733_s4 = scalar_lea.hbm %s5446_s20, 16 }
 0x12b   : > { %s1092_s29 = sshll.u32 %s1085_s27, 4  ;;  %p4734_p1 = scmp.ne.s32.totalorder %s5446_s20, %s4733_s4  ;;  %s1093_s29 = int_to_ptr.vmem [resolvable:$true] %s1092_s29 }
 0x12c   : > { %s4738_s1 = scalar_lea.hbm %s6069_s3, 32  ;;  %p4739_p0 = scmp.lt.s32.totalorder %s5446_s20, %s6069_s3 }
 0x12d   : > { %p4736_p5 = pnand %p4734_p1, %p5233_p8  ;;  %p4740_p7 = scmp.lt.s32.totalorder %s4738_s1, %s4733_s4 }
 0x12e   : > { %s6072_s24 = smov %s6071_s18  ;;  %s5465_s2 = scalar_lea.hbm %s6071_s18, %s5225_s9 }
 0x12f   : > { %p4737_p4 = pneg %p4736_p5  ;;  %p4741_p12 = por %p4740_p7, %p4739_p0 }
 0x131   : > { %p4742_p2 = pnand %p4741_p12, %p4737_p4 }
 0x133   : > { %4745 = shalt.err (!%p4742_p2)
}
 0x134   : > { %s4746_s14 = scalar_lea.vmem %s1093_s29, 16  ;;  %s4970_s13 = smov [#allocation14]  }
 0x135   : > { %p4747_p3 = scmp.ne.s32.totalorder %s1093_s29, %s4746_s14  ;;  %s4751_s9 = sshll.u32 %s4970_s13, 4  ;;  %s4752_s9 = int_to_ptr.vmem [resolvable:$false] %s4751_s9 }
 0x136   : > { %s4753_s19 = scalar_lea.vmem %s4752_s9, 32  ;;  %p4754_p11 = scmp.lt.s32.totalorder %s1093_s29, %s4752_s9 }
 0x137   : > { %p4749_p9 = pnand %p4747_p3, %p5233_p8  ;;  %p4755_p13 = scmp.lt.s32.totalorder %s4753_s19, %s4746_s14 }
 0x139   : > { %p4750_p10 = pneg %p4749_p9  ;;  %p4756_p1 = por %p4755_p13, %p4754_p11 }
 0x13b   : > { %p4757_p5 = pnand %p4756_p1, %p4750_p10 }
 0x13d   : > { %4760 = shalt.err (!%p4757_p5)
}
 0x13e   : > { %s6073_s1 = scalar_lea.sflag [#allocation13], %s5219_s21  ;;  %s1149_s8 = scalar_lea.vmem [#allocation17], %s5212_s6 }
 0x13f   : > { %4258 = dma.hbm_to_vmem [thread:$0]  (!%p5214_p6), %s5446_s20, 16, %s1093_s29, %s6073_s1  }
 0x140   : > { %s1156_s18 = sshll.u32 %s1149_s8, 4  ;;  %s4761_s14 = scalar_lea.hbm %s5465_s2, 16  ;;  %s1157_s18 = int_to_ptr.vmem [resolvable:$true] %s1156_s18 }
 0x141   : > { %p4762_p4 = scmp.ne.s32.totalorder %s5465_s2, %s4761_s14  ;;  %s4766_s27 = scalar_lea.hbm %s6072_s24, 32 }
 0x142   : > { %p4767_p12 = scmp.lt.s32.totalorder %s5465_s2, %s6072_s24  ;;  %p4768_p2 = scmp.lt.s32.totalorder %s4766_s27, %s4761_s14 }
 0x143   : > { %p4764_p0 = pnand %p4762_p4, %p5233_p8 }
 0x144   : > { %p4769_p3 = por %p4768_p2, %p4767_p12 }
 0x145   : > { %p4765_p7 = pneg %p4764_p0 }
 0x147   : > { %p4770_p9 = pnand %p4769_p3, %p4765_p7 }
 0x149   : > { %4773 = shalt.err (!%p4770_p9)
}
 0x14a   : > { %s4774_s4 = scalar_lea.vmem %s1157_s18, 16  ;;  %s4971_s6 = smov [#allocation17]  }
 0x14b   : > { %p4775_p10 = scmp.ne.s32.totalorder %s1157_s18, %s4774_s4  ;;  %s4779_s20 = sshll.u32 %s4971_s6, 4  ;;  %s4780_s20 = int_to_ptr.vmem [resolvable:$false] %s4779_s20 }
 0x14c   : > { %s4781_s29 = scalar_lea.vmem %s4780_s20, 32  ;;  %p4782_p1 = scmp.lt.s32.totalorder %s1157_s18, %s4780_s20 }
 0x14d   : > { %p4777_p11 = pnand %p4775_p10, %p5233_p8  ;;  %p4783_p5 = scmp.lt.s32.totalorder %s4781_s29, %s4774_s4 }
 0x14f   : > { %p4778_p13 = pneg %p4777_p11  ;;  %p4784_p4 = por %p4783_p5, %p4782_p1 }
 0x151   : > { %p4785_p0 = pnand %p4784_p4, %p4778_p13 }
 0x153   : > { %4788 = shalt.err (!%p4785_p0)
}
 0x154   : > { %s6074_s13 = scalar_lea.sflag [#allocation16], %s5219_s21  ;;  %p6075_p7 = scmp.ne.s32.totalorder %s6062_s22, 0 }
 0x155   : > { %4264 = dma.hbm_to_vmem [thread:$0]  (!%p5214_p6), %s5465_s2, 16, %s1157_s18, %s6074_s13  }
 0x156   : > { %1165 = sbr.rel (%p6075_p7) target bundleno = 5064 (0x13c8), region = 136 }
 0x15b   : > { %s5499_s30 = sand.u32 1, %s4905_s15   ;;  %p6078_p8 = scmp.ne.s32.totalorder %s6055_s5, 0 }
 0x15c   : > { %6076 = sst [smem:[#allocation74_spill]] %s5499_s30  ;;  %s3850_s9 = sshll.u32 %s5499_s30, 1 }
 0x15d   : > { %s1168_s19 = scalar_lea.sflag [#allocation4], %s5499_s30  ;;  %s5503_s1 = scalar_lea.vmem [#allocation3], %s3850_s9 }
 0x15e   : > { %6077 = sst [smem:[#allocation75_spill]] %s5503_s1 }
 0x15f   : > { %4860 = dma.done.wait (%p6078_p8), %s1168_s19, 32  }
 0x160   : > { %4862 = vsyncadd (%p6078_p8), %s1168_s19, 4294967264  ;;  %s1176_s21 = sand.u32 1, %s5336_s16  }
 0x161   : > { %s1177_s25 = scalar_lea.sflag [#allocation7], %s1176_s21 }
 0x162   : > { %4864 = dma.done.wait (%p6078_p8), %s1177_s25, 32  }
 0x163   : > { %4866 = vsyncadd (%p6078_p8), %s1177_s25, 4294967264  ;;  %s3851_s2 = sshll.u32 %s5499_s30, 5  ;;  %s1193_s18 = scalar_lea.sflag [#allocation10], %s1176_s21 }
 0x164   : > { %s5517_s14 = scalar_lea.vmem [#allocation9], %s3851_s2 }
 0x165   : > { %6079 = sst [smem:[#allocation76_spill]] %s5517_s14 }
 0x166   : > { %4868 = dma.done.wait (%p6078_p8), %s1193_s18, 528  }
 0x167   : > { %4870 = vsyncadd (%p6078_p8), %s1193_s18, 4294966768  ;;  %s1210_s4 = scalar_lea.sflag [#allocation13], %s1176_s21  ;;  %s5524_s6 = scalar_lea.vmem [#allocation12], %s3851_s2 }
 0x168   : > { %6080 = sst [smem:[#allocation77_spill]] %s5524_s6 }
 0x169   : > { %4872 = dma.done.wait (%p6078_p8), %s1210_s4, 528  }
 0x16a   : > { %4874 = vsyncadd (%p6078_p8), %s1210_s4, 4294966768  ;;  %s1227_s29 = scalar_lea.sflag [#allocation16], %s1176_s21  ;;  %s5531_s13 = scalar_lea.vmem [#allocation15], %s3850_s9 }
 0x16b   : > { %6081 = sst [smem:[#allocation78_spill]] %s5531_s13 }
 0x16c   : > { %4876 = dma.done.wait (%p6078_p8), %s1227_s29, 48  }
 0x16d   : > { %4878 = vsyncadd (%p6078_p8), %s1227_s29, 4294967248  ;;  %p6082_p6 = scmp.eq.s32.totalorder %s5336_s16, 0 }
 0x16f   : > { %4880 = dma.done.wait (%p6082_p6), [#allocation19], 16   ;;  %p6083_p12 = pmov %p6082_p6 }
 0x170   : > { %s6084_s25 = sld [smem:[#allocation64_spill]]  ;;  %s5987_s8 = sand.u32 1, %s4893_s10  }
 0x171   : > { %4882 = vsyncadd (%p6083_p12), [#allocation19], 4294967280  ;;  %s6085_s2 = sld [smem:[#allocation63_spill]]  ;;  %s5546_s16 = sshll.u32 %s5987_s8, 3 }
 0x172   : > { %s6086_s9 = sld [smem:[#allocation28_spill]]  ;;  %s1408_s4 = scalar_lea.vmem [#allocation20], %s5546_s16 }
 0x173   : > { %s6087_s21 = sld [smem:[#allocation29_spill]] }
 0x174   : > { %s6088_s18 = sld [smem:[#allocation31_spill]] }
 0x175   : > { %s6090_s5 = sld [smem:[#allocation33_spill]] }
 0x176   : > { %s6091_s29 = sld [smem:[#allocation35_spill]]  ;;  %p1409_p2 = scmp.lt.s32.totalorder %s6084_s25, 1 }
 0x177   : > { %s6092_s20 = sld [smem:[#allocation37_spill]]  ;;  %p1417_p3 = scmp.lt.s32.totalorder %s6085_s2, 1 }
 0x178   : > { %s6093_s19 = sld [smem:[#allocation38_spill]]  ;;  %s6156_s25 = smov (!%p1409_p2, %s6084_s25), 1 }
 0x179   : > { %s6094_s27 = sld [smem:[#allocation39_spill]]  ;;  %s3856_s8 = sshll.u32 %s6156_s25, 3 }
 0x17a   : > { %s6095_s22 = sld [smem:[#allocation40_spill]]  ;;  %s1412_s17 = scalar_lea.vmem %s6086_s9, %s3856_s8 }
 0x17b   : > { %s6096_s3 = sld [smem:[#allocation41_spill]]  ;;  %s5555_s11 = scalar_lea.vmem %s6087_s21, %s3856_s8 }
 0x17c   : > { %s6097_s24 = sld [smem:[#allocation47_spill]] }
 0x17d   : > { %s5551_s26 = scalar_select %p1417_p3, %s6085_s2, 1 }
 0x17e   : > { %s6098_s23 = sld [smem:[#allocation48_spill]] }
 0x17f   : > { %s6099_s15 = sld [smem:[#allocation49_spill]]  ;;  %s1419_s7 = scalar_lea.vmem %s6088_s18, %s5551_s26 }
 0x180   : > { %6100 = sst [smem:[#allocation79_spill]] %s5555_s11  ;;  %s3969_s0 = sshll.u32 %s5551_s26, 6 }
 0x181   : > { %s6101_s12 = sld [smem:[#allocation51_spill]]  ;;  %s3970_s10 = sshll.u32 %s5551_s26, 5 }
 0x182   : > { %s5564_s13 = scalar_lea.vmem %s6090_s5, %s3969_s0  ;;  %s5567_s6 = scalar_lea.vmem %s6091_s29, %s3970_s10 }
 0x183   : > { %s1435_s30 = scalar_lea.vmem %s6092_s20, %s5551_s26  ;;  %s1438_s14 = scalar_lea.vmem %s6093_s19, %s5551_s26 }
 0x184   : > { %s1441_s1 = scalar_lea.vmem %s6094_s27, %s5551_s26  ;;  %s1444_s2 = scalar_lea.vmem %s6095_s22, %s5551_s26 }
 0x185   : > { %s5578_s25 = scalar_lea.vmem %s6096_s3, %s3970_s10  ;;  %s1452_s9 = scalar_lea.vmem %s6097_s24, %s5551_s26 }
 0x186   : > { %s1455_s8 = scalar_lea.vmem %s6098_s23, %s5551_s26  ;;  %s5585_s21 = scalar_lea.vmem %s6099_s15, %s3969_s0 }
 0x187   : > { %s3973_s11 = sshll.u32 %s5551_s26, 7  ;;  %s6102_s28 = sld [smem:[#allocation63_spill]] }
 0x188   : > { %s5589_s18 = scalar_lea.vmem %s6101_s12, %s3973_s11 }
 0x18d   : > { %p3868_p9 = scmp.ne.s32.totalorder %s6102_s28, 0 }
 0x18f   : > { %1470 = sbr.rel (%p3868_p9) target bundleno = 406 (0x196), region = 180 }
 0x194   : > { %v1471_v0 = vld [vmem:[%s1412_s17] sm:$0xff]  ;;  %vm1472_vm0 = vcmask 523264  }
 0x195   : > { %1473 = vst.msk [vmem:[#allocation2] sm:$0xff] %vm1472_vm0, %v1471_v0 }
 0x196 PF: > { %vm1477_vm1 = vcmask 523264   ;;  %v4405_v8 = vld [vmem:[%s5564_s13 + $0x34] ss:$8 sps:$4 sm:$0xff]   ;;  %v4407_v9 = vld [vmem:[%s5564_s13 + $0x30] ss:$8 sps:$4 sm:$0xff]   ;;  %v4972_v12 = vmov 0   ;;  %v1527_v27 = vlaneseq }
 0x197   : > { %v4408_v10 = vld [vmem:[%s5564_s13 + $0x24] ss:$8 sps:$4 sm:$0xff]   ;;  %1588 = vmatprep.subr.bf16.mxu1 %v4405_v8  ;;  %v4410_v11 = vld [vmem:[%s5564_s13 + $0x20] ss:$8 sps:$4 sm:$0xff]   ;;  %1612 = vmatprep.mubr.bf16.mxu1 %v4972_v12  ;;  %v4411_v13 = vld [vmem:[%s5564_s13 + $0x14] ss:$8 sps:$4 sm:$0xff]  }
 0x198   : > { %1589 = vmatpush1.bf16.msra.mxu1 %v4407_v9  ;;  %s6104_s11 = sld [smem:[#allocation32_spill]]  ;;  %v4413_v14 = vld [vmem:[%s5564_s13 + $0x10] ss:$8 sps:$4 sm:$0xff]   ;;  %v4414_v15 = vld [vmem:[%s5564_s13 + $0x4] ss:$8 sps:$4 sm:$0xff]   ;;  %v5615_v28 = vshrl.u32 %v1527_v27, 7 }
 0x199   : > { %1590 = vmatprep.subr.bf16.mxu1 %v4408_v10  ;;  %v4416_v16 = vld [vmem:[%s5564_s13] ss:$8 sps:$4 sm:$0xff]   ;;  %s6105_s15 = sld [smem:[#allocation75_spill]]  ;;  %v4973_v29 = vmov 0.0   ;;  %vm4974_vm2 = vmmov 0   ;;  %s4976_s28 = smov 64  }
 0x19a   : > { %v3869_v21 = vld [vmem:[%s1419_s7] ss:$0 sm:$0xff]  ;;  %4065 = vmatprep.subr.bf16.mxu0 %v4973_v29  ;;  %v1529_v30 = vsub.s32 0, %v5615_v28  ;;  %4067 = vmatprep.mubr.msk.bf16.mxu0 %vm4974_vm2, %v4973_v29  ;;  %s4975_s7 = smov 112   ;;  %s4977_s0 = smov 48   ;;  %v1533_v39 = vsub.s32 1, %v5615_v28 }
 0x19b   : > { %s4978_s12 = smov 32   ;;  %s4979_s17 = smov 96   ;;  %vm1625_vm3 = vcmask 130048   ;;  %vm1691_vm4 = vcmask 1043456   ;;  %vm1674_vm5 = vcmask 64512   ;;  %vm2085_vm6 = vcmask 261120  }
 0x19c   : > { %v5593_v1 = vld [vmem:[#allocation2] sm:$0xff]  ;;  %1591 = vmatpush1.bf16.msra.mxu1 %v4410_v11  ;;  %s4980_s3 = smov 16   ;;  %s4981_s24 = smov 80   ;;  %vm2087_vm7 = vcmask 392192  }
 0x19d   : > { %v1478_v2 = vsel %vm1477_vm1, %v5593_v1, 0.0  ;;  %1592 = vmatprep.subr.bf16.mxu1 %v4411_v13  ;;  %s6107_s22 = sld [smem:[#allocation30_spill]] }
 0x19e   : > { %1479 = vadd.xlane.f32.xlu0 %v1478_v2  ;;  %s6106_s23 = scalar_lea.vmem %s6104_s11, %s5551_s26  ;;  %s6108_s27 = sld [smem:[#allocation79_spill]] }
 0x19f   : > { %v3870_v23 = vld [vmem:[%s6106_s23] ss:$0 sm:$0xff]  ;;  %s6110_s20 = sld [smem:[#allocation74_spill]] }
 0x1a0   : > { %1593 = vmatpush1.bf16.msra.mxu1 %v4413_v14  ;;  %v1514_v31 = vld [vmem:[%s6105_s15] sm:$0x3]  ;;  %s6122_s26 = sld [smem:[#allocation78_spill]] }
 0x1a1   : > { %1594 = vmatprep.subr.bf16.mxu1 %v4414_v15  ;;  %v1530_v32 = vrot.slane %v1514_v31, %v1529_v30  ;;  %v1534_v40 = vrot.slane %v1514_v31, %v1533_v39 }
 0x1a3   : > { %v1524_v56 = vld [vmem:[%s6107_s22] sm:$0xff] }
 0x1a4   : > { %1595 = vmatpush1.bf16.msra.mxu1 %v4416_v16 }
 0x1a5   : > { %4053 = vmatprep.subr.bf16.mxu1 %v4973_v29  ;;  %s6113_s5 = scalar_lea.vmem [#allocation6], %s6110_s20 }
 0x227   : > { %v1480_v3 = vpop.xlane.xlu0 %1479 }
 0x228   : > { %v1482_v4 = vmul.f32 0.015625, %v1480_v3 }
 0x22a   : > { %v1483_v5 = vsub.f32 %v5593_v1, %v1482_v4 }
 0x22c   : > { %v1484_v6 = vmul.f32 %v1483_v5, %v1483_v5 }
 0x22e   : > { %v1485_v7 = vsel %vm1477_vm1, %v1484_v6, 0.0 }
 0x22f   : > { %1486 = vadd.xlane.f32.xlu0 %v1485_v7 }
 0x2b8   : > { %v1487_v17 = vpop.xlane.xlu0 %1486 }
 0x2b9   : > { %v1488_v18 = vmul.f32 0.015625, %v1487_v17 }
 0x2bb   : > { %v1489_v19 = vadd.f32 1e-05, %v1488_v18 }
 0x2bd   : > { %4461 = vrsqrt.f32 %v1489_v19 }
 0x2ca   : > { %v4462_v20 = vpop.eup %4461 }
 0x2cb   : > { %v1491_v22 = vmul.f32 %v4462_v20, %v1483_v5 }
 0x2cd   : > { %v1498_v24 = vmul.f32 %v3869_v21, %v1491_v22 }
 0x2cf   : > { %v1505_v25 = vadd.f32 %v3870_v23, %v1498_v24 }
 0x2d1   : > { %v1525_v26 = vpack.c.bf16 %v1505_v25, %v1505_v25 }
 0x2d3   : > { %3879 = vmatmul.mubr.msk.bf16.vlgmr.msra.gmra.mxu1 %vm1477_vm1, %v1525_v26 }
 0x2d4   : > { %4055 = vmatprep.mubr.msk.bf16.mxu1 %vm4974_vm2, %v4973_v29 }
 0x393   : > { %v1614_v33 = vpop.f32.mrf.mxu1 }
 0x394   : > { %v1615_v34 = vadd.f32 %v1614_v33, %v1530_v32 }
 0x395   : > { %v1616_v35 = vpop.f32.mrf.mxu1 }
 0x396   : > { %v1621_v36 = vpack.c.bf16 %v1615_v34, %v1615_v34  ;;  %v1617_v42 = vadd.f32 %v1616_v35, %v1534_v40 }
 0x397   : > { %v1618_v37 = vpop.f32.mrf.mxu1 }
 0x398   : > { %1735 = vrot.lane.b32.xlu0 %v1621_v36, %s4975_s7  ;;  %1623 = vrot.lane.b32.xlu1 %v1621_v36, %s4976_s28  ;;  %v5639_v45 = vpack.c.bf16 %v1617_v42, %v1617_v42 }
 0x399   : > { %v1619_v38 = vpop.f32.mrf.mxu1 }
 0x39a   : > { %v1693_v48 = vsel %vm1691_vm4, %v5639_v45, 0 }
 0x39c   : > { %1737 = vrot.lane.b32.xlu1 %v1621_v36, %s4977_s0 }
 0x3a0   : > { %1850 = vrot.lane.b32.xlu1 %v1621_v36, %s4978_s12 }
 0x3a4   : > { %1848 = vrot.lane.b32.xlu1 %v1621_v36, %s4979_s17 }
 0x3a8   : > { %1962 = vrot.lane.b32.xlu1 %v1621_v36, %s4980_s3 }
 0x3ac   : > { %1960 = vrot.lane.b32.xlu1 %v1621_v36, %s4981_s24 }
 0x40a   : > { %v1624_v41 = vpop.permute.xlu1 %1623  ;;  %v1736_v49 = vpop.permute.xlu0 %1735 }
 0x40b   : > { %v1630_v43 = vsel %vm1625_vm3, %v1624_v41, 0 }
 0x40c   : > { %4054 = vmatpush3.bf16.xpose.msra.mxu1 %v1630_v43 }
 0x40d   : > { %4059 = vmatprep.subr.bf16.mxu1 %v4973_v29 }
 0x40e   : > { %v1738_v44 = vpop.permute.xlu1 %1737 }
 0x40f   : > { %v1743_v46 = vsel %vm1625_vm3, %v1738_v44, 0 }
 0x410   : > { %4066 = vmatpush3.bf16.xpose.msra.mxu0 %v1743_v46 }
 0x411   : > { %4077 = vmatprep.subr.bf16.mxu0 %v4973_v29 }
 0x412   : > { %v1851_v47 = vpop.permute.xlu1 %1850 }
 0x413   : > { %4056 = vmatmul.mubr.msk.bf16.vlgmr.msra.gmra.mxu1 %vm1625_vm3, %v1621_v36  ;;  %v1856_v51 = vsel %vm1625_vm3, %v1851_v47, 0 }
 0x414   : > { %4060 = vmatpush3.bf16.msra.mxu1 %v1693_v48  ;;  %4061 = vmatprep.mubr.msk.bf16.mxu1 %vm4974_vm2, %v4973_v29 }
 0x415   : > { %4071 = vmatprep.subr.bf16.mxu1 %v4973_v29 }
 0x416   : > { %v1849_v50 = vpop.permute.xlu1 %1848 }
 0x417   : > { %4068 = vmatmul.mubr.msk.bf16.vlgmr.msra.gmra.mxu0 %vm1625_vm3, %v1736_v49 }
 0x418   : > { %4078 = vmatpush3.bf16.xpose.msra.mxu0 %v1856_v51  ;;  %4079 = vmatprep.mubr.msk.bf16.mxu0 %vm4974_vm2, %v4973_v29 }
 0x419   : > { %4089 = vmatprep.subr.bf16.mxu0 %v4973_v29 }
 0x41a   : > { %v1963_v52 = vpop.permute.xlu1 %1962 }
 0x41b   : > { %v1968_v53 = vsel %vm1625_vm3, %v1963_v52, 0 }
 0x41e   : > { %v1961_v54 = vpop.permute.xlu1 %1960 }
 0x41f   : > { %4080 = vmatmul.mubr.msk.bf16.vlgmr.msra.gmra.mxu0 %vm1625_vm3, %v1849_v50 }
 0x420   : > { %4090 = vmatpush3.bf16.xpose.msra.mxu0 %v1968_v53  ;;  %4091 = vmatprep.mubr.msk.bf16.mxu0 %vm4974_vm2, %v4973_v29 }
 0x421   : > { %4101 = vmatprep.subr.bf16.mxu0 %v4973_v29 }
 0x427   : > { %4092 = vmatmul.mubr.msk.bf16.vlgmr.msra.gmra.mxu0 %vm1625_vm3, %v1961_v54 }
 0x428   : > { %4109 = vmatprep.mubr.msk.bf16.mxu0 %vm4974_vm2, %v4973_v29 }
 0x4d3   : > { %v1666_v55 = vpop.f32.mrf.mxu1 }
 0x4d4   : > { %v1672_v57 = vmul.f32 0.25, %v1666_v55 }
 0x4d5   : > { %v4057_v58 = vpop.f32.mrf.mxu1 }
 0x4d6   : > { %v1673_v59 = vadd.f32 %v1672_v57, %v1524_v56 }
 0x4d7   : > { %v1669_v60 = vpop.f32.mrf.mxu1  ;;  %v1779_v61 = vpop.f32.mrf.mxu0 }
 0x4d8   : > { %v1785_v62 = vmul.f32 0.25, %v1779_v61  ;;  %v1675_v63 = vsel %vm1674_vm5, %v1673_v59, -inf }
 0x4d9   : > { %1676 = vmax.xlane.f32.xlu1 %v1675_v63  ;;  %v4058_v0 = vpop.f32.mrf.mxu1  ;;  %v4069_v2 = vpop.f32.mrf.mxu0 }
 0x4da   : > { %v1786_v3 = vadd.f32 %v1785_v62, %v1524_v56 }
 0x4db   : > { %v1782_v4 = vpop.f32.mrf.mxu0 }
 0x4dc   : > { %v1787_v5 = vsel %vm1674_vm5, %v1786_v3, -inf }
 0x4dd   : > { %1788 = vmax.xlane.f32.xlu0 %v1787_v5  ;;  %v4070_v6 = vpop.f32.mrf.mxu0  ;;  %v4417_v5 = vld [vmem:[%s5567_s6 + $0x18] sm:$0xff]  }
 0x4de   : > { %4102 = vmatpush3.bf16.msra.mxu0 %v4417_v5 }
 0x4df   : > { %v1892_v7 = vpop.f32.mrf.mxu0  ;;  %4103 = vmatprep.subr.bf16.mxu0 %v4973_v29 }
 0x4e0   : > { %v1898_v8 = vmul.f32 0.25, %v1892_v7 }
 0x4e1   : > { %v4081_v9 = vpop.f32.mrf.mxu0 }
 0x4e2   : > { %v1899_v10 = vadd.f32 %v1898_v8, %v1524_v56 }
 0x4e3   : > { %v1895_v11 = vpop.f32.mrf.mxu0 }
 0x4e4   : > { %v1900_v13 = vsel %vm1674_vm5, %v1899_v10, -inf }
 0x4e5   : > { %1901 = vmax.xlane.f32.xlu1 %v1900_v13  ;;  %v4082_v14 = vpop.f32.mrf.mxu0 }
 0x4e7   : > { %v2004_v15 = vpop.f32.mrf.mxu0 }
 0x4e8   : > { %v2010_v16 = vmul.f32 0.25, %v2004_v15  ;;  %v4418_v15 = vld [vmem:[%s5567_s6 + $0x10] sm:$0xff]  }
 0x4e9   : > { %v4093_v17 = vpop.f32.mrf.mxu0  ;;  %4104 = vmatpush3.bf16.msra.mxu0 %v4418_v15 }
 0x4ea   : > { %v2011_v18 = vadd.f32 %v2010_v16, %v1524_v56  ;;  %v4419_v16 = vld [vmem:[%s5567_s6 + $0x8] sm:$0xff]   ;;  %4105 = vmatprep.subr.bf16.mxu0 %v4973_v29  ;;  %v4420_v17 = vld [vmem:[%s5567_s6] sm:$0xff]   ;;  %s6109_s6 = sld [smem:[#allocation76_spill]] }
 0x4eb   : > { %v2007_v19 = vpop.f32.mrf.mxu0 }
 0x4ec   : > { %v2012_v20 = vsel %vm1674_vm5, %v2011_v18, -inf }
 0x4ed   : > { %2013 = vmax.xlane.f32.xlu0 %v2012_v20  ;;  %v4094_v21 = vpop.f32.mrf.mxu0  ;;  %4106 = vmatpush3.bf16.msra.mxu0 %v4419_v16 }
 0x4ee   : > { %4107 = vmatprep.subr.bf16.mxu0 %v4973_v29 }
 0x4f1   : > { %4108 = vmatpush3.bf16.msra.mxu0 %v4420_v17 }
 0x4f2   : > { %4125 = vmatprep.subr.bf16.mxu0 %v4973_v29 }
 0x562   : > { %v1677_v22 = vpop.xlane.xlu1 %1676 }
 0x563   : > { %v1678_v23 = vsub.f32 %v1673_v59, %v1677_v22 }
 0x565   : > { %v1679_v24 = vmul.f32 1.442695, %v1678_v23 }
 0x566   : > { %v1789_v25 = vpop.xlane.xlu0 %1788 }
 0x567   : > { %4463 = vpow2.f32 %v1679_v24  ;;  %v1790_v26 = vsub.f32 %v1786_v3, %v1789_v25 }
 0x569   : > { %v1791_v27 = vmul.f32 1.442695, %v1790_v26  ;;  %v2193_v26 = vld [vmem:[%s6108_s27] sm:$0xff] }
 0x56b   : > { %4465 = vpow2.f32 %v1791_v27  ;;  %v2196_v27 = vsel %vm1477_vm1, %v2193_v26, 0.0 }
 0x56e   : > { %v1902_v41 = vpop.xlane.xlu1 %1901 }
 0x56f   : > { %v1903_v42 = vsub.f32 %v1899_v10, %v1902_v41 }
 0x571   : > { %v1904_v43 = vmul.f32 1.442695, %v1903_v42 }
 0x574   : > { %v4464_v31 = vpop.eup %4463 }
 0x575   : > { %v1681_v32 = vsel %vm1674_vm5, %v4464_v31, 0.0 }
 0x576   : > { %v2014_v33 = vpop.xlane.xlu0 %2013  ;;  %1682 = vadd.xlane.f32.xlu1 %v1681_v32 }
 0x577   : > { %v2015_v34 = vsub.f32 %v2011_v18, %v2014_v33 }
 0x578   : > { %v4466_v35 = vpop.eup %4465 }
 0x579   : > { %v2016_v36 = vmul.f32 1.442695, %v2015_v34  ;;  %v1793_v37 = vsel %vm1674_vm5, %v4466_v35, 0.0 }
 0x57a   : > { %1794 = vadd.xlane.f32.xlu0 %v1793_v37 }
 0x57b   : > { %4467 = vpow2.f32 %v2016_v36 }
 0x57c   : > { %4469 = vpow2.f32 %v1904_v43 }
 0x587   : > { %1800 = vrot.lane.b32.xlu1 %v5639_v45, %s4975_s7 }
 0x588   : > { %v4468_v38 = vpop.eup %4467 }
 0x589   : > { %v2018_v40 = vsel %vm1674_vm5, %v4468_v38, 0.0  ;;  %v4470_v44 = vpop.eup %4469 }
 0x58a   : > { %2019 = vadd.xlane.f32.xlu0 %v2018_v40  ;;  %v1906_v46 = vsel %vm1674_vm5, %v4470_v44, 0.0 }
 0x5a0   : > { %1912 = vrot.lane.b32.xlu0 %v5639_v45, %s4979_s17 }
 0x5ab   : > { %1907 = vadd.xlane.f32.xlu1 %v1906_v46  ;;  %v4422_v46 = vld [vmem:[%s6109_s6 + $0x10] sm:$0xff]  }
 0x5bc   : > { %2024 = vrot.lane.b32.xlu1 %v5639_v45, %s4981_s24 }
 0x5ff   : > { %v1683_v47 = vpop.xlane.xlu1 %1682 }
 0x600   : > { %4471 = vrcp.f32 %v1683_v47  ;;  %v4423_v47 = vld [vmem:[%s6109_s6 + $0x8] sm:$0xff]  }
 0x603   : > { %v1795_v48 = vpop.xlane.xlu0 %1794  ;;  %v1801_v51 = vpop.permute.xlu1 %1800 }
 0x604   : > { %4473 = vrcp.f32 %v1795_v48  ;;  %v1806_v54 = vsel %vm1691_vm4, %v1801_v51, 0  ;;  %v4424_v48 = vld [vmem:[%s6109_s6] sm:$0xff]  }
 0x605   : > { %v3888_v51 = vld [vmem:[%s6113_s5] ss:$0 sm:$0xff] }
 0x60d   : > { %v4472_v49 = vpop.eup %4471 }
 0x60e   : > { %v1685_v50 = vmul.f32 %v4472_v49, %v4464_v31 }
 0x610   : > { %v1686_v52 = vpack.c.bf16 %v1685_v50, %v1685_v50 }
 0x611   : > { %v4474_v53 = vpop.eup %4473 }
 0x612   : > { %4062 = vmatmul.mubr.msk.bf16.vlgmr.msra.gmra.mxu1 %vm1674_vm5, %v1686_v52  ;;  %v1797_v45 = vmul.f32 %v4474_v53, %v4466_v35 }
 0x613   : > { %4072 = vmatpush3.bf16.msra.mxu1 %v1806_v54  ;;  %v2020_v55 = vpop.xlane.xlu0 %2019  ;;  %4073 = vmatprep.mubr.msk.bf16.mxu1 %vm4974_vm2, %v4973_v29 }
 0x614   : > { %4083 = vmatprep.subr.bf16.mxu1 %v4973_v29  ;;  %v1798_v58 = vpack.c.bf16 %v1797_v45, %v1797_v45 }
 0x617   : > { %v1913_v56 = vpop.permute.xlu0 %1912 }
 0x618   : > { %v1918_v57 = vsel %vm1691_vm4, %v1913_v56, 0 }
 0x61a   : > { %4074 = vmatmul.mubr.msk.bf16.vlgmr.msra.gmra.mxu1 %vm1674_vm5, %v1798_v58 }
 0x61b   : > { %4084 = vmatpush3.bf16.msra.mxu1 %v1918_v57  ;;  %4085 = vmatprep.mubr.msk.bf16.mxu1 %vm4974_vm2, %v4973_v29 }
 0x61c   : > { %4095 = vmatprep.subr.bf16.mxu1 %v4973_v29 }
 0x634   : > { %v1908_v59 = vpop.xlane.xlu1 %1907 }
 0x635   : > { %4475 = vrcp.f32 %v1908_v59 }
 0x636   : > { %4477 = vrcp.f32 %v2020_v55 }
 0x638   : > { %v2025_v62 = vpop.permute.xlu1 %2024 }
 0x639   : > { %v2030_v2 = vsel %vm1691_vm4, %v2025_v62, 0  ;;  %v3897_v62 = vld [vmem:[%s1444_s2] ss:$0 sm:$0xff]  ;;  %s6115_s2 = scalar_lea.vmem [#allocation11], %s6110_s20 }
 0x642   : > { %v4476_v60 = vpop.eup %4475 }
 0x643   : > { %v1910_v61 = vmul.f32 %v4476_v60, %v4470_v44  ;;  %v4478_v0 = vpop.eup %4477  ;;  %v4421_v44 = vld [vmem:[%s6109_s6 + $0x18] sm:$0xff]   ;;  %v3896_v60 = vld [vmem:[%s1441_s1] ss:$0 sm:$0xff] }
 0x644   : > { %v2022_v3 = vmul.f32 %v4478_v0, %v4468_v38 }
 0x645   : > { %v1911_v63 = vpack.c.bf16 %v1910_v61, %v1910_v61 }
 0x646   : > { %v2023_v4 = vpack.c.bf16 %v2022_v3, %v2022_v3 }
 0x647   : > { %4086 = vmatmul.mubr.msk.bf16.vlgmr.msra.gmra.mxu1 %vm1674_vm5, %v1911_v63 }
 0x648   : > { %4096 = vmatpush3.bf16.msra.mxu1 %v2030_v2  ;;  %4097 = vmatprep.mubr.msk.bf16.mxu1 %vm4974_vm2, %v4973_v29 }
 0x649   : > { %4113 = vmatprep.subr.bf16.mxu1 %v4973_v29 }
 0x64f   : > { %4098 = vmatmul.mubr.msk.bf16.vlgmr.msra.gmra.mxu1 %vm1674_vm5, %v2023_v4 }
 0x650   : > { %4121 = vmatprep.mubr.msk.bf16.mxu1 %vm4974_vm2, %v4973_v29 }
 0x6d2   : > { %v1729_v6 = vpop.f32.mrf.mxu1 }
 0x6d4   : > { %v4063_v7 = vpop.f32.mrf.mxu1 }
 0x6d5   : > { %v4425_v7 = vld [vmem:[%s5578_s25 + $0x18] sm:$0xff]  }
 0x6d6   : > { %v1732_v8 = vpop.f32.mrf.mxu1  ;;  %4114 = vmatpush3.bf16.msra.mxu1 %v4425_v7 }
 0x6d7   : > { %4115 = vmatprep.subr.bf16.mxu1 %v4973_v29  ;;  %v4426_v8 = vld [vmem:[%s5578_s25 + $0x10] sm:$0xff]  }
 0x6d8   : > { %v4064_v9 = vpop.f32.mrf.mxu1 }
 0x6d9   : > { %v4427_v9 = vld [vmem:[%s5578_s25 + $0x8] sm:$0xff]  }
 0x6da   : > { %v1842_v10 = vpop.f32.mrf.mxu1  ;;  %4116 = vmatpush3.bf16.msra.mxu1 %v4426_v8 }
 0x6db   : > { %2073 = vrot.lane.b32.xlu1 %v1842_v10, %s4980_s3  ;;  %4117 = vmatprep.subr.bf16.mxu1 %v4973_v29  ;;  %v4428_v10 = vld [vmem:[%s5578_s25] sm:$0xff]   ;;  %s6119_s25 = scalar_lea.vmem [#allocation14], %s6110_s20 }
 0x6dc   : > { %v4075_v11 = vpop.f32.mrf.mxu1 }
 0x6dd   : > { %v3904_v11 = vld [vmem:[%s6115_s2] ss:$0 sm:$0xff] }
 0x6de   : > { %v1845_v13 = vpop.f32.mrf.mxu1  ;;  %4118 = vmatpush3.bf16.msra.mxu1 %v4427_v9 }
 0x6df   : > { %4119 = vmatprep.subr.bf16.mxu1 %v4973_v29 }
 0x6e0   : > { %v4076_v14 = vpop.f32.mrf.mxu1 }
 0x6e2   : > { %4120 = vmatpush3.bf16.msra.mxu1 %v4428_v10 }
 0x6e3   : > { %4137 = vmatprep.subr.bf16.mxu1 %v4973_v29 }
 0x707   : > { %v1954_v18 = vpop.f32.mrf.mxu1 }
 0x708   : > { %2077 = vrot.lane.b32.xlu0 %v1954_v18, %s4978_s12 }
 0x709   : > { %v4087_v19 = vpop.f32.mrf.mxu1 }
 0x70b   : > { %v1957_v20 = vpop.f32.mrf.mxu1 }
 0x70d   : > { %v4088_v21 = vpop.f32.mrf.mxu1 }
 0x70f   : > { %v2066_v22 = vpop.f32.mrf.mxu1 }
 0x710   : > { %2081 = vrot.lane.b32.xlu1 %v2066_v22, %s4977_s0 }
 0x711   : > { %v4099_v23 = vpop.f32.mrf.mxu1 }
 0x712   : > { %v3894_v23 = vld [vmem:[%s1435_s30] ss:$0 sm:$0xff]  ;;  %s6117_s30 = scalar_lea.vmem [#allocation8], %s6110_s20 }
 0x713   : > { %v2069_v24 = vpop.f32.mrf.mxu1 }
 0x715   : > { %v4100_v25 = vpop.f32.mrf.mxu1 }
 0x716   : > { %v3895_v25 = vld [vmem:[%s1438_s14] ss:$0 sm:$0xff]  ;;  %s6118_s14 = sld [smem:[#allocation77_spill]] }
 0x727   : > { %2197 = vadd.xlane.f32.xlu0 %v2196_v27 }
 0x74d   : > { %v2074_v31 = vpop.permute.xlu1 %2073 }
 0x74e   : > { %v2084_v33 = vsel %vm1625_vm3, %v1729_v6, %v2074_v31 }
 0x77a   : > { %v2078_v32 = vpop.permute.xlu0 %2077 }
 0x77b   : > { %v2086_v34 = vsel %vm2085_vm6, %v2084_v33, %v2078_v32 }
 0x782   : > { %v2082_v35 = vpop.permute.xlu1 %2081 }
 0x783   : > { %v2088_v36 = vsel %vm2087_vm7, %v2086_v34, %v2082_v35  ;;  %v3898_v35 = vld [vmem:[%s6117_s30] ss:$0 sm:$0xff] }
 0x784   : > { %v2089_v37 = vpack.c.bf16 %v2088_v36, %v2088_v36 }
 0x786   : > { %4110 = vmatmul.mubr.msk.bf16.vlgmr.msra.gmra.mxu0 %vm1477_vm1, %v2089_v37 }
 0x787   : > { %4133 = vmatprep.mubr.msk.bf16.mxu0 %vm4974_vm2, %v4973_v29  ;;  %4126 = vmatpush3.bf16.msra.mxu0 %v4421_v44 }
 0x788   : > { %4127 = vmatprep.subr.bf16.mxu0 %v4973_v29 }
 0x78b   : > { %4128 = vmatpush3.bf16.msra.mxu0 %v4422_v46 }
 0x78c   : > { %4129 = vmatprep.subr.bf16.mxu0 %v4973_v29 }
 0x78f   : > { %4130 = vmatpush3.bf16.msra.mxu0 %v4423_v47 }
 0x790   : > { %4131 = vmatprep.subr.bf16.mxu0 %v4973_v29 }
 0x793   : > { %4132 = vmatpush3.bf16.msra.mxu0 %v4424_v48 }
 0x794   : > { %4149 = vmatprep.subr.bf16.mxu0 %v4973_v29 }
 0x7b0   : > { %v2198_v38 = vpop.xlane.xlu0 %2197 }
 0x7b1   : > { %v2199_v40 = vmul.f32 0.015625, %v2198_v38 }
 0x7b3   : > { %v2200_v41 = vsub.f32 %v2193_v26, %v2199_v40 }
 0x7b5   : > { %v2201_v42 = vmul.f32 %v2200_v41, %v2200_v41 }
 0x7b7   : > { %v2202_v43 = vsel %vm1477_vm1, %v2201_v42, 0.0 }
 0x7b8   : > { %2203 = vadd.xlane.f32.xlu0 %v2202_v43 }
 0x841   : > { %v2204_v49 = vpop.xlane.xlu0 %2203 }
 0x842   : > { %v2205_v50 = vmul.f32 0.015625, %v2204_v49 }
 0x844   : > { %v2206_v52 = vadd.f32 1e-05, %v2205_v50 }
 0x846   : > { %v2157_v53 = vpop.f32.mrf.mxu0  ;;  %4479 = vrsqrt.f32 %v2206_v52 }
 0x847   : > { %v2158_v54 = vadd.f32 %v3888_v51, %v2157_v53 }
 0x848   : > { %v4111_v55 = vpop.f32.mrf.mxu0 }
 0x849   : > { %v5726_v45 = vadd.f32 %v2158_v54, %v5593_v1 }
 0x84a   : > { %v2160_v56 = vpop.f32.mrf.mxu0 }
 0x84b   : > { %v2166_v57 = vsel %vm1477_vm1, %v5726_v45, 0.0 }
 0x84c   : > { %2167 = vadd.xlane.f32.xlu1 %v2166_v57  ;;  %v4112_v58 = vpop.f32.mrf.mxu0 }
 0x853   : > { %v4480_v59 = vpop.eup %4479 }
 0x854   : > { %v2208_v61 = vmul.f32 %v4480_v59, %v2200_v41 }
 0x856   : > { %v2215_v63 = vmul.f32 %v3896_v60, %v2208_v61 }
 0x858   : > { %v2222_v0 = vadd.f32 %v3897_v62, %v2215_v63 }
 0x85a   : > { %v2324_v2 = vpack.c.bf16 %v2222_v0, %v2222_v0 }
 0x85c   : > { %4134 = vmatmul.mubr.msk.bf16.vlgmr.msra.gmra.mxu0 %vm1477_vm1, %v2324_v2 }
 0x85d   : > { %4151 = vmatprep.mubr.msk.bf16.mxu0 %vm4974_vm2, %v4973_v29 }
 0x8d5   : > { %v2168_v1 = vpop.xlane.xlu1 %2167 }
 0x8d6   : > { %v2169_v3 = vmul.f32 0.015625, %v2168_v1 }
 0x8d8   : > { %v2170_v4 = vsub.f32 %v5726_v45, %v2169_v3 }
 0x8da   : > { %v2171_v5 = vmul.f32 %v2170_v4, %v2170_v4 }
 0x8dc   : > { %v2172_v6 = vsel %vm1477_vm1, %v2171_v5, 0.0 }
 0x8dd   : > { %2173 = vadd.xlane.f32.xlu0 %v2172_v6 }
 0x91c   : > { %v2392_v13 = vpop.f32.mrf.mxu0 }
 0x91d   : > { %v2393_v14 = vadd.f32 %v3904_v11, %v2392_v13 }
 0x91e   : > { %v4135_v15 = vpop.f32.mrf.mxu0 }
 0x91f   : > { %v5751_v16 = vpack.c.bf16 %v2393_v14, %v2393_v14 }
 0x920   : > { %v2395_v17 = vpop.f32.mrf.mxu0 }
 0x921   : > { %2511 = vrot.lane.b32.xlu1 %v5751_v16, %s4975_s7  ;;  %v2404_v32 = vsel %vm1625_vm3, %v5751_v16, 0 }
 0x922   : > { %v4136_v18 = vpop.f32.mrf.mxu0 }
 0x925   : > { %2622 = vrot.lane.b32.xlu1 %v5751_v16, %s4979_s17 }
 0x966   : > { %v2174_v19 = vpop.xlane.xlu0 %2173 }
 0x967   : > { %v2175_v20 = vmul.f32 0.015625, %v2174_v19 }
 0x969   : > { %v2176_v21 = vadd.f32 1e-05, %v2175_v20 }
 0x96b   : > { %4481 = vrsqrt.f32 %v2176_v21 }
 0x978   : > { %v4482_v22 = vpop.eup %4481 }
 0x979   : > { %v2178_v24 = vmul.f32 %v4482_v22, %v2170_v4 }
 0x97b   : > { %v2185_v26 = vmul.f32 %v3894_v23, %v2178_v24 }
 0x97d   : > { %v2192_v27 = vadd.f32 %v3895_v25, %v2185_v26 }
 0x97f   : > { %v2250_v31 = vpack.c.bf16 %v2192_v27, %v2192_v27 }
 0x981   : > { %4122 = vmatmul.mubr.msk.bf16.vlgmr.msra.gmra.mxu1 %vm1477_vm1, %v2250_v31 }
 0x982   : > { %4138 = vmatpush3.bf16.xpose.msra.mxu1 %v2404_v32  ;;  %4139 = vmatprep.mubr.msk.bf16.mxu1 %vm4974_vm2, %v4973_v29 }
 0x983   : > { %4143 = vmatprep.subr.bf16.mxu1 %v4973_v29 }
 0x993   : > { %v2512_v33 = vpop.permute.xlu1 %2511 }
 0x994   : > { %v2517_v34 = vsel %vm1625_vm3, %v2512_v33, 0 }
 0x995   : > { %4150 = vmatpush3.bf16.xpose.msra.mxu0 %v2517_v34 }
 0x996   : > { %4161 = vmatprep.subr.bf16.mxu0 %v4973_v29 }
 0x997   : > { %v2623_v43 = vpop.permute.xlu1 %2622 }
 0x998   : > { %v2628_v46 = vsel %vm1625_vm3, %v2623_v43, 0 }
 0xa41   : > { %v2318_v36 = vpop.f32.mrf.mxu1 }
 0xa42   : > { %v2319_v37 = vadd.f32 %v3898_v35, %v2318_v36 }
 0xa43   : > { %v4123_v38 = vpop.f32.mrf.mxu1 }
 0xa44   : > { %v2398_v40 = vpack.c.bf16 %v2319_v37, %v2319_v37 }
 0xa45   : > { %v2321_v41 = vpop.f32.mrf.mxu1 }
 0xa46   : > { %2509 = vrot.lane.b32.xlu0 %v2398_v40, %s4975_s7  ;;  %2620 = vrot.lane.b32.xlu1 %v2398_v40, %s4979_s17 }
 0xa47   : > { %4140 = vmatmul.mubr.msk.bf16.vlgmr.msra.gmra.mxu1 %vm1625_vm3, %v2398_v40  ;;  %v4124_v42 = vpop.f32.mrf.mxu1 }
 0xa48   : > { %4145 = vmatprep.mubr.msk.bf16.mxu1 %vm4974_vm2, %v4973_v29 }
 0xa4a   : > { %2733 = vrot.lane.b32.xlu0 %v5751_v16, %s4981_s24  ;;  %2731 = vrot.lane.b32.xlu1 %v2398_v40, %s4981_s24 }
 0xab8   : > { %v2510_v44 = vpop.permute.xlu0 %2509  ;;  %v2621_v48 = vpop.permute.xlu1 %2620 }
 0xab9   : > { %4152 = vmatmul.mubr.msk.bf16.vlgmr.msra.gmra.mxu0 %vm1625_vm3, %v2510_v44 }
 0xaba   : > { %4162 = vmatpush3.bf16.xpose.msra.mxu0 %v2628_v46  ;;  %4163 = vmatprep.mubr.msk.bf16.mxu0 %vm4974_vm2, %v4973_v29 }
 0xabb   : > { %4173 = vmatprep.subr.bf16.mxu0 %v4973_v29 }
 0xabc   : > { %v2734_v47 = vpop.permute.xlu0 %2733  ;;  %v2732_v50 = vpop.permute.xlu1 %2731 }
 0xabd   : > { %v2739_v49 = vsel %vm1625_vm3, %v2734_v47, 0 }
 0xac1   : > { %4164 = vmatmul.mubr.msk.bf16.vlgmr.msra.gmra.mxu0 %vm1625_vm3, %v2621_v48 }
 0xac2   : > { %4174 = vmatpush3.bf16.xpose.msra.mxu0 %v2739_v49  ;;  %4175 = vmatprep.mubr.msk.bf16.mxu0 %vm4974_vm2, %v4973_v29 }
 0xac3   : > { %4185 = vmatprep.subr.bf16.mxu0 %v4973_v29 }
 0xac9   : > { %4176 = vmatmul.mubr.msk.bf16.vlgmr.msra.gmra.mxu0 %vm1625_vm3, %v2732_v50 }
 0xaca   : > { %4193 = vmatprep.mubr.msk.bf16.mxu0 %vm4974_vm2, %v4973_v29 }
 0xb07   : > { %v2440_v51 = vpop.f32.mrf.mxu1 }
 0xb08   : > { %v2446_v52 = vmul.f32 0.25, %v2440_v51 }
 0xb09   : > { %v4141_v53 = vpop.f32.mrf.mxu1 }
 0xb0a   : > { %v2447_v54 = vsel %vm1674_vm5, %v2446_v52, -inf }
 0xb0b   : > { %2448 = vmax.xlane.f32.xlu0 %v2447_v54  ;;  %v2443_v55 = vpop.f32.mrf.mxu1 }
 0xb0d   : > { %v4142_v56 = vpop.f32.mrf.mxu1 }
 0xb79   : > { %v2553_v57 = vpop.f32.mrf.mxu0 }
 0xb7a   : > { %v2559_v58 = vmul.f32 0.25, %v2553_v57 }
 0xb7b   : > { %v4153_v59 = vpop.f32.mrf.mxu0 }
 0xb7c   : > { %v2560_v60 = vsel %vm1674_vm5, %v2559_v58, -inf }
 0xb7d   : > { %2561 = vmax.xlane.f32.xlu1 %v2560_v60  ;;  %v2556_v61 = vpop.f32.mrf.mxu0 }
 0xb7f   : > { %v4154_v62 = vpop.f32.mrf.mxu0 }
 0xb81   : > { %v2664_v63 = vpop.f32.mrf.mxu0 }
 0xb82   : > { %v2670_v0 = vmul.f32 0.25, %v2664_v63 }
 0xb83   : > { %v4165_v2 = vpop.f32.mrf.mxu0 }
 0xb84   : > { %v2671_v1 = vsel %vm1674_vm5, %v2670_v0, -inf  ;;  %v4429_v2 = vld [vmem:[%s6118_s14 + $0x18] sm:$0xff]  }
 0xb85   : > { %2672 = vmax.xlane.f32.xlu0 %v2671_v1  ;;  %v2667_v3 = vpop.f32.mrf.mxu0  ;;  %4186 = vmatpush3.bf16.msra.mxu0 %v4429_v2  ;;  %v4430_v1 = vld [vmem:[%s6118_s14 + $0x10] sm:$0xff]   ;;  %v4452_v2 = vld [vmem:[%s5589_s18 + $0x20] sm:$0xff]  }
 0xb86   : > { %4187 = vmatprep.subr.bf16.mxu0 %v4973_v29  ;;  %v4431_v3 = vld [vmem:[%s6118_s14 + $0x8] sm:$0xff]  }
 0xb87   : > { %v4166_v4 = vpop.f32.mrf.mxu0 }
 0xb89   : > { %v2775_v5 = vpop.f32.mrf.mxu0  ;;  %4188 = vmatpush3.bf16.msra.mxu0 %v4430_v1  ;;  %v4453_v1 = vld [vmem:[%s5589_s18 + $0x58] sm:$0xff]  }
 0xb8a   : > { %v2781_v6 = vmul.f32 0.25, %v2775_v5  ;;  %4189 = vmatprep.subr.bf16.mxu0 %v4973_v29 }
 0xb8b   : > { %v4177_v7 = vpop.f32.mrf.mxu0 }
 0xb8c   : > { %v2782_v8 = vsel %vm1674_vm5, %v2781_v6, -inf }
 0xb8d   : > { %2783 = vmax.xlane.f32.xlu0 %v2782_v8  ;;  %v2778_v9 = vpop.f32.mrf.mxu0  ;;  %4190 = vmatpush3.bf16.msra.mxu0 %v4431_v3  ;;  %v4454_v3 = vld [vmem:[%s5589_s18 + $0x18] sm:$0xff]  }
 0xb8e   : > { %4191 = vmatprep.subr.bf16.mxu0 %v4973_v29 }
 0xb8f   : > { %v4178_v10 = vpop.f32.mrf.mxu0 }
 0xb94   : > { %v2449_v11 = vpop.xlane.xlu0 %2448 }
 0xb95   : > { %v2450_v13 = vsub.f32 %v2446_v52, %v2449_v11 }
 0xb97   : > { %v2451_v14 = vmul.f32 1.442695, %v2450_v13 }
 0xb99   : > { %4483 = vpow2.f32 %v2451_v14 }
 0xba6   : > { %v4484_v15 = vpop.eup %4483 }
 0xba7   : > { %v2453_v17 = vsel %vm1674_vm5, %v4484_v15, 0.0 }
 0xba8   : > { %2454 = vadd.xlane.f32.xlu1 %v2453_v17 }
 0xbb9   : > { %2460 = vrot.lane.b32.xlu1 %v5751_v16, %s4976_s28 }
 0xc06   : > { %v2562_v18 = vpop.xlane.xlu1 %2561 }
 0xc07   : > { %v2563_v19 = vsub.f32 %v2559_v58, %v2562_v18 }
 0xc09   : > { %v2564_v20 = vmul.f32 1.442695, %v2563_v19 }
 0xc0b   : > { %4485 = vpow2.f32 %v2564_v20 }
 0xc0e   : > { %v2673_v21 = vpop.xlane.xlu0 %2672 }
 0xc0f   : > { %v2674_v22 = vsub.f32 %v2670_v0, %v2673_v21 }
 0xc11   : > { %v2675_v23 = vmul.f32 1.442695, %v2674_v22 }
 0xc13   : > { %4487 = vpow2.f32 %v2675_v23 }
 0xc16   : > { %v2784_v24 = vpop.xlane.xlu0 %2783 }
 0xc17   : > { %v2785_v25 = vsub.f32 %v2781_v6, %v2784_v24  ;;  %v3918_v24 = vld [vmem:[%s6119_s25] ss:$0 sm:$0xff] }
 0xc18   : > { %v4486_v26 = vpop.eup %4485 }
 0xc19   : > { %v2786_v27 = vmul.f32 1.442695, %v2785_v25  ;;  %v2566_v31 = vsel %vm1674_vm5, %v4486_v26, 0.0 }
 0xc1a   : > { %2567 = vadd.xlane.f32.xlu0 %v2566_v31 }
 0xc1b   : > { %4489 = vpow2.f32 %v2786_v27 }
 0xc20   : > { %v4488_v32 = vpop.eup %4487 }
 0xc21   : > { %v2677_v33 = vsel %vm1674_vm5, %v4488_v32, 0.0 }
 0xc22   : > { %2678 = vadd.xlane.f32.xlu1 %v2677_v33 }
 0xc28   : > { %v4490_v34 = vpop.eup %4489 }
 0xc29   : > { %v2788_v35 = vsel %vm1674_vm5, %v4490_v34, 0.0 }
 0xc2a   : > { %2789 = vadd.xlane.f32.xlu0 %v2788_v35 }
 0xc31   : > { %v2455_v36 = vpop.xlane.xlu1 %2454 }
 0xc32   : > { %4491 = vrcp.f32 %v2455_v36 }
 0xc33   : > { %2683 = vrot.lane.b32.xlu1 %v5751_v16, %s4978_s12 }
 0xc35   : > { %v2461_v37 = vpop.permute.xlu1 %2460 }
 0xc36   : > { %v2466_v38 = vsel %vm1691_vm4, %v2461_v37, 0 }
 0xc37   : > { %4144 = vmatpush3.bf16.msra.mxu1 %v2466_v38  ;;  %2794 = vrot.lane.b32.xlu1 %v5751_v16, %s4980_s3 }
 0xc38   : > { %4155 = vmatprep.subr.bf16.mxu1 %v4973_v29 }
 0xc3f   : > { %v4492_v40 = vpop.eup %4491 }
 0xc40   : > { %2572 = vrot.lane.b32.xlu0 %v5751_v16, %s4977_s0  ;;  %v2457_v41 = vmul.f32 %v4492_v40, %v4484_v15 }
 0xc42   : > { %v2458_v42 = vpack.c.bf16 %v2457_v41, %v2457_v41  ;;  %v4433_v41 = vld [vmem:[%s5585_s21 + $0x30] ss:$8 sps:$4 sm:$0xff]  }
 0xc44   : > { %4146 = vmatmul.mubr.msk.bf16.vlgmr.msra.gmra.mxu1 %vm1674_vm5, %v2458_v42  ;;  %v4438_v42 = vld [vmem:[%s5585_s21 + $0x24] ss:$8 sps:$4 sm:$0xff]  }
 0xc45   : > { %4157 = vmatprep.mubr.msk.bf16.mxu1 %vm4974_vm2, %v4973_v29 }
 0xca3   : > { %v2568_v43 = vpop.xlane.xlu0 %2567 }
 0xca4   : > { %4493 = vrcp.f32 %v2568_v43  ;;  %v4436_v43 = vld [vmem:[%s5585_s21 + $0x20] ss:$8 sps:$4 sm:$0xff]  }
 0xcab   : > { %v2679_v44 = vpop.xlane.xlu1 %2678 }
 0xcac   : > { %4495 = vrcp.f32 %v2679_v44  ;;  %v4441_v44 = vld [vmem:[%s5585_s21 + $0x14] ss:$8 sps:$4 sm:$0xff]  }
 0xcaf   : > { %v2684_v51 = vpop.permute.xlu1 %2683 }
 0xcb0   : > { %v2689_v53 = vsel %vm1691_vm4, %v2684_v51, 0 }
 0xcb1   : > { %v4494_v46 = vpop.eup %4493 }
 0xcb2   : > { %v2570_v48 = vmul.f32 %v4494_v46, %v4486_v26  ;;  %v4439_v46 = vld [vmem:[%s5585_s21 + $0x10] ss:$8 sps:$4 sm:$0xff]  }
 0xcb3   : > { %v2790_v47 = vpop.xlane.xlu0 %2789  ;;  %v2795_v55 = vpop.permute.xlu1 %2794 }
 0xcb4   : > { %4497 = vrcp.f32 %v2790_v47  ;;  %v2571_v16 = vpack.c.bf16 %v2570_v48, %v2570_v48  ;;  %v2800_v58 = vsel %vm1691_vm4, %v2795_v55, 0  ;;  %v4444_v47 = vld [vmem:[%s5585_s21 + $0x4] ss:$8 sps:$4 sm:$0xff]   ;;  %v4442_v48 = vld [vmem:[%s5585_s21] ss:$8 sps:$4 sm:$0xff]  }
 0xcb7   : > { %v2573_v49 = vpop.permute.xlu0 %2572 }
 0xcb8   : > { %v2578_v50 = vsel %vm1691_vm4, %v2573_v49, 0 }
 0xcb9   : > { %4156 = vmatpush3.bf16.msra.mxu1 %v2578_v50  ;;  %v4496_v52 = vpop.eup %4495 }
 0xcba   : > { %4167 = vmatprep.subr.bf16.mxu1 %v4973_v29  ;;  %v2681_v54 = vmul.f32 %v4496_v52, %v4488_v32  ;;  %v3924_v52 = vld [vmem:[%s1452_s9] ss:$0 sm:$0xff]  ;;  %s6123_s9 = scalar_lea.vmem [#allocation17], %s6110_s20 }
 0xcbc   : > { %4158 = vmatmul.mubr.msk.bf16.vlgmr.msra.gmra.mxu1 %vm1674_vm5, %v2571_v16  ;;  %v2682_v56 = vpack.c.bf16 %v2681_v54, %v2681_v54  ;;  %v3925_v54 = vld [vmem:[%s1455_s8] ss:$0 sm:$0xff]  ;;  %s6124_s8 = sld [smem:[#allocation63_spill]] }
 0xcbd   : > { %4168 = vmatpush3.bf16.msra.mxu1 %v2689_v53  ;;  %4169 = vmatprep.mubr.msk.bf16.mxu1 %vm4974_vm2, %v4973_v29 }
 0xcbe   : > { %4179 = vmatprep.subr.bf16.mxu1 %v4973_v29 }
 0xcc1   : > { %v4498_v57 = vpop.eup %4497 }
 0xcc2   : > { %v2792_v59 = vmul.f32 %v4498_v57, %v4490_v34  ;;  %p3952_p10 = scmp.ne.s32.totalorder %s6124_s8, 1 }
 0xcc3   : > { %s6127_s15 = sld [smem:[#allocation54_spill]] (!%p3952_p10) }
 0xcc4   : > { %4170 = vmatmul.mubr.msk.bf16.vlgmr.msra.gmra.mxu1 %vm1674_vm5, %v2682_v56  ;;  %v2793_v60 = vpack.c.bf16 %v2792_v59, %v2792_v59  ;;  %v4446_v59 = vld [vmem:[%s5589_s18 + $0x38] sm:$0xff]  }
 0xcc5   : > { %4180 = vmatpush3.bf16.msra.mxu1 %v2800_v58  ;;  %4181 = vmatprep.mubr.msk.bf16.mxu1 %vm4974_vm2, %v4973_v29  ;;  %v4445_v58 = vld [vmem:[%s5589_s18 + $0x78] sm:$0xff]  }
 0xccc   : > { %4182 = vmatmul.mubr.msk.bf16.vlgmr.msra.gmra.mxu1 %vm1674_vm5, %v2793_v60  ;;  %v4447_v60 = vld [vmem:[%s5589_s18 + $0x70] sm:$0xff]  }
 0xccd   : > { %3090 = vmatprep.mubr.bf16.mxu1 %v4972_v12  ;;  %v4432_v12 = vld [vmem:[%s6118_s14] sm:$0xff]  }
 0xcce   : > { %4192 = vmatpush3.bf16.msra.mxu0 %v4432_v12  ;;  %v4457_v12 = vld [vmem:[%s5589_s18 + $0x48] sm:$0xff]  }
 0xccf   : > { %4026 = vmatprep.subr.bf16.mxu0 %v4445_v58 }
 0xd04   : > { %v2502_v61 = vpop.f32.mrf.mxu1 }
 0xd06   : > { %v4147_v62 = vpop.f32.mrf.mxu1 }
 0xd07   : > { %v4449_v62 = vld [vmem:[%s5589_s18 + $0x68] sm:$0xff]  }
 0xd08   : > { %v2505_v63 = vpop.f32.mrf.mxu1 }
 0xd09   : > { %v4450_v63 = vld [vmem:[%s5589_s18 + $0x28] sm:$0xff]  }
 0xd0a   : > { %v4148_v0 = vpop.f32.mrf.mxu1 }
 0xd0b   : > { %v4451_v0 = vld [vmem:[%s5589_s18 + $0x60] sm:$0xff]  }
 0xd7c   : > { %v2614_v4 = vpop.f32.mrf.mxu1 }
 0xd7d   : > { %2843 = vrot.lane.b32.xlu0 %v2614_v4, %s4980_s3  ;;  %v4455_v4 = vld [vmem:[%s5589_s18 + $0x50] sm:$0xff]  }
 0xd7e   : > { %v4159_v5 = vpop.f32.mrf.mxu1 }
 0xd7f   : > { %v4456_v5 = vld [vmem:[%s5589_s18 + $0x10] sm:$0xff]  }
 0xd80   : > { %v2617_v6 = vpop.f32.mrf.mxu1 }
 0xd81   : > { %v4458_v6 = vld [vmem:[%s5589_s18 + $0x8] sm:$0xff]  }
 0xd82   : > { %v4160_v7 = vpop.f32.mrf.mxu1 }
 0xd83   : > { %v4459_v7 = vld [vmem:[%s5589_s18 + $0x40] sm:$0xff]  }
 0xd84   : > { %v2725_v8 = vpop.f32.mrf.mxu1 }
 0xd85   : > { %2847 = vrot.lane.b32.xlu1 %v2725_v8, %s4978_s12  ;;  %v4460_v8 = vld [vmem:[%s5589_s18] sm:$0xff]  }
 0xd86   : > { %v4171_v9 = vpop.f32.mrf.mxu1 }
 0xd87   : > { %v2969_v9 = vld [vmem:[%s6122_s26] sm:$0x3] }
 0xd88   : > { %v2728_v10 = vpop.f32.mrf.mxu1 }
 0xd89   : > { %v3008_v10 = vrot.slane %v2969_v9, %v1529_v30 }
 0xd8a   : > { %v4172_v11 = vpop.f32.mrf.mxu1 }
 0xd8b   : > { %v3012_v11 = vrot.slane %v2969_v9, %v1533_v39 }
 0xd8c   : > { %v2836_v13 = vpop.f32.mrf.mxu1 }
 0xd8d   : > { %2851 = vrot.lane.b32.xlu0 %v2836_v13, %s4977_s0 }
 0xd8e   : > { %v4183_v14 = vpop.f32.mrf.mxu1 }
 0xd90   : > { %v2839_v15 = vpop.f32.mrf.mxu1 }
 0xd92   : > { %v4184_v17 = vpop.f32.mrf.mxu1 }
 0xdef   : > { %v2844_v18 = vpop.permute.xlu0 %2843 }
 0xdf0   : > { %v2854_v29 = vsel %vm1625_vm3, %v2502_v61, %v2844_v18  ;;  %v4448_v61 = vld [vmem:[%s5589_s18 + $0x30] sm:$0xff]   ;;  %s6126_s18 = sld [smem:[#allocation53_spill]] (!%p3952_p10) }
 0xdf7   : > { %v2848_v19 = vpop.permute.xlu1 %2847 }
 0xdf8   : > { %v2855_v20 = vsel %vm2085_vm6, %v2854_v29, %v2848_v19 }
 0xdff   : > { %v2852_v21 = vpop.permute.xlu0 %2851 }
 0xe00   : > { %v2856_v22 = vsel %vm2087_vm7, %v2855_v20, %v2852_v21 }
 0xe01   : > { %v2857_v23 = vpack.c.bf16 %v2856_v22, %v2856_v22 }
 0xe03   : > { %4194 = vmatmul.mubr.msk.bf16.vlgmr.msra.gmra.mxu0 %vm1477_vm1, %v2857_v23 }
 0xe04   : > { %4027 = vmatpush3.bf16.msra.mxu0 %v4446_v59 }
 0xe05   : > { %4028 = vmatprep.subr.bf16.mxu0 %v4447_v60 }
 0xe08   : > { %4029 = vmatpush3.bf16.msra.mxu0 %v4448_v61 }
 0xe09   : > { %4030 = vmatprep.subr.bf16.mxu0 %v4449_v62 }
 0xe0c   : > { %4031 = vmatpush3.bf16.msra.mxu0 %v4450_v63 }
 0xe0d   : > { %4032 = vmatprep.subr.bf16.mxu0 %v4451_v0 }
 0xe10   : > { %4033 = vmatpush3.bf16.msra.mxu0 %v4452_v2 }
 0xe11   : > { %4034 = vmatprep.subr.bf16.mxu0 %v4453_v1 }
 0xe14   : > { %4035 = vmatpush3.bf16.msra.mxu0 %v4454_v3 }
 0xe15   : > { %4036 = vmatprep.subr.bf16.mxu0 %v4455_v4 }
 0xe18   : > { %4037 = vmatpush3.bf16.msra.mxu0 %v4456_v5 }
 0xe19   : > { %4038 = vmatprep.subr.bf16.mxu0 %v4457_v12 }
 0xe1c   : > { %4039 = vmatpush3.bf16.msra.mxu0 %v4458_v6 }
 0xe1d   : > { %4040 = vmatprep.subr.bf16.mxu0 %v4459_v7 }
 0xe20   : > { %4041 = vmatpush3.bf16.msra.mxu0 %v4460_v8 }
 0xec3   : > { %v2925_v25 = vpop.f32.mrf.mxu0 }
 0xec4   : > { %v2926_v26 = vadd.f32 %v3918_v24, %v2925_v25 }
 0xec5   : > { %v4195_v27 = vpop.f32.mrf.mxu0 }
 0xec6   : > { %v5845_v31 = vadd.f32 %v2926_v26, %v5726_v45  ;;  %v4435_v45 = vld [vmem:[%s5585_s21 + $0x34] ss:$8 sps:$4 sm:$0xff]   ;;  %s6125_s21 = sld [smem:[#allocation55_spill]] (!%p3952_p10) }
 0xec7   : > { %v2928_v32 = vpop.f32.mrf.mxu0  ;;  %3066 = vmatprep.subr.bf16.mxu1 %v4435_v45 }
 0xec8   : > { %v2934_v33 = vsel %vm1477_vm1, %v5845_v31, 0.0  ;;  %3067 = vmatpush1.bf16.msra.mxu1 %v4433_v41  ;;  %v3935_v41 = vld [vmem:[%s6123_s9] ss:$0 sm:$0xff] }
 0xec9   : > { %2935 = vadd.xlane.f32.xlu1 %v2934_v33  ;;  %v4196_v34 = vpop.f32.mrf.mxu0  ;;  %3068 = vmatprep.subr.bf16.mxu1 %v4438_v42 }
 0xecc   : > { %3069 = vmatpush1.bf16.msra.mxu1 %v4436_v43 }
 0xecd   : > { %3070 = vmatprep.subr.bf16.mxu1 %v4441_v44 }
 0xed0   : > { %3071 = vmatpush1.bf16.msra.mxu1 %v4439_v46 }
 0xed1   : > { %3072 = vmatprep.subr.bf16.mxu1 %v4444_v47 }
 0xed4   : > { %3073 = vmatpush1.bf16.msra.mxu1 %v4442_v48 }
 0xf52   : > { %v2936_v35 = vpop.xlane.xlu1 %2935 }
 0xf53   : > { %v2937_v36 = vmul.f32 0.015625, %v2936_v35 }
 0xf55   : > { %v2938_v37 = vsub.f32 %v5845_v31, %v2937_v36 }
 0xf57   : > { %v2939_v38 = vmul.f32 %v2938_v37, %v2938_v37 }
 0xf59   : > { %v2940_v40 = vsel %vm1477_vm1, %v2939_v38, 0.0 }
 0xf5a   : > { %2941 = vadd.xlane.f32.xlu0 %v2940_v40 }
 0xfe3   : > { %v2942_v49 = vpop.xlane.xlu0 %2941 }
 0xfe4   : > { %v2943_v50 = vmul.f32 0.015625, %v2942_v49 }
 0xfe6   : > { %v2944_v51 = vadd.f32 1e-05, %v2943_v50 }
 0xfe8   : > { %4499 = vrsqrt.f32 %v2944_v51 }
 0xff5   : > { %v4500_v16 = vpop.eup %4499 }
 0xff6   : > { %v2946_v53 = vmul.f32 %v4500_v16, %v2938_v37 }
 0xff8   : > { %v2953_v55 = vmul.f32 %v3924_v52, %v2946_v53 }
 0xffa   : > { %v2960_v56 = vadd.f32 %v3925_v54, %v2953_v55 }
 0xffc   : > { %v3003_v57 = vpack.c.bf16 %v2960_v56, %v2960_v56 }
 0xffe   : > { %3934 = vmatmul.mubr.msk.bf16.vlgmr.msra.gmra.mxu1 %vm1477_vm1, %v3003_v57 }
0x10be   : > { %v3092_v13 = vpop.f32.mrf.mxu1 }
0x10bf   : > { %v3093_v14 = vadd.f32 %v3092_v13, %v3008_v10 }
0x10c0   : > { %v3094_v15 = vpop.f32.mrf.mxu1 }
0x10c1   : > { %v3099_v17 = vmul.f32 %v3093_v14, %v3093_v14  ;;  %v3095_v18 = vadd.f32 %v3094_v15, %v3012_v11 }
0x10c2   : > { %v3096_v19 = vpop.f32.mrf.mxu1 }
0x10c3   : > { %v3101_v29 = vmul.f32 %v3099_v17, %v3093_v14  ;;  %v3100_v20 = vmul.f32 %v3095_v18, %v3095_v18 }
0x10c4   : > { %v3097_v21 = vpop.f32.mrf.mxu1 }
0x10c5   : > { %v3103_v22 = vmul.f32 0.044715, %v3101_v29  ;;  %v3102_v23 = vmul.f32 %v3100_v20, %v3095_v18 }
0x10c7   : > { %v3105_v24 = vadd.f32 %v3103_v22, %v3093_v14  ;;  %v3104_v25 = vmul.f32 0.044715, %v3102_v23 }
0x10c9   : > { %v3107_v26 = vmul.f32 0.7978846, %v3105_v24  ;;  %v3106_v27 = vadd.f32 %v3104_v25, %v3095_v18 }
0x10cb   : > { %4501 = vtanh.f32 %v3107_v26  ;;  %v3108_v30 = vmul.f32 0.7978846, %v3106_v27 }
0x10cd   : > { %4503 = vtanh.f32 %v3108_v30 }
0x10d8   : > { %v4502_v28 = vpop.eup %4501 }
0x10d9   : > { %v3111_v39 = vadd.f32 1.0, %v4502_v28 }
0x10da   : > { %v4504_v32 = vpop.eup %4503 }
0x10db   : > { %v3112_v33 = vadd.f32 1.0, %v4504_v32  ;;  %v3113_v34 = vmul.f32 0.5, %v3111_v39 }
0x10dd   : > { %v3114_v35 = vmul.f32 0.5, %v3112_v33  ;;  %v3115_v36 = vmul.f32 %v3113_v34, %v3093_v14 }
0x10df   : > { %v3116_v37 = vmul.f32 %v3114_v35, %v3095_v18  ;;  %v3117_v40 = vpack.c.bf16 %v3115_v36, %v3115_v36 }
0x10e1   : > { %v3118_v38 = vpack.c.bf16 %v3116_v37, %v3116_v37 }
0x10e3   : > { %3253 = vmatprep.mubr.bf16.mxu0 %v3118_v38 }
0x10e4   : > { %3254 = vmatmul.mubr.bf16.vlgmr.msra.gmra.mxu0 %v3117_v40 }
0x11a4   : > { %v4042_v45 = vpop.f32.mrf.mxu0 }
0x11a6   : > { %v4043_v42 = vpop.f32.mrf.mxu0 }
0x11a7   : > { %v4044_v43 = vadd.f32 %v4043_v42, %v4042_v45 }
0x11a8   : > { %v4045_v44 = vpop.f32.mrf.mxu0 }
0x11a9   : > { %v3256_v46 = vadd.f32 %v4044_v43, %v3935_v41  ;;  %3266 = sbr.rel (%p3952_p10) target bundleno = 5035 (0x13ab), region = 184 }
0x11aa   : > { %v4046_v47 = vpop.f32.mrf.mxu0 }
0x11ab   : > { %v3261_v48 = vadd.f32 %v3256_v46, %v5845_v31 }
0x11ad   : > { %3262 = vst.msk [vmem:[#allocation2] sm:$0xff] %vm1477_vm1, %v3261_v48 }
0x11ae   : > { %v3269_v49 = vsel %vm1477_vm1, %v3261_v48, 0.0  ;;  %v4505_v31 = vld [vmem:[%s6125_s21 + $0x18] sm:$0xff]   ;;  %v4982_v54 = vmov 0.0   ;;  %vm4983_vm8 = vmmov 0   ;;  %v4506_v55 = vld [vmem:[%s6125_s21 + $0x10] sm:$0xff]   ;;  %v4507_v56 = vld [vmem:[%s6125_s21 + $0x8] sm:$0xff]  }
0x11af   : > { %3270 = vadd.xlane.f32.xlu0 %v3269_v49  ;;  %4197 = vmatprep.subr.bf16.mxu0 %v4982_v54  ;;  %v4508_v57 = vld [vmem:[%s6125_s21] sm:$0xff]   ;;  %v3955_v4 = vld [vmem:[#allocation18] ss:$0 sm:$0xff] }
0x11b0   : > { %4205 = vmatprep.mubr.msk.bf16.mxu0 %vm4983_vm8, %v4982_v54  ;;  %4198 = vmatpush3.bf16.msra.mxu0 %v4505_v31  ;;  %v3953_v62 = vld [vmem:[%s6126_s18] ss:$0 sm:$0xff] }
0x11b1   : > { %4199 = vmatprep.subr.bf16.mxu0 %v4982_v54  ;;  %v3954_v0 = vld [vmem:[%s6127_s15] ss:$0 sm:$0xff] }
0x11b4   : > { %4200 = vmatpush3.bf16.msra.mxu0 %v4506_v55 }
0x11b5   : > { %4201 = vmatprep.subr.bf16.mxu0 %v4982_v54 }
0x11b8   : > { %4202 = vmatpush3.bf16.msra.mxu0 %v4507_v56 }
0x11b9   : > { %4203 = vmatprep.subr.bf16.mxu0 %v4982_v54 }
0x11bc   : > { %4204 = vmatpush3.bf16.msra.mxu0 %v4508_v57 }
0x1238   : > { %v3271_v50 = vpop.xlane.xlu0 %3270 }
0x1239   : > { %v3272_v51 = vmul.f32 0.015625, %v3271_v50 }
0x123b   : > { %v3273_v16 = vsub.f32 %v3261_v48, %v3272_v51 }
0x123d   : > { %v3274_v52 = vmul.f32 %v3273_v16, %v3273_v16 }
0x123f   : > { %v3275_v53 = vsel %vm1477_vm1, %v3274_v52, 0.0 }
0x1240   : > { %3276 = vadd.xlane.f32.xlu0 %v3275_v53 }
0x12c9   : > { %v3277_v58 = vpop.xlane.xlu0 %3276 }
0x12ca   : > { %v3278_v59 = vmul.f32 0.015625, %v3277_v58 }
0x12cc   : > { %v3279_v60 = vadd.f32 1e-05, %v3278_v59 }
0x12ce   : > { %4509 = vrsqrt.f32 %v3279_v60 }
0x12db   : > { %v4510_v61 = vpop.eup %4509 }
0x12dc   : > { %v3281_v63 = vmul.f32 %v4510_v61, %v3273_v16 }
0x12de   : > { %v3288_v2 = vmul.f32 %v3953_v62, %v3281_v63 }
0x12e0   : > { %v3295_v1 = vadd.f32 %v3954_v0, %v3288_v2 }
0x12e2   : > { %v3296_v3 = vpack.c.bf16 %v3295_v1, %v3295_v1 }
0x12e4   : > { %4206 = vmatmul.mubr.msk.bf16.vlgmr.msra.gmra.mxu0 %vm1477_vm1, %v3296_v3 }
0x13a4   : > { %v3373_v5 = vpop.f32.mrf.mxu0 }
0x13a5   : > { %v3374_v12 = vadd.f32 %v3955_v4, %v3373_v5 }
0x13a6   : > { %v4207_v6 = vpop.f32.mrf.mxu0 }
0x13a7   : > { %3379 = vst [vmem:[%s1408_s4] sm:$0xff] %v3374_v12 }
0x13a8   : > { %v3376_v7 = vpop.f32.mrf.mxu0 }
0x13aa   : > { %v4208_v8 = vpop.f32.mrf.mxu0 }
0x13ab PF: > { %s6128_s23 = sld [smem:[#allocation64_spill]]  ;;  %s3394_s24 = sshll.u32 %s1408_s4, 4  ;;  %s3395_s24 = int_to_ptr.vmem [resolvable:$true] %s3394_s24 }
0x13ac   : > { %s6129_s7 = sld [smem:[#allocation57_spill]]  ;;  %s4789_s6 = scalar_lea.vmem %s3395_s24, 128 }
0x13ad   : > { %s6131_s28 = sld [smem:[#allocation59_spill]]  ;;  %p4790_p11 = scmp.ne.s32.totalorder %s3395_s24, %s4789_s6 }
0x13ae   : > { %s6132_s0 = sld [smem:[#allocation71_spill]]  ;;  %s4984_s20 = smov [#allocation20]  }
0x13af   : > { %s4793_s13 = sshll.u32 %s4984_s20, 4  ;;  %s4794_s13 = int_to_ptr.vmem [resolvable:$false] %s4793_s13 }
0x13b0   : > { %s4795_s19 = scalar_lea.vmem %s4794_s13, 256  ;;  %p4796_p4 = scmp.lt.s32.totalorder %s3395_s24, %s4794_s13 }
0x13b1   : > { %s3962_s17 = sshll.u32 %s6128_s23, 7  ;;  %p4797_p0 = scmp.lt.s32.totalorder %s4795_s19, %s4789_s6 }
0x13b2   : > { %s6130_s12 = smov %s6129_s7  ;;  %s3392_s3 = scalar_lea.hbm %s6129_s7, %s3962_s17 }
0x13b3   : > { %s6133_s22 = sand.u32 1, %s6131_s28   ;;  %p4798_p7 = por %p4797_p0, %p4796_p4 }
0x13b4   : > { %s3381_s27 = scalar_lea.sflag [#allocation5], %s6133_s22  ;;  %p6134_p13 = scmp.ne.s32.totalorder %s6132_s0, 0 }
0x13b6   : > { %p4791_p1 = pnand %p4790_p11, %p6134_p13 }
0x13b8   : > { %p4792_p5 = pneg %p4791_p1 }
0x13ba   : > { %p4799_p8 = pnand %p4798_p7, %p4792_p5 }
0x13bc   : > { %4802 = shalt.err (!%p4799_p8)
}
0x13bd   : > { %s4803_s5 = scalar_lea.hbm %s3392_s3, 128  ;;  %s4807_s16 = scalar_lea.hbm %s6130_s12, 256 }
0x13be   : > { %p4804_p6 = scmp.ne.s32.totalorder %s3392_s3, %s4803_s5  ;;  %p4808_p3 = scmp.lt.s32.totalorder %s3392_s3, %s6130_s12 }
0x13bf   : > { %p4809_p9 = scmp.lt.s32.totalorder %s4807_s16, %s4803_s5 }
0x13c0   : > { %p4805_p12 = pnand %p4804_p6, %p6134_p13 }
0x13c1   : > { %p4810_p10 = por %p4809_p9, %p4808_p3 }
0x13c2   : > { %p4806_p2 = pneg %p4805_p12 }
0x13c4   : > { %p4811_p11 = pnand %p4810_p10, %p4806_p2 }
0x13c6   : > { %4814 = shalt.err (!%p4811_p11)
}
0x13c7   : > { %4231 = dma.vmem_to_hbm [thread:$0]  (%p6134_p13), %s3395_s24, 128, %s3392_s3, %s3381_s27  }
0x13c8 PF: > { %s6135_s4 = sld [smem:[#allocation67_spill]] }
0x13c9   : > { %s6136_s1 = sld [smem:[#allocation58_spill]] }
0x13ca   : > { %s6137_s2 = sld [smem:[#allocation72_spill]] }
0x13ce   : > { %p4272_p1 = scmp.ge.s32.totalorder %s6135_s4, 2 }
0x13cf   : > { %s3406_s29 = sand.u32 1, %s6136_s1  }
0x13d0   : > { %p6138_p5 = scmp.ne.s32.totalorder %s6137_s2, 0  ;;  %s3407_s30 = scalar_lea.sflag [#allocation5], %s3406_s29 }
0x13d2   : > { %p4266_p4 = pnand %p4272_p1, %p6138_p5 }
0x13d4   : > { %p4267_p0 = pneg %p4266_p4 }
0x13d6   : > { %4884 = dma.done.wait (%p4267_p0), %s3407_s30, 128  }
0x13d7   : > { %4886 = vsyncadd (%p4267_p0), %s3407_s30, 4294967168  ;;  %s88_s28 = sadd.s32 1, %s6135_s4   ;;  %s6139_s7 = sld [smem:[#allocation59_spill]] }
0x13d8   : > { %p85_p7 = scmp.ge.s32.totalorder %s88_s28, 6   ;;  %s6140_s10 = sld [smem:[#allocation60_spill]] }
0x13d9   : > { %s6141_s11 = sld [smem:[#allocation73_spill]] }
0x13da   : > { %s6142_s0 = sld [smem:[#allocation61_spill]] }
0x13db   : > { %s6143_s15 = sld [smem:[#allocation62_spill]] }
0x13dc   : > { %s6144_s16 = sld [smem:[#allocation69_spill]]  ;;  %87 = sbr.rel (!%p85_p7) target bundleno = 84 (0x54), region = 363 }
0x13dd   : > { %s6145_s18 = sld [smem:[#allocation65_spill]] }
0x13de   : > { %s6146_s22 = sld [smem:[#allocation66_spill]] }
0x13df   : > { %s6147_s23 = sld [smem:[#allocation68_spill]] }
0x13e0   : > { %s6148_s26 = sld [smem:[#allocation70_spill]] }
0x13e1   :  { %3412 = vsyncpa [#allocation4], 1 }
0x13e2   :  { %3414 = vsyncpa [#allocation4 + $0x1], 1 }
0x13e3   :  { %3415 = vsyncpa [#allocation7], 1 }
0x13e4   :  { %3417 = vsyncpa [#allocation7 + $0x1], 1 }
0x13e5   :  { %3418 = vsyncpa [#allocation10], 1 }
0x13e6   :  { %3420 = vsyncpa [#allocation10 + $0x1], 1 }
0x13e7   :  { %3421 = vsyncpa [#allocation13], 1 }
0x13e8   :  { %3423 = vsyncpa [#allocation13 + $0x1], 1 }
0x13e9   :  { %3424 = vsyncpa [#allocation16], 1 }
0x13ea   :  { %3426 = vsyncpa [#allocation16 + $0x1], 1 }
0x13eb   :  { %3427 = vsyncpa [#allocation19], 1 }
0x13ec   :  { %3428 = vsyncpa [#allocation5], 1 }
0x13ed   :  { %3430 = vsyncpa [#allocation5 + $0x1], 1 }

</bundles_post_ra>
